<compile_context>
chip_gen: v7x
topology: tpu7x:2x2x1
jax: 0.10.0
libtpu: 0.0.40
codegen_flags: <defaults>
</compile_context>

<pallas_src>
import functools

import jax
import jax.numpy as jnp
from jax.experimental import pallas as pl
from jax.experimental.pallas import tpu as pltpu


# ----------------------------------------------------------------------------
# Fused kernel: conv stack (polyphase) + adaptive pool + fc1/BN/ReLU + fc2
# ----------------------------------------------------------------------------
def _fused_kernel(*refs, bblk, lp0, has_pool):
    if has_pool:
        (xph_ref, w0_ref, wr_ref, csh_ref, pool_ref,
         w1_ref, s1_ref, w2_ref, b2_ref, o_ref) = refs
    else:
        (xph_ref, w0_ref, wr_ref, csh_ref,
         w1_ref, s1_ref, w2_ref, b2_ref, o_ref) = refs
        pool_ref = None

    # ---- helpers: per-batch-element +-1 row shifts with zero fill ----------
    def shift_down(a):          # out[s] = a[s-1]; 0 at s == 0      (per element)
        zrow = jnp.zeros((1, a.shape[1]), a.dtype)
        pieces = []
        for b in range(bblk):
            pieces.append(zrow)
            pieces.append(a[b * lp0:(b + 1) * lp0 - 1, :])
        return jnp.concatenate(pieces, axis=0)

    def shift_up(a):            # out[s] = a[s+1]; 0 at s == lp0-1  (per element)
        zrow = jnp.zeros((1, a.shape[1]), a.dtype)
        pieces = []
        for b in range(bblk):
            pieces.append(a[b * lp0 + 1:(b + 1) * lp0, :])
            pieces.append(zrow)
        return jnp.concatenate(pieces, axis=0)

    # ---- conv stack in polyphase form --------------------------------------
    # phases[p] has shape (bblk*lp0, C); phases[p][b*lp0 + s] = x[b, s*P + p].
    phases = [xph_ref[p] for p in range(16)]
    for layer in range(4):
        p_in = len(phases)                # 16, 8, 4, 2
        q_out = p_in // 2                 # 8, 4, 2, 1
        wcat = w0_ref[...] if layer == 0 else wr_ref[layer - 1]  # (5*Cin, 64)
        shift = csh_ref[layer:layer + 1, :]                      # (1, 64) f32
        # arrs[a][b*lp0+s] == x[b, s*p_in + a] for a in [-2, p_in], 0 outside.
        arrs = {a: phases[a] for a in range(p_in)}
        arrs[-2] = shift_down(phases[p_in - 2])
        arrs[-1] = shift_down(phases[p_in - 1])
        arrs[p_in] = shift_up(phases[0])
        new_phases = []
        for q in range(q_out):
            # One K=5*Cin matmul per output phase (taps concatenated on lanes).
            xq = jnp.concatenate([arrs[2 * q - 2 + k] for k in range(5)],
                                 axis=-1)                        # (M, 5*Cin)
            acc = jnp.dot(xq, wcat, preferred_element_type=jnp.float32)
            y = jnp.maximum(acc + shift, 0.0)
            # TODO(synk): Dropout(0.2) is identity in eval/inference mode.
            if layer == 3 and has_pool:
                new_phases.append(y)                  # keep f32 for the pool
            else:
                new_phases.append(y.astype(jnp.bfloat16))
        phases = new_phases

    act = phases[0]                    # (bblk*lp0, 64), positions in order

    # ---- AdaptiveAvgPool1d(32): identity when lp0 == 32 --------------------
    if has_pool:
        pm = pool_ref[...]             # (32, lp0) f32 (torch bin edges)
        rows = []
        for b in range(bblk):
            ab = act[b * lp0:(b + 1) * lp0, :]
            rows.append(jnp.dot(pm, ab, preferred_element_type=jnp.float32
                                ).astype(jnp.bfloat16))
        pooled = jnp.concatenate(rows, axis=0)        # (bblk*32, 64) bf16
    else:
        pooled = act                                  # lp0 == 32 already

    # ---- flatten to (bblk, 2048) in p*64+c order (fc1 columns permuted) ----
    feat_rows = []
    for b in range(bblk):
        base = b * 32
        pieces = [pooled[base + p: base + p + 1, :] for p in range(32)]
        feat_rows.append(jnp.concatenate(pieces, axis=-1))       # (1, 2048)
    feats = jnp.concatenate(feat_rows, axis=0)                   # (bblk, 2048)

    # ---- fc1 + BN + ReLU (+Dropout id) -> fc2 -------------------------------
    h = jnp.dot(feats, w1_ref[...], preferred_element_type=jnp.float32)
    h = jnp.maximum(h + s1_ref[...], 0.0)
    # TODO(synk): Dropout(0.5) is identity in eval/inference mode.
    logits = jnp.dot(h.astype(jnp.bfloat16), w2_ref[...],
                     preferred_element_type=jnp.float32)
    o_ref[0] = (logits + b2_ref[...]).astype(o_ref.dtype)


# ----------------------------------------------------------------------------
# Torch-style AdaptiveAvgPool1d as a (out_size, length) row-stochastic matrix.
# ----------------------------------------------------------------------------
def _adaptive_pool_matrix(length, out_size):
    mat = jnp.zeros((out_size, length), jnp.float32)
    for i in range(out_size):
        start = (i * length) // out_size
        end = -(-((i + 1) * length) // out_size)      # ceil
        mat = mat.at[i, start:end].set(1.0 / (end - start))
    return mat


# ----------------------------------------------------------------------------
# Full forward pass (eval mode)
# ----------------------------------------------------------------------------
def adaptive_classifier_forward(x_ncl, params, *, eps=1e-5, block_batch=None):
    B, d_model, L = x_ncl.shape                       # PyTorch NCL layout
    if L % 16 != 0:
        raise ValueError("sequence length must be a multiple of 16 "
                         "(four stride-2 convolutions)")
    lp0 = L // 16                                     # per-element phase length
    if block_batch is None:
        block_batch = 1 if B < 2 else max(1, min(8, B // 2))
    bblk = block_batch
    g = -(-B // bblk)
    b_pad = g * bblk

    # ---- input: channels-last, 16-way polyphase split (XLA, trace time) ----
    x = jnp.transpose(x_ncl, (0, 2, 1))               # (B, L, C)
    if b_pad > B:
        x = jnp.pad(x, ((0, b_pad - B), (0, 0), (0, 0)))
    x = x.reshape(b_pad, lp0, 16, d_model)            # position i = s*16 + p
    x = jnp.transpose(x, (2, 0, 1, 3)).reshape(16, b_pad * lp0, d_model)
    x_ph = x.astype(jnp.bfloat16)                     # (16, b_pad*lp0, d_model)

    # ---- conv weights: fold BN scale, stack 5 taps along K -----------------
    wcats, shifts = [], []
    for layer in params["conv_layers"]:
        w, b = layer["w"], layer["b"]                 # (64, cin, 5), (64,)
        scale = layer["gamma"] * jax.lax.rsqrt(layer["var"] + eps)
        shifts.append((b - layer["mean"]) * scale + layer["beta"])
        w = w * scale[:, None, None]                  # fold BN scale
        wcats.append(jnp.concatenate(
            [jnp.transpose(w[:, :, k]) for k in range(5)],
            axis=0).astype(jnp.bfloat16))             # (5*cin, 64)
    w0 = wcats[0]                                     # (5*d_model, 64)
    wrest = jnp.stack(wcats[1:], 0)                   # (3, 320, 64)
    cshift = jnp.stack(shifts, 0).astype(jnp.float32)  # (4, 64)

    has_pool = (lp0 != 32)                            # identity when L == 512

    # ---- fc weights (BN folded, fc1 columns permuted to p*64+c order) ------
    fc1, fc2 = params["fc1"], params["fc2"]
    hidden = fc1["w"].shape[0]                        # 256
    scale1 = fc1["gamma"] * jax.lax.rsqrt(fc1["var"] + eps)
    shift1 = (fc1["b"] - fc1["mean"]) * scale1 + fc1["beta"]
    w1 = fc1["w"].reshape(hidden, 64, 32)             # torch feature = c*32+p
    w1 = jnp.transpose(w1, (2, 1, 0)).reshape(32 * 64, hidden)  # row = p*64+c
    w1 = (w1 * scale1[None, :]).astype(jnp.bfloat16)
    shift1 = shift1.reshape(1, hidden).astype(jnp.float32)

    num_classes = fc2["w"].shape[0]
    n2 = ((num_classes + 127) // 128) * 128           # lane-dense logits
    w2 = jnp.pad(jnp.transpose(fc2["w"]), ((0, 0), (0, n2 - num_classes)))
    w2 = w2.astype(jnp.bfloat16)
    b2 = jnp.pad(fc2["b"], (0, n2 - num_classes)).reshape(1, n2)
    b2 = b2.astype(jnp.float32)

    in_specs = [
        pl.BlockSpec((16, bblk * lp0, d_model), lambda i: (0, i, 0)),
        pl.BlockSpec((5 * d_model, 64), lambda i: (0, 0)),
        pl.BlockSpec((3, 320, 64), lambda i: (0, 0, 0)),
        pl.BlockSpec((4, 64), lambda i: (0, 0)),
    ]
    args = [x_ph, w0, wrest, cshift]
    if has_pool:
        pool_mat = _adaptive_pool_matrix(lp0, 32)     # (32, lp0) f32
        in_specs.append(pl.BlockSpec((32, lp0), lambda i: (0, 0)))
        args.append(pool_mat)
    in_specs += [
        pl.BlockSpec((32 * 64, hidden), lambda i: (0, 0)),
        pl.BlockSpec((1, hidden), lambda i: (0, 0)),
        pl.BlockSpec((hidden, n2), lambda i: (0, 0)),
        pl.BlockSpec((1, n2), lambda i: (0, 0)),
    ]
    args += [w1, shift1, w2, b2]

    out = pl.pallas_call(
        functools.partial(_fused_kernel, bblk=bblk, lp0=lp0, has_pool=has_pool),
        out_shape=jax.ShapeDtypeStruct((g, bblk, n2), jnp.float32),
        grid_spec=pltpu.PrefetchScalarGridSpec(
            num_scalar_prefetch=0,
            grid=(g,),
            in_specs=in_specs,
            out_specs=pl.BlockSpec((1, bblk, n2), lambda i: (i, 0, 0)),
        ),
        compiler_params=pltpu.CompilerParams(
            dimension_semantics=("parallel",),
            vmem_limit_bytes=32 * 1024 * 1024),
    )(*args)

    return out.reshape(b_pad, n2)[:B, :num_classes]


# ----------------------------------------------------------------------------
# Deterministic parameter initialization (matches the module's shapes)
# ----------------------------------------------------------------------------
def init_params(key, d_model, num_classes):
    keys = jax.random.split(key, 16)
    ki = 0
    conv_layers = []
    cin = d_model
    for _ in range(4):
        w = 0.05 * jax.random.normal(keys[ki], (64, cin, 5), jnp.float32); ki += 1
        b = 0.05 * jax.random.normal(keys[ki], (64,), jnp.float32); ki += 1
        conv_layers.append(dict(
            w=w, b=b,
            gamma=jnp.ones((64,), jnp.float32),
            beta=jnp.zeros((64,), jnp.float32),
            mean=jnp.zeros((64,), jnp.float32),
            var=jnp.ones((64,), jnp.float32)))
        cin = 64
    fc1 = dict(
        w=0.02 * jax.random.normal(keys[ki], (256, 64 * 32), jnp.float32),
        b=0.02 * jax.random.normal(keys[ki + 1], (256,), jnp.float32),
        gamma=jnp.ones((256,), jnp.float32),
        beta=jnp.zeros((256,), jnp.float32),
        mean=jnp.zeros((256,), jnp.float32),
        var=jnp.ones((256,), jnp.float32))
    ki += 2
    fc2 = dict(
        w=0.02 * jax.random.normal(keys[ki], (num_classes, 256), jnp.float32),
        b=0.02 * jax.random.normal(keys[ki + 1], (num_classes,), jnp.float32))
    return dict(conv_layers=conv_layers, fc1=fc1, fc2=fc2)


if __name__ == "__main__":
    d_model, num_classes = 16, 10
    B, L = 4, 512   # L=512 -> conv lengths 256/128/64/32 -> pool(32) identity

    key = jax.random.PRNGKey(0)
    kx, kp = jax.random.split(key)
    x = jax.random.normal(kx, (B, d_model, L), jnp.float32)
    params = init_params(kp, d_model, num_classes)

    fwd = jax.jit(adaptive_classifier_forward)
    logits = fwd(x, params)
    jax.block_until_ready(logits)
    assert logits.shape == (B, num_classes), logits.shape
    assert bool(jnp.all(jnp.isfinite(logits)))
    print("KERNEL_OK")
</pallas_src>

<mosaic_0001>
module attributes {stable_mosaic.version = 11 : i64} {
  func.func @_fused_kernel(%arg0: i32, %arg1: memref<16x64x16xbf16, #tpu.memory_space<vmem>>, %arg2: memref<80x64xbf16, #tpu.memory_space<vmem>>, %arg3: memref<3x320x64xbf16, #tpu.memory_space<vmem>>, %arg4: memref<4x64xf32, #tpu.memory_space<vmem>>, %arg5: memref<2048x256xbf16, #tpu.memory_space<vmem>>, %arg6: memref<1x256xf32, #tpu.memory_space<vmem>>, %arg7: memref<256x128xbf16, #tpu.memory_space<vmem>>, %arg8: memref<1x128xf32, #tpu.memory_space<vmem>>, %arg9: memref<1x2x128xf32, #tpu.memory_space<vmem>>) attributes {dimension_semantics = [#tpu.dimension_semantics<parallel>], iteration_bounds = array<i64: 2>, scalar_prefetch = 0 : i64, scratch_operands = 0 : i64, tpu.core_type = #tpu.core_type<tc>, window_params = [{transform_indices = @transform_0, window_bounds = array<i64: 16, 64, 16>}, {pipeline_mode = #tpu.pipeline_mode<synchronous>, transform_indices = @transform_1, window_bounds = array<i64: 80, 64>}, {pipeline_mode = #tpu.pipeline_mode<synchronous>, transform_indices = @transform_2, window_bounds = array<i64: 3, 320, 64>}, {pipeline_mode = #tpu.pipeline_mode<synchronous>, transform_indices = @transform_3, window_bounds = array<i64: 4, 64>}, {pipeline_mode = #tpu.pipeline_mode<synchronous>, transform_indices = @transform_4, window_bounds = array<i64: 2048, 256>}, {pipeline_mode = #tpu.pipeline_mode<synchronous>, transform_indices = @transform_5, window_bounds = array<i64: 1, 256>}, {pipeline_mode = #tpu.pipeline_mode<synchronous>, transform_indices = @transform_6, window_bounds = array<i64: 256, 128>}, {pipeline_mode = #tpu.pipeline_mode<synchronous>, transform_indices = @transform_7, window_bounds = array<i64: 1, 128>}, {transform_indices = @transform_8, window_bounds = array<i64: 1, 2, 128>}]} {
    %c0 = arith.constant 0 : index
    %c0_0 = arith.constant 0 : index
    %c0_1 = arith.constant 0 : index
    %0 = vector.load %arg1[%c0, %c0_0, %c0_1] : memref<16x64x16xbf16, #tpu.memory_space<vmem>>, vector<1x64x16xbf16>
    %1 = vector.shape_cast %0 : vector<1x64x16xbf16> to vector<64x16xbf16>
    %c1 = arith.constant 1 : index
    %c0_2 = arith.constant 0 : index
    %c0_3 = arith.constant 0 : index
    %2 = vector.load %arg1[%c1, %c0_2, %c0_3] : memref<16x64x16xbf16, #tpu.memory_space<vmem>>, vector<1x64x16xbf16>
    %3 = vector.shape_cast %2 : vector<1x64x16xbf16> to vector<64x16xbf16>
    %c2 = arith.constant 2 : index
    %c0_4 = arith.constant 0 : index
    %c0_5 = arith.constant 0 : index
    %4 = vector.load %arg1[%c2, %c0_4, %c0_5] : memref<16x64x16xbf16, #tpu.memory_space<vmem>>, vector<1x64x16xbf16>
    %5 = vector.shape_cast %4 : vector<1x64x16xbf16> to vector<64x16xbf16>
    %c3 = arith.constant 3 : index
    %c0_6 = arith.constant 0 : index
    %c0_7 = arith.constant 0 : index
    %6 = vector.load %arg1[%c3, %c0_6, %c0_7] : memref<16x64x16xbf16, #tpu.memory_space<vmem>>, vector<1x64x16xbf16>
    %7 = vector.shape_cast %6 : vector<1x64x16xbf16> to vector<64x16xbf16>
    %c4 = arith.constant 4 : index
    %c0_8 = arith.constant 0 : index
    %c0_9 = arith.constant 0 : index
    %8 = vector.load %arg1[%c4, %c0_8, %c0_9] : memref<16x64x16xbf16, #tpu.memory_space<vmem>>, vector<1x64x16xbf16>
    %9 = vector.shape_cast %8 : vector<1x64x16xbf16> to vector<64x16xbf16>
    %c5 = arith.constant 5 : index
    %c0_10 = arith.constant 0 : index
    %c0_11 = arith.constant 0 : index
    %10 = vector.load %arg1[%c5, %c0_10, %c0_11] : memref<16x64x16xbf16, #tpu.memory_space<vmem>>, vector<1x64x16xbf16>
    %11 = vector.shape_cast %10 : vector<1x64x16xbf16> to vector<64x16xbf16>
    %c6 = arith.constant 6 : index
    %c0_12 = arith.constant 0 : index
    %c0_13 = arith.constant 0 : index
    %12 = vector.load %arg1[%c6, %c0_12, %c0_13] : memref<16x64x16xbf16, #tpu.memory_space<vmem>>, vector<1x64x16xbf16>
    %13 = vector.shape_cast %12 : vector<1x64x16xbf16> to vector<64x16xbf16>
    %c7 = arith.constant 7 : index
    %c0_14 = arith.constant 0 : index
    %c0_15 = arith.constant 0 : index
    %14 = vector.load %arg1[%c7, %c0_14, %c0_15] : memref<16x64x16xbf16, #tpu.memory_space<vmem>>, vector<1x64x16xbf16>
    %15 = vector.shape_cast %14 : vector<1x64x16xbf16> to vector<64x16xbf16>
    %c8 = arith.constant 8 : index
    %c0_16 = arith.constant 0 : index
    %c0_17 = arith.constant 0 : index
    %16 = vector.load %arg1[%c8, %c0_16, %c0_17] : memref<16x64x16xbf16, #tpu.memory_space<vmem>>, vector<1x64x16xbf16>
    %17 = vector.shape_cast %16 : vector<1x64x16xbf16> to vector<64x16xbf16>
    %c9 = arith.constant 9 : index
    %c0_18 = arith.constant 0 : index
    %c0_19 = arith.constant 0 : index
    %18 = vector.load %arg1[%c9, %c0_18, %c0_19] : memref<16x64x16xbf16, #tpu.memory_space<vmem>>, vector<1x64x16xbf16>
    %19 = vector.shape_cast %18 : vector<1x64x16xbf16> to vector<64x16xbf16>
    %c10 = arith.constant 10 : index
    %c0_20 = arith.constant 0 : index
    %c0_21 = arith.constant 0 : index
    %20 = vector.load %arg1[%c10, %c0_20, %c0_21] : memref<16x64x16xbf16, #tpu.memory_space<vmem>>, vector<1x64x16xbf16>
    %21 = vector.shape_cast %20 : vector<1x64x16xbf16> to vector<64x16xbf16>
    %c11 = arith.constant 11 : index
    %c0_22 = arith.constant 0 : index
    %c0_23 = arith.constant 0 : index
    %22 = vector.load %arg1[%c11, %c0_22, %c0_23] : memref<16x64x16xbf16, #tpu.memory_space<vmem>>, vector<1x64x16xbf16>
    %23 = vector.shape_cast %22 : vector<1x64x16xbf16> to vector<64x16xbf16>
    %c12 = arith.constant 12 : index
    %c0_24 = arith.constant 0 : index
    %c0_25 = arith.constant 0 : index
    %24 = vector.load %arg1[%c12, %c0_24, %c0_25] : memref<16x64x16xbf16, #tpu.memory_space<vmem>>, vector<1x64x16xbf16>
    %25 = vector.shape_cast %24 : vector<1x64x16xbf16> to vector<64x16xbf16>
    %c13 = arith.constant 13 : index
    %c0_26 = arith.constant 0 : index
    %c0_27 = arith.constant 0 : index
    %26 = vector.load %arg1[%c13, %c0_26, %c0_27] : memref<16x64x16xbf16, #tpu.memory_space<vmem>>, vector<1x64x16xbf16>
    %27 = vector.shape_cast %26 : vector<1x64x16xbf16> to vector<64x16xbf16>
    %c14 = arith.constant 14 : index
    %c0_28 = arith.constant 0 : index
    %c0_29 = arith.constant 0 : index
    %28 = vector.load %arg1[%c14, %c0_28, %c0_29] : memref<16x64x16xbf16, #tpu.memory_space<vmem>>, vector<1x64x16xbf16>
    %29 = vector.shape_cast %28 : vector<1x64x16xbf16> to vector<64x16xbf16>
    %c15 = arith.constant 15 : index
    %c0_30 = arith.constant 0 : index
    %c0_31 = arith.constant 0 : index
    %30 = vector.load %arg1[%c15, %c0_30, %c0_31] : memref<16x64x16xbf16, #tpu.memory_space<vmem>>, vector<1x64x16xbf16>
    %31 = vector.shape_cast %30 : vector<1x64x16xbf16> to vector<64x16xbf16>
    %c0_32 = arith.constant 0 : index
    %c0_33 = arith.constant 0 : index
    %32 = vector.load %arg2[%c0_32, %c0_33] : memref<80x64xbf16, #tpu.memory_space<vmem>>, vector<80x64xbf16>
    %c0_34 = arith.constant 0 : index
    %c0_35 = arith.constant 0 : index
    %33 = vector.load %arg4[%c0_34, %c0_35] : memref<4x64xf32, #tpu.memory_space<vmem>>, vector<1x64xf32>
    %cst = arith.constant 0.000000e+00 : bf16
    %34 = vector.broadcast %cst : bf16 to vector<1x16xbf16>
    %35 = vector.extract_strided_slice %29 {offsets = [0, 0], sizes = [31, 16], strides = [1, 1]} : vector<64x16xbf16> to vector<31x16xbf16>
    %36 = vector.extract_strided_slice %29 {offsets = [32, 0], sizes = [31, 16], strides = [1, 1]} : vector<64x16xbf16> to vector<31x16xbf16>
    %37 = tpu.concatenate %34, %35, %34, %36 in 0 : vector<1x16xbf16>, vector<31x16xbf16>, vector<1x16xbf16>, vector<31x16xbf16> -> vector<64x16xbf16>
    %cst_36 = arith.constant 0.000000e+00 : bf16
    %38 = vector.broadcast %cst_36 : bf16 to vector<1x16xbf16>
    %39 = vector.extract_strided_slice %31 {offsets = [0, 0], sizes = [31, 16], strides = [1, 1]} : vector<64x16xbf16> to vector<31x16xbf16>
    %40 = vector.extract_strided_slice %31 {offsets = [32, 0], sizes = [31, 16], strides = [1, 1]} : vector<64x16xbf16> to vector<31x16xbf16>
    %41 = tpu.concatenate %38, %39, %38, %40 in 0 : vector<1x16xbf16>, vector<31x16xbf16>, vector<1x16xbf16>, vector<31x16xbf16> -> vector<64x16xbf16>
    %cst_37 = arith.constant 0.000000e+00 : bf16
    %42 = vector.broadcast %cst_37 : bf16 to vector<1x16xbf16>
    %43 = vector.extract_strided_slice %1 {offsets = [1, 0], sizes = [31, 16], strides = [1, 1]} : vector<64x16xbf16> to vector<31x16xbf16>
    %44 = vector.extract_strided_slice %1 {offsets = [33, 0], sizes = [31, 16], strides = [1, 1]} : vector<64x16xbf16> to vector<31x16xbf16>
    %45 = tpu.concatenate %43, %42, %44, %42 in 0 : vector<31x16xbf16>, vector<1x16xbf16>, vector<31x16xbf16>, vector<1x16xbf16> -> vector<64x16xbf16>
    %46 = tpu.concatenate %37, %41, %1, %3, %5 in 1 : vector<64x16xbf16>, vector<64x16xbf16>, vector<64x16xbf16>, vector<64x16xbf16>, vector<64x16xbf16> -> vector<64x80xbf16>
    %cst_38 = arith.constant dense<0.000000e+00> : vector<64x64xf32>
    %47 = tpu.matmul %46, %32, %cst_38 {dimension_numbers = #tpu.dot_dimension_numbers<[1], [0], [0], [1], [0, 0, 1, 1], [], []>} : vector<64x80xbf16>, vector<80x64xbf16>, vector<64x64xf32> -> vector<64x64xf32>
    %48 = vector.broadcast %33 : vector<1x64xf32> to vector<64x64xf32>
    %49 = arith.addf %47, %48 : vector<64x64xf32>
    %cst_39 = arith.constant 0.000000e+00 : f32
    %50 = vector.broadcast %cst_39 : f32 to vector<64x64xf32>
    %51 = arith.maximumf %49, %50 : vector<64x64xf32>
    %52 = arith.truncf %51 : vector<64x64xf32> to vector<64x64xbf16>
    %53 = tpu.concatenate %1, %3, %5, %7, %9 in 1 : vector<64x16xbf16>, vector<64x16xbf16>, vector<64x16xbf16>, vector<64x16xbf16>, vector<64x16xbf16> -> vector<64x80xbf16>
    %cst_40 = arith.constant dense<0.000000e+00> : vector<64x64xf32>
    %54 = tpu.matmul %53, %32, %cst_40 {dimension_numbers = #tpu.dot_dimension_numbers<[1], [0], [0], [1], [0, 0, 1, 1], [], []>} : vector<64x80xbf16>, vector<80x64xbf16>, vector<64x64xf32> -> vector<64x64xf32>
    %55 = vector.broadcast %33 : vector<1x64xf32> to vector<64x64xf32>
    %56 = arith.addf %54, %55 : vector<64x64xf32>
    %cst_41 = arith.constant 0.000000e+00 : f32
    %57 = vector.broadcast %cst_41 : f32 to vector<64x64xf32>
    %58 = arith.maximumf %56, %57 : vector<64x64xf32>
    %59 = arith.truncf %58 : vector<64x64xf32> to vector<64x64xbf16>
    %60 = tpu.concatenate %5, %7, %9, %11, %13 in 1 : vector<64x16xbf16>, vector<64x16xbf16>, vector<64x16xbf16>, vector<64x16xbf16>, vector<64x16xbf16> -> vector<64x80xbf16>
    %cst_42 = arith.constant dense<0.000000e+00> : vector<64x64xf32>
    %61 = tpu.matmul %60, %32, %cst_42 {dimension_numbers = #tpu.dot_dimension_numbers<[1], [0], [0], [1], [0, 0, 1, 1], [], []>} : vector<64x80xbf16>, vector<80x64xbf16>, vector<64x64xf32> -> vector<64x64xf32>
    %62 = vector.broadcast %33 : vector<1x64xf32> to vector<64x64xf32>
    %63 = arith.addf %61, %62 : vector<64x64xf32>
    %cst_43 = arith.constant 0.000000e+00 : f32
    %64 = vector.broadcast %cst_43 : f32 to vector<64x64xf32>
    %65 = arith.maximumf %63, %64 : vector<64x64xf32>
    %66 = arith.truncf %65 : vector<64x64xf32> to vector<64x64xbf16>
    %67 = tpu.concatenate %9, %11, %13, %15, %17 in 1 : vector<64x16xbf16>, vector<64x16xbf16>, vector<64x16xbf16>, vector<64x16xbf16>, vector<64x16xbf16> -> vector<64x80xbf16>
    %cst_44 = arith.constant dense<0.000000e+00> : vector<64x64xf32>
    %68 = tpu.matmul %67, %32, %cst_44 {dimension_numbers = #tpu.dot_dimension_numbers<[1], [0], [0], [1], [0, 0, 1, 1], [], []>} : vector<64x80xbf16>, vector<80x64xbf16>, vector<64x64xf32> -> vector<64x64xf32>
    %69 = vector.broadcast %33 : vector<1x64xf32> to vector<64x64xf32>
    %70 = arith.addf %68, %69 : vector<64x64xf32>
    %cst_45 = arith.constant 0.000000e+00 : f32
    %71 = vector.broadcast %cst_45 : f32 to vector<64x64xf32>
    %72 = arith.maximumf %70, %71 : vector<64x64xf32>
    %73 = arith.truncf %72 : vector<64x64xf32> to vector<64x64xbf16>
    %74 = tpu.concatenate %13, %15, %17, %19, %21 in 1 : vector<64x16xbf16>, vector<64x16xbf16>, vector<64x16xbf16>, vector<64x16xbf16>, vector<64x16xbf16> -> vector<64x80xbf16>
    %cst_46 = arith.constant dense<0.000000e+00> : vector<64x64xf32>
    %75 = tpu.matmul %74, %32, %cst_46 {dimension_numbers = #tpu.dot_dimension_numbers<[1], [0], [0], [1], [0, 0, 1, 1], [], []>} : vector<64x80xbf16>, vector<80x64xbf16>, vector<64x64xf32> -> vector<64x64xf32>
    %76 = vector.broadcast %33 : vector<1x64xf32> to vector<64x64xf32>
    %77 = arith.addf %75, %76 : vector<64x64xf32>
    %cst_47 = arith.constant 0.000000e+00 : f32
    %78 = vector.broadcast %cst_47 : f32 to vector<64x64xf32>
    %79 = arith.maximumf %77, %78 : vector<64x64xf32>
    %80 = arith.truncf %79 : vector<64x64xf32> to vector<64x64xbf16>
    %81 = tpu.concatenate %17, %19, %21, %23, %25 in 1 : vector<64x16xbf16>, vector<64x16xbf16>, vector<64x16xbf16>, vector<64x16xbf16>, vector<64x16xbf16> -> vector<64x80xbf16>
    %cst_48 = arith.constant dense<0.000000e+00> : vector<64x64xf32>
    %82 = tpu.matmul %81, %32, %cst_48 {dimension_numbers = #tpu.dot_dimension_numbers<[1], [0], [0], [1], [0, 0, 1, 1], [], []>} : vector<64x80xbf16>, vector<80x64xbf16>, vector<64x64xf32> -> vector<64x64xf32>
    %83 = vector.broadcast %33 : vector<1x64xf32> to vector<64x64xf32>
    %84 = arith.addf %82, %83 : vector<64x64xf32>
    %cst_49 = arith.constant 0.000000e+00 : f32
    %85 = vector.broadcast %cst_49 : f32 to vector<64x64xf32>
    %86 = arith.maximumf %84, %85 : vector<64x64xf32>
    %87 = arith.truncf %86 : vector<64x64xf32> to vector<64x64xbf16>
    %88 = tpu.concatenate %21, %23, %25, %27, %29 in 1 : vector<64x16xbf16>, vector<64x16xbf16>, vector<64x16xbf16>, vector<64x16xbf16>, vector<64x16xbf16> -> vector<64x80xbf16>
    %cst_50 = arith.constant dense<0.000000e+00> : vector<64x64xf32>
    %89 = tpu.matmul %88, %32, %cst_50 {dimension_numbers = #tpu.dot_dimension_numbers<[1], [0], [0], [1], [0, 0, 1, 1], [], []>} : vector<64x80xbf16>, vector<80x64xbf16>, vector<64x64xf32> -> vector<64x64xf32>
    %90 = vector.broadcast %33 : vector<1x64xf32> to vector<64x64xf32>
    %91 = arith.addf %89, %90 : vector<64x64xf32>
    %cst_51 = arith.constant 0.000000e+00 : f32
    %92 = vector.broadcast %cst_51 : f32 to vector<64x64xf32>
    %93 = arith.maximumf %91, %92 : vector<64x64xf32>
    %94 = arith.truncf %93 : vector<64x64xf32> to vector<64x64xbf16>
    %95 = tpu.concatenate %25, %27, %29, %31, %45 in 1 : vector<64x16xbf16>, vector<64x16xbf16>, vector<64x16xbf16>, vector<64x16xbf16>, vector<64x16xbf16> -> vector<64x80xbf16>
    %cst_52 = arith.constant dense<0.000000e+00> : vector<64x64xf32>
    %96 = tpu.matmul %95, %32, %cst_52 {dimension_numbers = #tpu.dot_dimension_numbers<[1], [0], [0], [1], [0, 0, 1, 1], [], []>} : vector<64x80xbf16>, vector<80x64xbf16>, vector<64x64xf32> -> vector<64x64xf32>
    %97 = vector.broadcast %33 : vector<1x64xf32> to vector<64x64xf32>
    %98 = arith.addf %96, %97 : vector<64x64xf32>
    %cst_53 = arith.constant 0.000000e+00 : f32
    %99 = vector.broadcast %cst_53 : f32 to vector<64x64xf32>
    %100 = arith.maximumf %98, %99 : vector<64x64xf32>
    %101 = arith.truncf %100 : vector<64x64xf32> to vector<64x64xbf16>
    %c0_54 = arith.constant 0 : index
    %c0_55 = arith.constant 0 : index
    %c0_56 = arith.constant 0 : index
    %102 = vector.load %arg3[%c0_54, %c0_55, %c0_56] : memref<3x320x64xbf16, #tpu.memory_space<vmem>>, vector<1x320x64xbf16>
    %103 = vector.shape_cast %102 : vector<1x320x64xbf16> to vector<320x64xbf16>
    %c1_57 = arith.constant 1 : index
    %c0_58 = arith.constant 0 : index
    %104 = vector.load %arg4[%c1_57, %c0_58] : memref<4x64xf32, #tpu.memory_space<vmem>>, vector<1x64xf32>
    %cst_59 = arith.constant 0.000000e+00 : bf16
    %105 = vector.broadcast %cst_59 : bf16 to vector<1x64xbf16>
    %106 = vector.extract_strided_slice %94 {offsets = [0, 0], sizes = [31, 64], strides = [1, 1]} : vector<64x64xbf16> to vector<31x64xbf16>
    %107 = vector.extract_strided_slice %94 {offsets = [32, 0], sizes = [31, 64], strides = [1, 1]} : vector<64x64xbf16> to vector<31x64xbf16>
    %108 = tpu.concatenate %105, %106, %105, %107 in 0 : vector<1x64xbf16>, vector<31x64xbf16>, vector<1x64xbf16>, vector<31x64xbf16> -> vector<64x64xbf16>
    %cst_60 = arith.constant 0.000000e+00 : bf16
    %109 = vector.broadcast %cst_60 : bf16 to vector<1x64xbf16>
    %110 = vector.extract_strided_slice %101 {offsets = [0, 0], sizes = [31, 64], strides = [1, 1]} : vector<64x64xbf16> to vector<31x64xbf16>
    %111 = vector.extract_strided_slice %101 {offsets = [32, 0], sizes = [31, 64], strides = [1, 1]} : vector<64x64xbf16> to vector<31x64xbf16>
    %112 = tpu.concatenate %109, %110, %109, %111 in 0 : vector<1x64xbf16>, vector<31x64xbf16>, vector<1x64xbf16>, vector<31x64xbf16> -> vector<64x64xbf16>
    %cst_61 = arith.constant 0.000000e+00 : bf16
    %113 = vector.broadcast %cst_61 : bf16 to vector<1x64xbf16>
    %114 = vector.extract_strided_slice %52 {offsets = [1, 0], sizes = [31, 64], strides = [1, 1]} : vector<64x64xbf16> to vector<31x64xbf16>
    %115 = vector.extract_strided_slice %52 {offsets = [33, 0], sizes = [31, 64], strides = [1, 1]} : vector<64x64xbf16> to vector<31x64xbf16>
    %116 = tpu.concatenate %114, %113, %115, %113 in 0 : vector<31x64xbf16>, vector<1x64xbf16>, vector<31x64xbf16>, vector<1x64xbf16> -> vector<64x64xbf16>
    %117 = tpu.concatenate %108, %112, %52, %59, %66 in 1 : vector<64x64xbf16>, vector<64x64xbf16>, vector<64x64xbf16>, vector<64x64xbf16>, vector<64x64xbf16> -> vector<64x320xbf16>
    %cst_62 = arith.constant dense<0.000000e+00> : vector<64x64xf32>
    %118 = tpu.matmul %117, %103, %cst_62 {dimension_numbers = #tpu.dot_dimension_numbers<[1], [0], [0], [1], [0, 0, 1, 1], [], []>} : vector<64x320xbf16>, vector<320x64xbf16>, vector<64x64xf32> -> vector<64x64xf32>
    %119 = vector.broadcast %104 : vector<1x64xf32> to vector<64x64xf32>
    %120 = arith.addf %118, %119 : vector<64x64xf32>
    %cst_63 = arith.constant 0.000000e+00 : f32
    %121 = vector.broadcast %cst_63 : f32 to vector<64x64xf32>
    %122 = arith.maximumf %120, %121 : vector<64x64xf32>
    %123 = arith.truncf %122 : vector<64x64xf32> to vector<64x64xbf16>
    %124 = tpu.concatenate %52, %59, %66, %73, %80 in 1 : vector<64x64xbf16>, vector<64x64xbf16>, vector<64x64xbf16>, vector<64x64xbf16>, vector<64x64xbf16> -> vector<64x320xbf16>
    %cst_64 = arith.constant dense<0.000000e+00> : vector<64x64xf32>
    %125 = tpu.matmul %124, %103, %cst_64 {dimension_numbers = #tpu.dot_dimension_numbers<[1], [0], [0], [1], [0, 0, 1, 1], [], []>} : vector<64x320xbf16>, vector<320x64xbf16>, vector<64x64xf32> -> vector<64x64xf32>
    %126 = vector.broadcast %104 : vector<1x64xf32> to vector<64x64xf32>
    %127 = arith.addf %125, %126 : vector<64x64xf32>
    %cst_65 = arith.constant 0.000000e+00 : f32
    %128 = vector.broadcast %cst_65 : f32 to vector<64x64xf32>
    %129 = arith.maximumf %127, %128 : vector<64x64xf32>
    %130 = arith.truncf %129 : vector<64x64xf32> to vector<64x64xbf16>
    %131 = tpu.concatenate %66, %73, %80, %87, %94 in 1 : vector<64x64xbf16>, vector<64x64xbf16>, vector<64x64xbf16>, vector<64x64xbf16>, vector<64x64xbf16> -> vector<64x320xbf16>
    %cst_66 = arith.constant dense<0.000000e+00> : vector<64x64xf32>
    %132 = tpu.matmul %131, %103, %cst_66 {dimension_numbers = #tpu.dot_dimension_numbers<[1], [0], [0], [1], [0, 0, 1, 1], [], []>} : vector<64x320xbf16>, vector<320x64xbf16>, vector<64x64xf32> -> vector<64x64xf32>
    %133 = vector.broadcast %104 : vector<1x64xf32> to vector<64x64xf32>
    %134 = arith.addf %132, %133 : vector<64x64xf32>
    %cst_67 = arith.constant 0.000000e+00 : f32
    %135 = vector.broadcast %cst_67 : f32 to vector<64x64xf32>
    %136 = arith.maximumf %134, %135 : vector<64x64xf32>
    %137 = arith.truncf %136 : vector<64x64xf32> to vector<64x64xbf16>
    %138 = tpu.concatenate %80, %87, %94, %101, %116 in 1 : vector<64x64xbf16>, vector<64x64xbf16>, vector<64x64xbf16>, vector<64x64xbf16>, vector<64x64xbf16> -> vector<64x320xbf16>
    %cst_68 = arith.constant dense<0.000000e+00> : vector<64x64xf32>
    %139 = tpu.matmul %138, %103, %cst_68 {dimension_numbers = #tpu.dot_dimension_numbers<[1], [0], [0], [1], [0, 0, 1, 1], [], []>} : vector<64x320xbf16>, vector<320x64xbf16>, vector<64x64xf32> -> vector<64x64xf32>
    %140 = vector.broadcast %104 : vector<1x64xf32> to vector<64x64xf32>
    %141 = arith.addf %139, %140 : vector<64x64xf32>
    %cst_69 = arith.constant 0.000000e+00 : f32
    %142 = vector.broadcast %cst_69 : f32 to vector<64x64xf32>
    %143 = arith.maximumf %141, %142 : vector<64x64xf32>
    %144 = arith.truncf %143 : vector<64x64xf32> to vector<64x64xbf16>
    %c1_70 = arith.constant 1 : index
    %c0_71 = arith.constant 0 : index
    %c0_72 = arith.constant 0 : index
    %145 = vector.load %arg3[%c1_70, %c0_71, %c0_72] : memref<3x320x64xbf16, #tpu.memory_space<vmem>>, vector<1x320x64xbf16>
    %146 = vector.shape_cast %145 : vector<1x320x64xbf16> to vector<320x64xbf16>
    %c2_73 = arith.constant 2 : index
    %c0_74 = arith.constant 0 : index
    %147 = vector.load %arg4[%c2_73, %c0_74] : memref<4x64xf32, #tpu.memory_space<vmem>>, vector<1x64xf32>
    %cst_75 = arith.constant 0.000000e+00 : bf16
    %148 = vector.broadcast %cst_75 : bf16 to vector<1x64xbf16>
    %149 = vector.extract_strided_slice %137 {offsets = [0, 0], sizes = [31, 64], strides = [1, 1]} : vector<64x64xbf16> to vector<31x64xbf16>
    %150 = vector.extract_strided_slice %137 {offsets = [32, 0], sizes = [31, 64], strides = [1, 1]} : vector<64x64xbf16> to vector<31x64xbf16>
    %151 = tpu.concatenate %148, %149, %148, %150 in 0 : vector<1x64xbf16>, vector<31x64xbf16>, vector<1x64xbf16>, vector<31x64xbf16> -> vector<64x64xbf16>
    %cst_76 = arith.constant 0.000000e+00 : bf16
    %152 = vector.broadcast %cst_76 : bf16 to vector<1x64xbf16>
    %153 = vector.extract_strided_slice %144 {offsets = [0, 0], sizes = [31, 64], strides = [1, 1]} : vector<64x64xbf16> to vector<31x64xbf16>
    %154 = vector.extract_strided_slice %144 {offsets = [32, 0], sizes = [31, 64], strides = [1, 1]} : vector<64x64xbf16> to vector<31x64xbf16>
    %155 = tpu.concatenate %152, %153, %152, %154 in 0 : vector<1x64xbf16>, vector<31x64xbf16>, vector<1x64xbf16>, vector<31x64xbf16> -> vector<64x64xbf16>
    %cst_77 = arith.constant 0.000000e+00 : bf16
    %156 = vector.broadcast %cst_77 : bf16 to vector<1x64xbf16>
    %157 = vector.extract_strided_slice %123 {offsets = [1, 0], sizes = [31, 64], strides = [1, 1]} : vector<64x64xbf16> to vector<31x64xbf16>
    %158 = vector.extract_strided_slice %123 {offsets = [33, 0], sizes = [31, 64], strides = [1, 1]} : vector<64x64xbf16> to vector<31x64xbf16>
    %159 = tpu.concatenate %157, %156, %158, %156 in 0 : vector<31x64xbf16>, vector<1x64xbf16>, vector<31x64xbf16>, vector<1x64xbf16> -> vector<64x64xbf16>
    %160 = tpu.concatenate %151, %155, %123, %130, %137 in 1 : vector<64x64xbf16>, vector<64x64xbf16>, vector<64x64xbf16>, vector<64x64xbf16>, vector<64x64xbf16> -> vector<64x320xbf16>
    %cst_78 = arith.constant dense<0.000000e+00> : vector<64x64xf32>
    %161 = tpu.matmul %160, %146, %cst_78 {dimension_numbers = #tpu.dot_dimension_numbers<[1], [0], [0], [1], [0, 0, 1, 1], [], []>} : vector<64x320xbf16>, vector<320x64xbf16>, vector<64x64xf32> -> vector<64x64xf32>
    %162 = vector.broadcast %147 : vector<1x64xf32> to vector<64x64xf32>
    %163 = arith.addf %161, %162 : vector<64x64xf32>
    %cst_79 = arith.constant 0.000000e+00 : f32
    %164 = vector.broadcast %cst_79 : f32 to vector<64x64xf32>
    %165 = arith.maximumf %163, %164 : vector<64x64xf32>
    %166 = arith.truncf %165 : vector<64x64xf32> to vector<64x64xbf16>
    %167 = tpu.concatenate %123, %130, %137, %144, %159 in 1 : vector<64x64xbf16>, vector<64x64xbf16>, vector<64x64xbf16>, vector<64x64xbf16>, vector<64x64xbf16> -> vector<64x320xbf16>
    %cst_80 = arith.constant dense<0.000000e+00> : vector<64x64xf32>
    %168 = tpu.matmul %167, %146, %cst_80 {dimension_numbers = #tpu.dot_dimension_numbers<[1], [0], [0], [1], [0, 0, 1, 1], [], []>} : vector<64x320xbf16>, vector<320x64xbf16>, vector<64x64xf32> -> vector<64x64xf32>
    %169 = vector.broadcast %147 : vector<1x64xf32> to vector<64x64xf32>
    %170 = arith.addf %168, %169 : vector<64x64xf32>
    %cst_81 = arith.constant 0.000000e+00 : f32
    %171 = vector.broadcast %cst_81 : f32 to vector<64x64xf32>
    %172 = arith.maximumf %170, %171 : vector<64x64xf32>
    %173 = arith.truncf %172 : vector<64x64xf32> to vector<64x64xbf16>
    %c2_82 = arith.constant 2 : index
    %c0_83 = arith.constant 0 : index
    %c0_84 = arith.constant 0 : index
    %174 = vector.load %arg3[%c2_82, %c0_83, %c0_84] : memref<3x320x64xbf16, #tpu.memory_space<vmem>>, vector<1x320x64xbf16>
    %175 = vector.shape_cast %174 : vector<1x320x64xbf16> to vector<320x64xbf16>
    %c3_85 = arith.constant 3 : index
    %c0_86 = arith.constant 0 : index
    %176 = vector.load %arg4[%c3_85, %c0_86] : memref<4x64xf32, #tpu.memory_space<vmem>>, vector<1x64xf32>
    %cst_87 = arith.constant 0.000000e+00 : bf16
    %177 = vector.broadcast %cst_87 : bf16 to vector<1x64xbf16>
    %178 = vector.extract_strided_slice %166 {offsets = [0, 0], sizes = [31, 64], strides = [1, 1]} : vector<64x64xbf16> to vector<31x64xbf16>
    %179 = vector.extract_strided_slice %166 {offsets = [32, 0], sizes = [31, 64], strides = [1, 1]} : vector<64x64xbf16> to vector<31x64xbf16>
    %180 = tpu.concatenate %177, %178, %177, %179 in 0 : vector<1x64xbf16>, vector<31x64xbf16>, vector<1x64xbf16>, vector<31x64xbf16> -> vector<64x64xbf16>
    %cst_88 = arith.constant 0.000000e+00 : bf16
    %181 = vector.broadcast %cst_88 : bf16 to vector<1x64xbf16>
    %182 = vector.extract_strided_slice %173 {offsets = [0, 0], sizes = [31, 64], strides = [1, 1]} : vector<64x64xbf16> to vector<31x64xbf16>
    %183 = vector.extract_strided_slice %173 {offsets = [32, 0], sizes = [31, 64], strides = [1, 1]} : vector<64x64xbf16> to vector<31x64xbf16>
    %184 = tpu.concatenate %181, %182, %181, %183 in 0 : vector<1x64xbf16>, vector<31x64xbf16>, vector<1x64xbf16>, vector<31x64xbf16> -> vector<64x64xbf16>
    %cst_89 = arith.constant 0.000000e+00 : bf16
    %185 = vector.broadcast %cst_89 : bf16 to vector<1x64xbf16>
    %186 = vector.extract_strided_slice %166 {offsets = [1, 0], sizes = [31, 64], strides = [1, 1]} : vector<64x64xbf16> to vector<31x64xbf16>
    %187 = vector.extract_strided_slice %166 {offsets = [33, 0], sizes = [31, 64], strides = [1, 1]} : vector<64x64xbf16> to vector<31x64xbf16>
    %188 = tpu.concatenate %186, %185, %187, %185 in 0 : vector<31x64xbf16>, vector<1x64xbf16>, vector<31x64xbf16>, vector<1x64xbf16> -> vector<64x64xbf16>
    %189 = tpu.concatenate %180, %184, %166, %173, %188 in 1 : vector<64x64xbf16>, vector<64x64xbf16>, vector<64x64xbf16>, vector<64x64xbf16>, vector<64x64xbf16> -> vector<64x320xbf16>
    %cst_90 = arith.constant dense<0.000000e+00> : vector<64x64xf32>
    %190 = tpu.matmul %189, %175, %cst_90 {dimension_numbers = #tpu.dot_dimension_numbers<[1], [0], [0], [1], [0, 0, 1, 1], [], []>} : vector<64x320xbf16>, vector<320x64xbf16>, vector<64x64xf32> -> vector<64x64xf32>
    %191 = vector.broadcast %176 : vector<1x64xf32> to vector<64x64xf32>
    %192 = arith.addf %190, %191 : vector<64x64xf32>
    %cst_91 = arith.constant 0.000000e+00 : f32
    %193 = vector.broadcast %cst_91 : f32 to vector<64x64xf32>
    %194 = arith.maximumf %192, %193 : vector<64x64xf32>
    %195 = arith.truncf %194 : vector<64x64xf32> to vector<64x64xbf16>
    %196 = vector.extract_strided_slice %195 {offsets = [0, 0], sizes = [1, 64], strides = [1, 1]} : vector<64x64xbf16> to vector<1x64xbf16>
    %197 = vector.extract_strided_slice %195 {offsets = [1, 0], sizes = [1, 64], strides = [1, 1]} : vector<64x64xbf16> to vector<1x64xbf16>
    %198 = vector.extract_strided_slice %195 {offsets = [2, 0], sizes = [1, 64], strides = [1, 1]} : vector<64x64xbf16> to vector<1x64xbf16>
    %199 = vector.extract_strided_slice %195 {offsets = [3, 0], sizes = [1, 64], strides = [1, 1]} : vector<64x64xbf16> to vector<1x64xbf16>
    %200 = vector.extract_strided_slice %195 {offsets = [4, 0], sizes = [1, 64], strides = [1, 1]} : vector<64x64xbf16> to vector<1x64xbf16>
    %201 = vector.extract_strided_slice %195 {offsets = [5, 0], sizes = [1, 64], strides = [1, 1]} : vector<64x64xbf16> to vector<1x64xbf16>
    %202 = vector.extract_strided_slice %195 {offsets = [6, 0], sizes = [1, 64], strides = [1, 1]} : vector<64x64xbf16> to vector<1x64xbf16>
    %203 = vector.extract_strided_slice %195 {offsets = [7, 0], sizes = [1, 64], strides = [1, 1]} : vector<64x64xbf16> to vector<1x64xbf16>
    %204 = vector.extract_strided_slice %195 {offsets = [8, 0], sizes = [1, 64], strides = [1, 1]} : vector<64x64xbf16> to vector<1x64xbf16>
    %205 = vector.extract_strided_slice %195 {offsets = [9, 0], sizes = [1, 64], strides = [1, 1]} : vector<64x64xbf16> to vector<1x64xbf16>
    %206 = vector.extract_strided_slice %195 {offsets = [10, 0], sizes = [1, 64], strides = [1, 1]} : vector<64x64xbf16> to vector<1x64xbf16>
    %207 = vector.extract_strided_slice %195 {offsets = [11, 0], sizes = [1, 64], strides = [1, 1]} : vector<64x64xbf16> to vector<1x64xbf16>
    %208 = vector.extract_strided_slice %195 {offsets = [12, 0], sizes = [1, 64], strides = [1, 1]} : vector<64x64xbf16> to vector<1x64xbf16>
    %209 = vector.extract_strided_slice %195 {offsets = [13, 0], sizes = [1, 64], strides = [1, 1]} : vector<64x64xbf16> to vector<1x64xbf16>
    %210 = vector.extract_strided_slice %195 {offsets = [14, 0], sizes = [1, 64], strides = [1, 1]} : vector<64x64xbf16> to vector<1x64xbf16>
    %211 = vector.extract_strided_slice %195 {offsets = [15, 0], sizes = [1, 64], strides = [1, 1]} : vector<64x64xbf16> to vector<1x64xbf16>
    %212 = vector.extract_strided_slice %195 {offsets = [16, 0], sizes = [1, 64], strides = [1, 1]} : vector<64x64xbf16> to vector<1x64xbf16>
    %213 = vector.extract_strided_slice %195 {offsets = [17, 0], sizes = [1, 64], strides = [1, 1]} : vector<64x64xbf16> to vector<1x64xbf16>
    %214 = vector.extract_strided_slice %195 {offsets = [18, 0], sizes = [1, 64], strides = [1, 1]} : vector<64x64xbf16> to vector<1x64xbf16>
    %215 = vector.extract_strided_slice %195 {offsets = [19, 0], sizes = [1, 64], strides = [1, 1]} : vector<64x64xbf16> to vector<1x64xbf16>
    %216 = vector.extract_strided_slice %195 {offsets = [20, 0], sizes = [1, 64], strides = [1, 1]} : vector<64x64xbf16> to vector<1x64xbf16>
    %217 = vector.extract_strided_slice %195 {offsets = [21, 0], sizes = [1, 64], strides = [1, 1]} : vector<64x64xbf16> to vector<1x64xbf16>
    %218 = vector.extract_strided_slice %195 {offsets = [22, 0], sizes = [1, 64], strides = [1, 1]} : vector<64x64xbf16> to vector<1x64xbf16>
    %219 = vector.extract_strided_slice %195 {offsets = [23, 0], sizes = [1, 64], strides = [1, 1]} : vector<64x64xbf16> to vector<1x64xbf16>
    %220 = vector.extract_strided_slice %195 {offsets = [24, 0], sizes = [1, 64], strides = [1, 1]} : vector<64x64xbf16> to vector<1x64xbf16>
    %221 = vector.extract_strided_slice %195 {offsets = [25, 0], sizes = [1, 64], strides = [1, 1]} : vector<64x64xbf16> to vector<1x64xbf16>
    %222 = vector.extract_strided_slice %195 {offsets = [26, 0], sizes = [1, 64], strides = [1, 1]} : vector<64x64xbf16> to vector<1x64xbf16>
    %223 = vector.extract_strided_slice %195 {offsets = [27, 0], sizes = [1, 64], strides = [1, 1]} : vector<64x64xbf16> to vector<1x64xbf16>
    %224 = vector.extract_strided_slice %195 {offsets = [28, 0], sizes = [1, 64], strides = [1, 1]} : vector<64x64xbf16> to vector<1x64xbf16>
    %225 = vector.extract_strided_slice %195 {offsets = [29, 0], sizes = [1, 64], strides = [1, 1]} : vector<64x64xbf16> to vector<1x64xbf16>
    %226 = vector.extract_strided_slice %195 {offsets = [30, 0], sizes = [1, 64], strides = [1, 1]} : vector<64x64xbf16> to vector<1x64xbf16>
    %227 = vector.extract_strided_slice %195 {offsets = [31, 0], sizes = [1, 64], strides = [1, 1]} : vector<64x64xbf16> to vector<1x64xbf16>
    %228 = tpu.concatenate %196, %197, %198, %199, %200, %201, %202, %203, %204, %205, %206, %207, %208, %209, %210, %211 in 1 : vector<1x64xbf16>, vector<1x64xbf16>, vector<1x64xbf16>, vector<1x64xbf16>, vector<1x64xbf16>, vector<1x64xbf16>, vector<1x64xbf16>, vector<1x64xbf16>, vector<1x64xbf16>, vector<1x64xbf16>, vector<1x64xbf16>, vector<1x64xbf16>, vector<1x64xbf16>, vector<1x64xbf16>, vector<1x64xbf16>, vector<1x64xbf16> -> vector<1x1024xbf16>
    %229 = tpu.concatenate %212, %213, %214, %215, %216, %217, %218, %219, %220, %221, %222, %223, %224, %225, %226, %227 in 1 : vector<1x64xbf16>, vector<1x64xbf16>, vector<1x64xbf16>, vector<1x64xbf16>, vector<1x64xbf16>, vector<1x64xbf16>, vector<1x64xbf16>, vector<1x64xbf16>, vector<1x64xbf16>, vector<1x64xbf16>, vector<1x64xbf16>, vector<1x64xbf16>, vector<1x64xbf16>, vector<1x64xbf16>, vector<1x64xbf16>, vector<1x64xbf16> -> vector<1x1024xbf16>
    %230 = tpu.concatenate %228, %229 in 1 : vector<1x1024xbf16>, vector<1x1024xbf16> -> vector<1x2048xbf16>
    %231 = vector.extract_strided_slice %195 {offsets = [32, 0], sizes = [1, 64], strides = [1, 1]} : vector<64x64xbf16> to vector<1x64xbf16>
    %232 = vector.extract_strided_slice %195 {offsets = [33, 0], sizes = [1, 64], strides = [1, 1]} : vector<64x64xbf16> to vector<1x64xbf16>
    %233 = vector.extract_strided_slice %195 {offsets = [34, 0], sizes = [1, 64], strides = [1, 1]} : vector<64x64xbf16> to vector<1x64xbf16>
    %234 = vector.extract_strided_slice %195 {offsets = [35, 0], sizes = [1, 64], strides = [1, 1]} : vector<64x64xbf16> to vector<1x64xbf16>
    %235 = vector.extract_strided_slice %195 {offsets = [36, 0], sizes = [1, 64], strides = [1, 1]} : vector<64x64xbf16> to vector<1x64xbf16>
    %236 = vector.extract_strided_slice %195 {offsets = [37, 0], sizes = [1, 64], strides = [1, 1]} : vector<64x64xbf16> to vector<1x64xbf16>
    %237 = vector.extract_strided_slice %195 {offsets = [38, 0], sizes = [1, 64], strides = [1, 1]} : vector<64x64xbf16> to vector<1x64xbf16>
    %238 = vector.extract_strided_slice %195 {offsets = [39, 0], sizes = [1, 64], strides = [1, 1]} : vector<64x64xbf16> to vector<1x64xbf16>
    %239 = vector.extract_strided_slice %195 {offsets = [40, 0], sizes = [1, 64], strides = [1, 1]} : vector<64x64xbf16> to vector<1x64xbf16>
    %240 = vector.extract_strided_slice %195 {offsets = [41, 0], sizes = [1, 64], strides = [1, 1]} : vector<64x64xbf16> to vector<1x64xbf16>
    %241 = vector.extract_strided_slice %195 {offsets = [42, 0], sizes = [1, 64], strides = [1, 1]} : vector<64x64xbf16> to vector<1x64xbf16>
    %242 = vector.extract_strided_slice %195 {offsets = [43, 0], sizes = [1, 64], strides = [1, 1]} : vector<64x64xbf16> to vector<1x64xbf16>
    %243 = vector.extract_strided_slice %195 {offsets = [44, 0], sizes = [1, 64], strides = [1, 1]} : vector<64x64xbf16> to vector<1x64xbf16>
    %244 = vector.extract_strided_slice %195 {offsets = [45, 0], sizes = [1, 64], strides = [1, 1]} : vector<64x64xbf16> to vector<1x64xbf16>
    %245 = vector.extract_strided_slice %195 {offsets = [46, 0], sizes = [1, 64], strides = [1, 1]} : vector<64x64xbf16> to vector<1x64xbf16>
    %246 = vector.extract_strided_slice %195 {offsets = [47, 0], sizes = [1, 64], strides = [1, 1]} : vector<64x64xbf16> to vector<1x64xbf16>
    %247 = vector.extract_strided_slice %195 {offsets = [48, 0], sizes = [1, 64], strides = [1, 1]} : vector<64x64xbf16> to vector<1x64xbf16>
    %248 = vector.extract_strided_slice %195 {offsets = [49, 0], sizes = [1, 64], strides = [1, 1]} : vector<64x64xbf16> to vector<1x64xbf16>
    %249 = vector.extract_strided_slice %195 {offsets = [50, 0], sizes = [1, 64], strides = [1, 1]} : vector<64x64xbf16> to vector<1x64xbf16>
    %250 = vector.extract_strided_slice %195 {offsets = [51, 0], sizes = [1, 64], strides = [1, 1]} : vector<64x64xbf16> to vector<1x64xbf16>
    %251 = vector.extract_strided_slice %195 {offsets = [52, 0], sizes = [1, 64], strides = [1, 1]} : vector<64x64xbf16> to vector<1x64xbf16>
    %252 = vector.extract_strided_slice %195 {offsets = [53, 0], sizes = [1, 64], strides = [1, 1]} : vector<64x64xbf16> to vector<1x64xbf16>
    %253 = vector.extract_strided_slice %195 {offsets = [54, 0], sizes = [1, 64], strides = [1, 1]} : vector<64x64xbf16> to vector<1x64xbf16>
    %254 = vector.extract_strided_slice %195 {offsets = [55, 0], sizes = [1, 64], strides = [1, 1]} : vector<64x64xbf16> to vector<1x64xbf16>
    %255 = vector.extract_strided_slice %195 {offsets = [56, 0], sizes = [1, 64], strides = [1, 1]} : vector<64x64xbf16> to vector<1x64xbf16>
    %256 = vector.extract_strided_slice %195 {offsets = [57, 0], sizes = [1, 64], strides = [1, 1]} : vector<64x64xbf16> to vector<1x64xbf16>
    %257 = vector.extract_strided_slice %195 {offsets = [58, 0], sizes = [1, 64], strides = [1, 1]} : vector<64x64xbf16> to vector<1x64xbf16>
    %258 = vector.extract_strided_slice %195 {offsets = [59, 0], sizes = [1, 64], strides = [1, 1]} : vector<64x64xbf16> to vector<1x64xbf16>
    %259 = vector.extract_strided_slice %195 {offsets = [60, 0], sizes = [1, 64], strides = [1, 1]} : vector<64x64xbf16> to vector<1x64xbf16>
    %260 = vector.extract_strided_slice %195 {offsets = [61, 0], sizes = [1, 64], strides = [1, 1]} : vector<64x64xbf16> to vector<1x64xbf16>
    %261 = vector.extract_strided_slice %195 {offsets = [62, 0], sizes = [1, 64], strides = [1, 1]} : vector<64x64xbf16> to vector<1x64xbf16>
    %262 = vector.extract_strided_slice %195 {offsets = [63, 0], sizes = [1, 64], strides = [1, 1]} : vector<64x64xbf16> to vector<1x64xbf16>
    %263 = tpu.concatenate %231, %232, %233, %234, %235, %236, %237, %238, %239, %240, %241, %242, %243, %244, %245, %246 in 1 : vector<1x64xbf16>, vector<1x64xbf16>, vector<1x64xbf16>, vector<1x64xbf16>, vector<1x64xbf16>, vector<1x64xbf16>, vector<1x64xbf16>, vector<1x64xbf16>, vector<1x64xbf16>, vector<1x64xbf16>, vector<1x64xbf16>, vector<1x64xbf16>, vector<1x64xbf16>, vector<1x64xbf16>, vector<1x64xbf16>, vector<1x64xbf16> -> vector<1x1024xbf16>
    %264 = tpu.concatenate %247, %248, %249, %250, %251, %252, %253, %254, %255, %256, %257, %258, %259, %260, %261, %262 in 1 : vector<1x64xbf16>, vector<1x64xbf16>, vector<1x64xbf16>, vector<1x64xbf16>, vector<1x64xbf16>, vector<1x64xbf16>, vector<1x64xbf16>, vector<1x64xbf16>, vector<1x64xbf16>, vector<1x64xbf16>, vector<1x64xbf16>, vector<1x64xbf16>, vector<1x64xbf16>, vector<1x64xbf16>, vector<1x64xbf16>, vector<1x64xbf16> -> vector<1x1024xbf16>
    %265 = tpu.concatenate %263, %264 in 1 : vector<1x1024xbf16>, vector<1x1024xbf16> -> vector<1x2048xbf16>
    %266 = tpu.concatenate %230, %265 in 0 : vector<1x2048xbf16>, vector<1x2048xbf16> -> vector<2x2048xbf16>
    %c0_92 = arith.constant 0 : index
    %c0_93 = arith.constant 0 : index
    %267 = vector.load %arg5[%c0_92, %c0_93] : memref<2048x256xbf16, #tpu.memory_space<vmem>>, vector<2048x256xbf16>
    %cst_94 = arith.constant dense<0.000000e+00> : vector<2x256xf32>
    %268 = tpu.matmul %266, %267, %cst_94 {dimension_numbers = #tpu.dot_dimension_numbers<[1], [0], [0], [1], [0, 0, 1, 1], [], []>} : vector<2x2048xbf16>, vector<2048x256xbf16>, vector<2x256xf32> -> vector<2x256xf32>
    %c0_95 = arith.constant 0 : index
    %c0_96 = arith.constant 0 : index
    %269 = vector.load %arg6[%c0_95, %c0_96] : memref<1x256xf32, #tpu.memory_space<vmem>>, vector<1x256xf32>
    %270 = vector.broadcast %269 : vector<1x256xf32> to vector<2x256xf32>
    %271 = arith.addf %268, %270 : vector<2x256xf32>
    %cst_97 = arith.constant 0.000000e+00 : f32
    %272 = vector.broadcast %cst_97 : f32 to vector<2x256xf32>
    %273 = arith.maximumf %271, %272 : vector<2x256xf32>
    %274 = arith.truncf %273 : vector<2x256xf32> to vector<2x256xbf16>
    %c0_98 = arith.constant 0 : index
    %c0_99 = arith.constant 0 : index
    %275 = vector.load %arg7[%c0_98, %c0_99] : memref<256x128xbf16, #tpu.memory_space<vmem>>, vector<256x128xbf16>
    %cst_100 = arith.constant dense<0.000000e+00> : vector<2x128xf32>
    %276 = tpu.matmul %274, %275, %cst_100 {dimension_numbers = #tpu.dot_dimension_numbers<[1], [0], [0], [1], [0, 0, 1, 1], [], []>} : vector<2x256xbf16>, vector<256x128xbf16>, vector<2x128xf32> -> vector<2x128xf32>
    %c0_101 = arith.constant 0 : index
    %c0_102 = arith.constant 0 : index
    %277 = vector.load %arg8[%c0_101, %c0_102] : memref<1x128xf32, #tpu.memory_space<vmem>>, vector<1x128xf32>
    %278 = vector.broadcast %277 : vector<1x128xf32> to vector<2x128xf32>
    %279 = arith.addf %276, %278 : vector<2x128xf32>
    %c0_103 = arith.constant 0 : index
    %c0_104 = arith.constant 0 : index
    %c0_105 = arith.constant 0 : index
    %280 = vector.load %arg9[%c0_103, %c0_104, %c0_105] : memref<1x2x128xf32, #tpu.memory_space<vmem>>, vector<1x2x128xf32>
    %281 = vector.shape_cast %280 : vector<1x2x128xf32> to vector<2x128xf32>
    %282 = vector.shape_cast %279 : vector<2x128xf32> to vector<1x2x128xf32>
    tpu.vector_store %arg9[%c0_103, %c0_104, %c0_105], %282 {strides = array<i32>} : memref<1x2x128xf32, #tpu.memory_space<vmem>>, vector<1x2x128xf32>,
    return
  }
  func.func @transform_0(%arg0: i32) -> (i32, i32, i32) {
    %c0_i32 = arith.constant 0 : i32
    %c0_i32_0 = arith.constant 0 : i32
    %c0_i32_1 = arith.constant 0 : i32
    return %c0_i32, %arg0, %c0_i32_0 : i32, i32, i32
  }
  func.func @transform_1(%arg0: i32) -> (i32, i32) {
    %c0_i32 = arith.constant 0 : i32
    %c0_i32_0 = arith.constant 0 : i32
    %c0_i32_1 = arith.constant 0 : i32
    return %c0_i32, %c0_i32_0 : i32, i32
  }
  func.func @transform_2(%arg0: i32) -> (i32, i32, i32) {
    %c0_i32 = arith.constant 0 : i32
    %c0_i32_0 = arith.constant 0 : i32
    %c0_i32_1 = arith.constant 0 : i32
    %c0_i32_2 = arith.constant 0 : i32
    return %c0_i32, %c0_i32_0, %c0_i32_1 : i32, i32, i32
  }
  func.func @transform_3(%arg0: i32) -> (i32, i32) {
    %c0_i32 = arith.constant 0 : i32
    %c0_i32_0 = arith.constant 0 : i32
    %c0_i32_1 = arith.constant 0 : i32
    return %c0_i32, %c0_i32_0 : i32, i32
  }
  func.func @transform_4(%arg0: i32) -> (i32, i32) {
    %c0_i32 = arith.constant 0 : i32
    %c0_i32_0 = arith.constant 0 : i32
    %c0_i32_1 = arith.constant 0 : i32
    return %c0_i32, %c0_i32_0 : i32, i32
  }
  func.func @transform_5(%arg0: i32) -> (i32, i32) {
    %c0_i32 = arith.constant 0 : i32
    %c0_i32_0 = arith.constant 0 : i32
    %c0_i32_1 = arith.constant 0 : i32
    return %c0_i32, %c0_i32_0 : i32, i32
  }
  func.func @transform_6(%arg0: i32) -> (i32, i32) {
    %c0_i32 = arith.constant 0 : i32
    %c0_i32_0 = arith.constant 0 : i32
    %c0_i32_1 = arith.constant 0 : i32
    return %c0_i32, %c0_i32_0 : i32, i32
  }
  func.func @transform_7(%arg0: i32) -> (i32, i32) {
    %c0_i32 = arith.constant 0 : i32
    %c0_i32_0 = arith.constant 0 : i32
    %c0_i32_1 = arith.constant 0 : i32
    return %c0_i32, %c0_i32_0 : i32, i32
  }
  func.func @transform_8(%arg0: i32) -> (i32, i32, i32) {
    %c0_i32 = arith.constant 0 : i32
    %c0_i32_0 = arith.constant 0 : i32
    %c0_i32_1 = arith.constant 0 : i32
    return %arg0, %c0_i32, %c0_i32_0 : i32, i32, i32
  }
}

</mosaic_0001>

<bundles_post_ra>
// kernel: adaptive_classifier_forward.1
= control target key start
LH: loop header
LB: loop body
LE: loop exit
PB: predicated region body
PF: predicated region fallthrough
CT: control target
= control target key end

     0   :  { %13 = vsyncpa [#allocation4], 0  ;;  %s12344_s0 = inlined_call_operand.vmem [shape: bf16[16,128,16], index: 0, kind: input, shape index: {}]   ;;  %s12345_s1 = inlined_call_operand.vmem [shape: bf16[80,64], index: 1, kind: input, shape index: {}]   ;;  %s12346_s2 = inlined_call_operand.vmem [shape: bf16[3,320,64], index: 2, kind: input, shape index: {}]   ;;  %s12347_s3 = inlined_call_operand.vmem [shape: f32[4,64], index: 3, kind: input, shape index: {}]   ;;  %s12348_s4 = inlined_call_operand.vmem [shape: bf16[2048,256], index: 4, kind: input, shape index: {}]   ;;  %s12349_s5 = inlined_call_operand.vmem [shape: f32[1,256], index: 5, kind: input, shape index: {}]   ;;  %s12350_s6 = inlined_call_operand.vmem [shape: bf16[256,128], index: 6, kind: input, shape index: {}]   ;;  %s12351_s7 = inlined_call_operand.vmem [shape: f32[1,128], index: 7, kind: input, shape index: {}]   ;;  %s12352_s8 = inlined_call_operand.hbm [shape: f32[2,2,128], index: 8, kind: output, shape index: {}]  }
   0x1   :  { %15 = vsyncpa [#allocation4 + $0x1], 0  ;;  %s9379_s27 = smov 0   ;;  %s9381_s28 = smov 0  }
   0x2   :  { %s9383_s29 = smov 0   ;;  %s9385_s30 = smov 0  }
   0x3 LB: > { %s7242_s9 = sadd.s32 4294967295, %s9327_s30   ;;  %s7243_s10 = sadd.s32 4294967294, %s9327_s30   ;;  %s9327_s30 = sphi %s9385_s30, %s12365_s30   ;;  %s9323_s29 = sphi %s9383_s29, %s12364_s29   ;;  %s9319_s28 = sphi %s9381_s28, %s12363_s28   ;;  %s9315_s27 = sphi %s9379_s27, %s12362_s27  }
   0x4   : > { %s9402_s11 = sadd.s32 1, %s9327_s30   ;;  %s28_s12 = sadd.s32 1, %s9323_s29 }
   0x5   : > { %s25_s13 = ssub.s32 %s9327_s30, %s9402_s11  ;;  %p35_p0 = scmp.ne.s32.totalorder %s9323_s29, %s9319_s28 }
   0x6   : > { %p26_p1 = scmp.eq.s32.totalorder %s25_s13, 0  ;;  %p36_p2 = scmp.eq.s32.totalorder %s9327_s30, 0 }
   0x7   : > { %p212_p3 = scmp.eq.s32.totalorder %s7242_s9, 1  ;;  %p217_p4 = scmp.ne.s32.totalorder %s9319_s28, %s9315_s27 }
   0x8   : > { %s9415_s14 = scalar_select %p26_p1, %s9323_s29, %s28_s12  }
   0x9   : > { %p37_p5 = por %p36_p2, %p35_p0  ;;  %p9417_p6 = por %p212_p3, %p35_p0 }
   0xa   : > { %p218_p7 = scmp.eq.s32.totalorder %s7243_s10, 1  ;;  %p7245_p9 = scmp.ge.s32.totalorder %s9327_s30, 2 }
   0xc   : > { %p9421_p8 = por %p218_p7, %p217_p4  ;;  %255 = sbr.rel (%p7245_p9) target bundleno = 55 (0x37), region = 44 }
  0x13   : > { %258 = sbr.rel (!%p37_p5) target bundleno = 55 (0x37), region = 48  ;;  %s260_s17 = sand.u32 (%p37_p5), 1, %s9323_s29  }
  0x14   : > { %s7922_s18 = sshll.u32 (%p37_p5), %s9327_s30, 5  ;;  %s7246_s19 = sshll.u32 (%p37_p5), %s260_s17, 9 }
  0x15   : > { %s9433_s22 = scalar_lea.vmem (%p37_p5), %s12344_s0, %s7922_s18  ;;  %s9438_s23 = scalar_lea.vmem (%p37_p5), [#allocation2], %s7246_s19 }
  0x16   : > { %v281_v0 = vld [vmem:[%s9433_s22] sm:$0xff] (%p37_p5)   ;;  %v285_v1 = vld [vmem:[%s9433_s22 + $0x8] sm:$0xff] (%p37_p5)   ;;  %v289_v2 = vld [vmem:[%s9433_s22 + $0x10] sm:$0xff] (%p37_p5)  }
  0x17   : > { %282 = vst [vmem:[%s9438_s23] sm:$0xff] (%p37_p5), %v281_v0   ;;  %286 = vst [vmem:[%s9438_s23 + $0x8] sm:$0xff] (%p37_p5), %v285_v1   ;;  %v293_v3 = vld [vmem:[%s9433_s22 + $0x18] sm:$0xff] (%p37_p5)   ;;  %v297_v4 = vld [vmem:[%s9433_s22 + $0x40] sm:$0xff] (%p37_p5)  }
  0x18   : > { %290 = vst [vmem:[%s9438_s23 + $0x10] sm:$0xff] (%p37_p5), %v289_v2   ;;  %v301_v5 = vld [vmem:[%s9433_s22 + $0x48] sm:$0xff] (%p37_p5)   ;;  %294 = vst [vmem:[%s9438_s23 + $0x18] sm:$0xff] (%p37_p5), %v293_v3   ;;  %v305_v6 = vld [vmem:[%s9433_s22 + $0x50] sm:$0xff] (%p37_p5)  }
  0x19   : > { %298 = vst [vmem:[%s9438_s23 + $0x20] sm:$0xff] (%p37_p5), %v297_v4   ;;  %302 = vst [vmem:[%s9438_s23 + $0x28] sm:$0xff] (%p37_p5), %v301_v5   ;;  %v309_v7 = vld [vmem:[%s9433_s22 + $0x58] sm:$0xff] (%p37_p5)   ;;  %v313_v8 = vld [vmem:[%s9433_s22 + $0x80] sm:$0xff] (%p37_p5)  }
  0x1a   : > { %306 = vst [vmem:[%s9438_s23 + $0x30] sm:$0xff] %v305_v6   ;;  %310 = vst [vmem:[%s9438_s23 + $0x38] sm:$0xff] %v309_v7   ;;  %v317_v9 = vld [vmem:[%s9433_s22 + $0x88] sm:$0xff]   ;;  %v321_v10 = vld [vmem:[%s9433_s22 + $0x90] sm:$0xff]  }
  0x1b   : > { %314 = vst [vmem:[%s9438_s23 + $0x40] sm:$0xff] %v313_v8   ;;  %v325_v11 = vld [vmem:[%s9433_s22 + $0x98] sm:$0xff]   ;;  %318 = vst [vmem:[%s9438_s23 + $0x48] sm:$0xff] %v317_v9   ;;  %v329_v12 = vld [vmem:[%s9433_s22 + $0xc0] sm:$0xff]  }
  0x1c   : > { %322 = vst [vmem:[%s9438_s23 + $0x50] sm:$0xff] %v321_v10   ;;  %326 = vst [vmem:[%s9438_s23 + $0x58] sm:$0xff] %v325_v11   ;;  %v333_v13 = vld [vmem:[%s9433_s22 + $0xc8] sm:$0xff]   ;;  %v337_v14 = vld [vmem:[%s9433_s22 + $0xd0] sm:$0xff]  }
  0x1d   : > { %330 = vst [vmem:[%s9438_s23 + $0x60] sm:$0xff] %v329_v12   ;;  %334 = vst [vmem:[%s9438_s23 + $0x68] sm:$0xff] %v333_v13   ;;  %v341_v15 = vld [vmem:[%s9433_s22 + $0xd8] sm:$0xff]   ;;  %v345_v16 = vld [vmem:[%s9433_s22 + $0x100] sm:$0xff]  }
  0x1e   : > { %338 = vst [vmem:[%s9438_s23 + $0x70] sm:$0xff] %v337_v14   ;;  %v349_v17 = vld [vmem:[%s9433_s22 + $0x108] sm:$0xff]   ;;  %342 = vst [vmem:[%s9438_s23 + $0x78] sm:$0xff] %v341_v15   ;;  %v353_v18 = vld [vmem:[%s9433_s22 + $0x110] sm:$0xff]  }
  0x1f   : > { %346 = vst [vmem:[%s9438_s23 + $0x80] sm:$0xff] %v345_v16   ;;  %350 = vst [vmem:[%s9438_s23 + $0x88] sm:$0xff] %v349_v17   ;;  %v357_v19 = vld [vmem:[%s9433_s22 + $0x118] sm:$0xff]   ;;  %v361_v20 = vld [vmem:[%s9433_s22 + $0x140] sm:$0xff]  }
  0x20   : > { %354 = vst [vmem:[%s9438_s23 + $0x90] sm:$0xff] %v353_v18   ;;  %358 = vst [vmem:[%s9438_s23 + $0x98] sm:$0xff] %v357_v19   ;;  %v365_v21 = vld [vmem:[%s9433_s22 + $0x148] sm:$0xff]   ;;  %v369_v22 = vld [vmem:[%s9433_s22 + $0x150] sm:$0xff]  }
  0x21   : > { %362 = vst [vmem:[%s9438_s23 + $0xa0] sm:$0xff] %v361_v20   ;;  %v373_v23 = vld [vmem:[%s9433_s22 + $0x158] sm:$0xff]   ;;  %366 = vst [vmem:[%s9438_s23 + $0xa8] sm:$0xff] %v365_v21   ;;  %v377_v24 = vld [vmem:[%s9433_s22 + $0x180] sm:$0xff]  }
  0x22   : > { %370 = vst [vmem:[%s9438_s23 + $0xb0] sm:$0xff] %v369_v22   ;;  %374 = vst [vmem:[%s9438_s23 + $0xb8] sm:$0xff] %v373_v23   ;;  %v381_v25 = vld [vmem:[%s9433_s22 + $0x188] sm:$0xff]   ;;  %v385_v26 = vld [vmem:[%s9433_s22 + $0x190] sm:$0xff]  }
  0x23   : > { %378 = vst [vmem:[%s9438_s23 + $0xc0] sm:$0xff] %v377_v24   ;;  %382 = vst [vmem:[%s9438_s23 + $0xc8] sm:$0xff] %v381_v25   ;;  %v389_v27 = vld [vmem:[%s9433_s22 + $0x198] sm:$0xff]   ;;  %v393_v28 = vld [vmem:[%s9433_s22 + $0x1c0] sm:$0xff]  }
  0x24   : > { %386 = vst [vmem:[%s9438_s23 + $0xd0] sm:$0xff] %v385_v26   ;;  %v397_v29 = vld [vmem:[%s9433_s22 + $0x1c8] sm:$0xff]   ;;  %390 = vst [vmem:[%s9438_s23 + $0xd8] sm:$0xff] %v389_v27   ;;  %v401_v30 = vld [vmem:[%s9433_s22 + $0x1d0] sm:$0xff]  }
  0x25   : > { %394 = vst [vmem:[%s9438_s23 + $0xe0] sm:$0xff] %v393_v28   ;;  %398 = vst [vmem:[%s9438_s23 + $0xe8] sm:$0xff] %v397_v29   ;;  %v405_v31 = vld [vmem:[%s9433_s22 + $0x1d8] sm:$0xff]   ;;  %v409_v32 = vld [vmem:[%s9433_s22 + $0x200] sm:$0xff]  }
  0x26   : > { %402 = vst [vmem:[%s9438_s23 + $0xf0] sm:$0xff] %v401_v30   ;;  %406 = vst [vmem:[%s9438_s23 + $0xf8] sm:$0xff] %v405_v31   ;;  %v413_v33 = vld [vmem:[%s9433_s22 + $0x208] sm:$0xff]   ;;  %v417_v34 = vld [vmem:[%s9433_s22 + $0x210] sm:$0xff]  }
  0x27   : > { %410 = vst [vmem:[%s9438_s23 + $0x100] sm:$0xff] %v409_v32   ;;  %v421_v35 = vld [vmem:[%s9433_s22 + $0x218] sm:$0xff]   ;;  %414 = vst [vmem:[%s9438_s23 + $0x108] sm:$0xff] %v413_v33   ;;  %v425_v36 = vld [vmem:[%s9433_s22 + $0x240] sm:$0xff]  }
  0x28   : > { %418 = vst [vmem:[%s9438_s23 + $0x110] sm:$0xff] %v417_v34   ;;  %422 = vst [vmem:[%s9438_s23 + $0x118] sm:$0xff] %v421_v35   ;;  %v429_v37 = vld [vmem:[%s9433_s22 + $0x248] sm:$0xff]   ;;  %v433_v38 = vld [vmem:[%s9433_s22 + $0x250] sm:$0xff]  }
  0x29   : > { %426 = vst [vmem:[%s9438_s23 + $0x120] sm:$0xff] %v425_v36   ;;  %430 = vst [vmem:[%s9438_s23 + $0x128] sm:$0xff] %v429_v37   ;;  %v437_v39 = vld [vmem:[%s9433_s22 + $0x258] sm:$0xff]   ;;  %v441_v40 = vld [vmem:[%s9433_s22 + $0x280] sm:$0xff]  }
  0x2a   : > { %434 = vst [vmem:[%s9438_s23 + $0x130] sm:$0xff] %v433_v38   ;;  %v445_v41 = vld [vmem:[%s9433_s22 + $0x288] sm:$0xff]   ;;  %438 = vst [vmem:[%s9438_s23 + $0x138] sm:$0xff] %v437_v39   ;;  %v449_v42 = vld [vmem:[%s9433_s22 + $0x290] sm:$0xff]  }
  0x2b   : > { %442 = vst [vmem:[%s9438_s23 + $0x140] sm:$0xff] %v441_v40   ;;  %446 = vst [vmem:[%s9438_s23 + $0x148] sm:$0xff] %v445_v41   ;;  %v453_v43 = vld [vmem:[%s9433_s22 + $0x298] sm:$0xff]   ;;  %v457_v44 = vld [vmem:[%s9433_s22 + $0x2c0] sm:$0xff]  }
  0x2c   : > { %450 = vst [vmem:[%s9438_s23 + $0x150] sm:$0xff] %v449_v42   ;;  %454 = vst [vmem:[%s9438_s23 + $0x158] sm:$0xff] %v453_v43   ;;  %v461_v45 = vld [vmem:[%s9433_s22 + $0x2c8] sm:$0xff]   ;;  %v465_v46 = vld [vmem:[%s9433_s22 + $0x2d0] sm:$0xff]  }
  0x2d   : > { %458 = vst [vmem:[%s9438_s23 + $0x160] sm:$0xff] %v457_v44   ;;  %v469_v47 = vld [vmem:[%s9433_s22 + $0x2d8] sm:$0xff]   ;;  %462 = vst [vmem:[%s9438_s23 + $0x168] sm:$0xff] %v461_v45   ;;  %v473_v48 = vld [vmem:[%s9433_s22 + $0x300] sm:$0xff]  }
  0x2e   : > { %466 = vst [vmem:[%s9438_s23 + $0x170] sm:$0xff] %v465_v46   ;;  %470 = vst [vmem:[%s9438_s23 + $0x178] sm:$0xff] %v469_v47   ;;  %v477_v49 = vld [vmem:[%s9433_s22 + $0x308] sm:$0xff]   ;;  %v481_v50 = vld [vmem:[%s9433_s22 + $0x310] sm:$0xff]  }
  0x2f   : > { %474 = vst [vmem:[%s9438_s23 + $0x180] sm:$0xff] %v473_v48   ;;  %478 = vst [vmem:[%s9438_s23 + $0x188] sm:$0xff] %v477_v49   ;;  %v485_v51 = vld [vmem:[%s9433_s22 + $0x318] sm:$0xff]   ;;  %v489_v52 = vld [vmem:[%s9433_s22 + $0x340] sm:$0xff]  }
  0x30   : > { %482 = vst [vmem:[%s9438_s23 + $0x190] sm:$0xff] %v481_v50   ;;  %v493_v53 = vld [vmem:[%s9433_s22 + $0x348] sm:$0xff]   ;;  %486 = vst [vmem:[%s9438_s23 + $0x198] sm:$0xff] %v485_v51   ;;  %v497_v54 = vld [vmem:[%s9433_s22 + $0x350] sm:$0xff]  }
  0x31   : > { %490 = vst [vmem:[%s9438_s23 + $0x1a0] sm:$0xff] %v489_v52   ;;  %494 = vst [vmem:[%s9438_s23 + $0x1a8] sm:$0xff] %v493_v53   ;;  %v501_v55 = vld [vmem:[%s9433_s22 + $0x358] sm:$0xff]   ;;  %v505_v56 = vld [vmem:[%s9433_s22 + $0x380] sm:$0xff]  }
  0x32   : > { %498 = vst [vmem:[%s9438_s23 + $0x1b0] sm:$0xff] %v497_v54   ;;  %502 = vst [vmem:[%s9438_s23 + $0x1b8] sm:$0xff] %v501_v55   ;;  %v509_v57 = vld [vmem:[%s9433_s22 + $0x388] sm:$0xff]   ;;  %v513_v58 = vld [vmem:[%s9433_s22 + $0x390] sm:$0xff]  }
  0x33   : > { %506 = vst [vmem:[%s9438_s23 + $0x1c0] sm:$0xff] %v505_v56   ;;  %v517_v59 = vld [vmem:[%s9433_s22 + $0x398] sm:$0xff]   ;;  %510 = vst [vmem:[%s9438_s23 + $0x1c8] sm:$0xff] %v509_v57   ;;  %v521_v60 = vld [vmem:[%s9433_s22 + $0x3c0] sm:$0xff]  }
  0x34   : > { %514 = vst [vmem:[%s9438_s23 + $0x1d0] sm:$0xff] %v513_v58   ;;  %518 = vst [vmem:[%s9438_s23 + $0x1d8] sm:$0xff] %v517_v59   ;;  %v525_v61 = vld [vmem:[%s9433_s22 + $0x3c8] sm:$0xff]   ;;  %v529_v62 = vld [vmem:[%s9433_s22 + $0x3d0] sm:$0xff]  }
  0x35   : > { %522 = vst [vmem:[%s9438_s23 + $0x1e0] sm:$0xff] %v521_v60   ;;  %526 = vst [vmem:[%s9438_s23 + $0x1e8] sm:$0xff] %v525_v61   ;;  %v533_v63 = vld [vmem:[%s9433_s22 + $0x3d8] sm:$0xff]  }
  0x36   : > { %530 = vst [vmem:[%s9438_s23 + $0x1f0] sm:$0xff] %v529_v62   ;;  %534 = vst [vmem:[%s9438_s23 + $0x1f8] sm:$0xff] %v533_v63  }
  0x37 PF: > { %p7249_p10 = scmp.ge.s32.totalorder %s9327_s30, 1  ;;  %p814_p11 = scmp.lt.s32.totalorder %s9327_s30, 3 }
  0x39   : > { %p815_p12 = pnand %p7249_p10, %p814_p11 }
  0x3b   : > { %818 = sbr.rel (%p815_p12) target bundleno = 2601 (0xa29), region = 89 }
  0x42   : > { %s9568_s24 = sand.u32 1, %s9319_s28   ;;  %v9573_v0 = vld [vmem:[%s12345_s1] sm:$0xff]   ;;  %s9329_s13 = smov 32   ;;  %v9655_v31 = vld [vmem:[%s12345_s1 + $0x8] sm:$0xff]   ;;  %v9662_v33 = vld [vmem:[%s12345_s1 + $0x10] sm:$0xff]   ;;  %vm1063_vm1 = vcmask 1040384  }
  0x43   : > { %s7250_s10 = sshll.u32 %s9568_s24, 9  ;;  %8371 = vmatprep.subr.bf16.mxu1 %v9573_v0  ;;  %8353 = vmatprep.subr.bf16.mxu0 %v9573_v0  ;;  %s9330_s17 = smov 16   ;;  %v9673_v35 = vld [vmem:[%s12345_s1 + $0x18] sm:$0xff]   ;;  %v9686_v38 = vld [vmem:[%s12345_s1 + $0x20] sm:$0xff]   ;;  %vm1020_vm0 = vsmask.f32 256 }
  0x44   : > { %s9578_s12 = scalar_lea.vmem [#allocation2], %s7250_s10  ;;  %8372 = vmatpush3.bf16.msra.mxu1 %v9573_v0  ;;  %8354 = vmatpush3.bf16.msra.mxu0 %v9573_v0  ;;  %s9331_s18 = smov 48   ;;  %vm9717_vm2 = vmand %vm1063_vm1, %vm1020_vm0  ;;  %vm1131_vm3 = vsmask.f32 7424  ;;  %vm1174_vm4 = vcmask 1047552   ;;  %vm1252_vm6 = vcmask 130048  }
  0x45   : > { %v9581_v1 = vld [vmem:[%s9578_s12 + $0x40] sm:$0xff]   ;;  %v9591_v3 = vld [vmem:[%s9578_s12 + $0x48] sm:$0xff]   ;;  %s9332_s19 = smov 64   ;;  %v8688_v9 = vld [vmem:[%s9578_s12 + $0x38] sm:$0xff]   ;;  %8373 = vmatprep.subr.bf16.mxu1 %v9655_v31  ;;  %8355 = vmatprep.subr.bf16.mxu0 %v9655_v31  ;;  %vm1265_vm7 = vcmask 261120   ;;  %vm1274_vm8 = vcmask 392192  }
  0x46   : > { %v9586_v2 = vld [vmem:[%s9578_s12 + $0x20] sm:$0xff]   ;;  %1420 = vrot.lane.b32.xlu1 %v9581_v1, %s9329_s13  ;;  %v9596_v4 = vld [vmem:[%s9578_s12 + $0x28] sm:$0xff]   ;;  %v8689_v10 = vld [vmem:[%s9578_s12 + $0x30] sm:$0xff]   ;;  %vm1283_vm9 = vcmask 523264   ;;  %vm1326_vm10 = vcmask 654336   ;;  %s7919_s10 = sshll.u32 %s7242_s9, 5 }
  0x47   : > { %1412 = vrot.lane.b32.xlu0 %v9586_v2, %s9330_s17  ;;  %v8684_v5 = vld [vmem:[%s9578_s12 + $0x68] sm:$0xff]   ;;  %v8685_v6 = vld [vmem:[%s9578_s12 + $0x60] sm:$0xff]   ;;  %v8690_v11 = vld [vmem:[%s9578_s12 + $0x58] sm:$0xff]   ;;  %s12300_s23 = scalar_lea.hbm %s12352_s8, %s7919_s10  ;;  %s9333_s9 = smov [#allocation3]  }
  0x48   : > { %v8686_v7 = vld [vmem:[%s9578_s12 + $0x88] sm:$0xff]   ;;  %v8687_v8 = vld [vmem:[%s9578_s12 + $0x80] sm:$0xff]   ;;  %v8691_v12 = vld [vmem:[%s9578_s12 + $0x50] sm:$0xff]   ;;  %8374 = vmatpush3.bf16.msra.mxu1 %v9655_v31  ;;  %8356 = vmatpush3.bf16.msra.mxu0 %v9655_v31 }
  0x49   : > { %v8692_v13 = vld [vmem:[%s9578_s12 + $0x78] sm:$0xff]   ;;  %v8693_v14 = vld [vmem:[%s9578_s12 + $0x70] sm:$0xff]   ;;  %v8696_v17 = vld [vmem:[%s9578_s12 + $0xa8] sm:$0xff]   ;;  %8375 = vmatprep.subr.bf16.mxu1 %v9662_v33  ;;  %8357 = vmatprep.subr.bf16.mxu0 %v9662_v33 }
  0x4a   : > { %1422 = vrot.lane.b32.xlu1 %v9591_v3, %s9329_s13  ;;  %v8694_v15 = vld [vmem:[%s9578_s12 + $0x98] sm:$0xff]   ;;  %v8695_v16 = vld [vmem:[%s9578_s12 + $0x90] sm:$0xff]   ;;  %v8697_v18 = vld [vmem:[%s9578_s12 + $0xa0] sm:$0xff]  }
  0x4b   : > { %1414 = vrot.lane.b32.xlu0 %v9596_v4, %s9330_s17  ;;  %v8698_v19 = vld [vmem:[%s9578_s12 + $0xc8] sm:$0xff]   ;;  %v8699_v20 = vld [vmem:[%s9578_s12 + $0xc0] sm:$0xff]   ;;  %v8704_v25 = vld [vmem:[%s9578_s12 + $0xb8] sm:$0xff]  }
  0x4c   : > { %v8700_v21 = vld [vmem:[%s9578_s12 + $0xe8] sm:$0xff]   ;;  %v8701_v22 = vld [vmem:[%s9578_s12 + $0xe0] sm:$0xff]   ;;  %v8705_v26 = vld [vmem:[%s9578_s12 + $0xb0] sm:$0xff]   ;;  %8376 = vmatpush3.bf16.msra.mxu1 %v9662_v33  ;;  %8358 = vmatpush3.bf16.msra.mxu0 %v9662_v33 }
  0x4d   : > { %v8702_v23 = vld [vmem:[%s9578_s12 + $0x108] sm:$0xff]   ;;  %v8703_v24 = vld [vmem:[%s9578_s12 + $0x100] sm:$0xff]   ;;  %v8706_v27 = vld [vmem:[%s9578_s12 + $0xd8] sm:$0xff]   ;;  %8377 = vmatprep.subr.bf16.mxu1 %v9673_v35  ;;  %8359 = vmatprep.subr.bf16.mxu0 %v9673_v35 }
  0x4e   : > { %1450 = vrot.lane.b32.xlu1 %v8684_v5, %s9331_s18  ;;  %v8707_v28 = vld [vmem:[%s9578_s12 + $0xd0] sm:$0xff]   ;;  %v8708_v29 = vld [vmem:[%s9578_s12 + $0xf8] sm:$0xff]   ;;  %v8712_v36 = vld [vmem:[%s9578_s12 + $0x128] sm:$0xff]  }
  0x4f   : > { %1448 = vrot.lane.b32.xlu0 %v8685_v6, %s9331_s18  ;;  %v8709_v30 = vld [vmem:[%s9578_s12 + $0xf0] sm:$0xff]   ;;  %v8710_v32 = vld [vmem:[%s9578_s12 + $0x118] sm:$0xff]   ;;  %v8713_v37 = vld [vmem:[%s9578_s12 + $0x120] sm:$0xff]  }
  0x50   : > { %v8711_v34 = vld [vmem:[%s9578_s12 + $0x110] sm:$0xff]   ;;  %v9690_v39 = vld [vmem:[%s9578_s12 + $0x1e0] sm:$0xff]   ;;  %v8714_v40 = vld [vmem:[%s9578_s12 + $0x148] sm:$0xff]   ;;  %8378 = vmatpush3.bf16.msra.mxu1 %v9673_v35  ;;  %8360 = vmatpush3.bf16.msra.mxu0 %v9673_v35 }
  0x51   : > { %v8715_v41 = vld [vmem:[%s9578_s12 + $0x140] sm:$0xff]   ;;  %8379 = vmatprep.subr.bf16.mxu1 %v9686_v38  ;;  %v8716_v42 = vld [vmem:[%s9578_s12 + $0x168] sm:$0xff]   ;;  %v1078_v44 = vshrl.u32 %v9690_v39, 16  ;;  %8361 = vmatprep.subr.bf16.mxu0 %v9686_v38  ;;  %v1081_v45 = vshll.u32 %v9690_v39, 16  ;;  %v8720_v51 = vld [vmem:[%s9578_s12 + $0x138] sm:$0xff]  }
  0x52   : > { %1478 = vrot.lane.b32.xlu1 %v8686_v7, %s9332_s19  ;;  %v8717_v43 = vld [vmem:[%s9578_s12 + $0x160] sm:$0xff]   ;;  %v8718_v46 = vld [vmem:[%s9578_s12 + $0x188] sm:$0xff]   ;;  %v8721_v52 = vld [vmem:[%s9578_s12 + $0x130] sm:$0xff]  }
  0x53   : > { %1476 = vrot.lane.b32.xlu0 %v8687_v8, %s9332_s19  ;;  %v8719_v47 = vld [vmem:[%s9578_s12 + $0x180] sm:$0xff]   ;;  %v1080_v48 = vrot.slane %v1078_v44, 7  ;;  %v9722_v50 = vld [vmem:[%s9578_s12 + $0x1e8] sm:$0xff]   ;;  %v8722_v53 = vld [vmem:[%s9578_s12 + $0x158] sm:$0xff]  }
  0x54   : > { %8380 = vmatpush3.bf16.msra.mxu1 %v9686_v38  ;;  %8362 = vmatpush3.bf16.msra.mxu0 %v9686_v38  ;;  %v8723_v54 = vld [vmem:[%s9578_s12 + $0x150] sm:$0xff]   ;;  %v1085_v55 = vshrl.u32 %v9722_v50, 16  ;;  %v8724_v57 = vld [vmem:[%s9578_s12 + $0x178] sm:$0xff]   ;;  %v1088_v58 = vshll.u32 %v9722_v50, 16  ;;  %v8730_v6 = vld [vmem:[%s9578_s12 + $0x1a0] sm:$0xff]  }
  0x55   : > { %8407 = vmatprep.subr.bf16.mxu1 %v9573_v0  ;;  %8389 = vmatprep.subr.bf16.mxu0 %v9573_v0  ;;  %v1083_v56 = vor.u32 %v1081_v45, %v1080_v48  ;;  %v8725_v59 = vld [vmem:[%s9578_s12 + $0x170] sm:$0xff]   ;;  %v8726_v62 = vld [vmem:[%s9578_s12 + $0x198] sm:$0xff]   ;;  %v8731_v7 = vld [vmem:[%s9578_s12] sm:$0xff]  }
  0x56   : > { %1418 = vrot.lane.b32.xlu1 %v8688_v9, %s9330_s17  ;;  %v1087_v60 = vrot.slane %v1085_v55, 7  ;;  %v8727_v63 = vld [vmem:[%s9578_s12 + $0x190] sm:$0xff]   ;;  %v8732_v8 = vld [vmem:[%s9578_s12 + $0x8] sm:$0xff]   ;;  %v8733_v9 = vld [vmem:[%s9578_s12 + $0x1c0] sm:$0xff]  }
  0x57   : > { %1416 = vrot.lane.b32.xlu0 %v8689_v10, %s9330_s17  ;;  %v1119_v61 = vsel %vm9717_vm2, 0, %v1083_v56  ;;  %v8734_v10 = vld [vmem:[%s9578_s12 + $0x1a8] sm:$0xff]   ;;  %vm9768_vm5 = vmand %vm1174_vm4, %vm1131_vm3  ;;  %v9815_v56 = vld [vmem:[%s12345_s1] sm:$0xff]  }
  0x58   : > { %v1090_v0 = vor.u32 %v1088_v58, %v1087_v60  ;;  %v9210_v60 = vld [vmem:[%s9578_s12 + $0x38] sm:$0xff]  }
  0x59   : > { %v9208_v49 = vld [vmem:[%s12350_s6 + $0x38] sm:$0xff]  }
  0x5a   : > { %1426 = vrot.lane.b32.xlu1 %v8690_v11, %s9329_s13  ;;  %v1091_v5 = vsel %vm1020_vm0, %v1080_v48, %v1090_v0  ;;  %v9760_v11 = vld [vmem:[%s9578_s12 + $0x1f8] sm:$0xff]  }
  0x5b   : > { %1424 = vrot.lane.b32.xlu0 %v8691_v12, %s9329_s13  ;;  %v9764_v12 = vld [vmem:[%s9578_s12 + $0x1f0] sm:$0xff]  }
  0x5e   : > { %1454 = vrot.lane.b32.xlu1 %v8692_v13, %s9331_s18  ;;  %v1140_v13 = vshll.u32 %v8732_v8, 16 }
  0x5f   : > { %1452 = vrot.lane.b32.xlu0 %v8693_v14, %s9331_s18 }
  0x62   : > { %1482 = vrot.lane.b32.xlu1 %v8694_v15, %s9332_s19  ;;  %v1135_v15 = vshll.u32 %v8731_v7, 16 }
  0x63   : > { %1480 = vrot.lane.b32.xlu0 %v8695_v16, %s9332_s19  ;;  %v8737_v16 = vld [vmem:[%s9578_s12 + $0x1c8] sm:$0xff]  }
  0x66   : > { %1796 = vrot.lane.b32.xlu1 %v8696_v17, %s9330_s17  ;;  %v1144_v17 = vshrl.u32 %v8732_v8, 16 }
  0x67   : > { %1794 = vrot.lane.b32.xlu0 %v8697_v18, %s9330_s17  ;;  %v1111_v18 = vshrl.u32 %v9760_v11, 16 }
  0x6a   : > { %1804 = vrot.lane.b32.xlu1 %v8698_v19, %s9329_s13 }
  0x6b   : > { %1802 = vrot.lane.b32.xlu0 %v8699_v20, %s9329_s13  ;;  %v1133_v20 = vshrl.u32 %v8731_v7, 16 }
  0x6e   : > { %1832 = vrot.lane.b32.xlu1 %v8700_v21, %s9331_s18  ;;  %v1137_v21 = vrot.slane %v1135_v15, 1  ;;  %v9853_v15 = vld [vmem:[%s9578_s12 + $0x1d8] sm:$0xff]  }
  0x6f   : > { %1830 = vrot.lane.b32.xlu0 %v8701_v22, %s9331_s18  ;;  %v1104_v22 = vshrl.u32 %v9764_v12, 16 }
  0x72   : > { %1860 = vrot.lane.b32.xlu1 %v8702_v23, %s9332_s19 }
  0x73   : > { %1858 = vrot.lane.b32.xlu0 %v8703_v24, %s9332_s19 }
  0x76   : > { %1800 = vrot.lane.b32.xlu1 %v8704_v25, %s9330_s17  ;;  %v1114_v25 = vshll.u32 %v9760_v11, 16 }
  0x77   : > { %1798 = vrot.lane.b32.xlu0 %v8705_v26, %s9330_s17  ;;  %v1138_v26 = vor.u32 %v1137_v21, %v1133_v20 }
  0x7a   : > { %1808 = vrot.lane.b32.xlu1 %v8706_v27, %s9329_s13  ;;  %v1106_v27 = vrot.slane %v1104_v22, 7 }
  0x7b   : > { %1806 = vrot.lane.b32.xlu0 %v8707_v28, %s9329_s13  ;;  %v1107_v28 = vshll.u32 %v9764_v12, 16 }
  0x7e   : > { %1836 = vrot.lane.b32.xlu1 %v8708_v29, %s9331_s18 }
  0x7f   : > { %1834 = vrot.lane.b32.xlu0 %v8709_v30, %s9331_s18 }
  0x82   : > { %1864 = vrot.lane.b32.xlu1 %v8710_v32, %s9332_s19 }
  0x83   : > { %1862 = vrot.lane.b32.xlu0 %v8711_v34, %s9332_s19 }
  0x86   : > { %2182 = vrot.lane.b32.xlu1 %v8712_v36, %s9330_s17 }
  0x87   : > { %2180 = vrot.lane.b32.xlu0 %v8713_v37, %s9330_s17 }
  0x8a   : > { %2190 = vrot.lane.b32.xlu1 %v8714_v40, %s9329_s13 }
  0x8b   : > { %2188 = vrot.lane.b32.xlu0 %v8715_v41, %s9329_s13 }
  0x8e   : > { %2218 = vrot.lane.b32.xlu1 %v8716_v42, %s9331_s18 }
  0x8f   : > { %2216 = vrot.lane.b32.xlu0 %v8717_v43, %s9331_s18 }
  0x92   : > { %2246 = vrot.lane.b32.xlu1 %v8718_v46, %s9332_s19 }
  0x93   : > { %2244 = vrot.lane.b32.xlu0 %v8719_v47, %s9332_s19  ;;  %v9802_v47 = vld [vmem:[%s9578_s12 + $0x18] sm:$0xff]  }
  0x94   : > { %v1166_v22 = vshll.u32 %v9802_v47, 16 }
  0x96   : > { %2186 = vrot.lane.b32.xlu1 %v8720_v51, %s9330_s17 }
  0x97   : > { %2184 = vrot.lane.b32.xlu0 %v8721_v52, %s9330_s17  ;;  %v8744_v52 = vld [vmem:[%s9578_s12 + $0x10] sm:$0xff]  }
  0x98   : > { %v1159_v20 = vshrl.u32 %v8744_v52, 16 }
  0x9a   : > { %2194 = vrot.lane.b32.xlu1 %v8722_v53, %s9329_s13 }
  0x9b   : > { %2192 = vrot.lane.b32.xlu0 %v8723_v54, %s9329_s13 }
  0x9e   : > { %2222 = vrot.lane.b32.xlu1 %v8724_v57, %s9331_s18 }
  0x9f   : > { %2220 = vrot.lane.b32.xlu0 %v8725_v59, %s9331_s18 }
  0xa2   : > { %2250 = vrot.lane.b32.xlu1 %v8726_v62, %s9332_s19 }
  0xa3   : > { %2248 = vrot.lane.b32.xlu0 %v8727_v63, %s9332_s19  ;;  %v9831_v63 = vld [vmem:[%s9578_s12 + $0x1b8] sm:$0xff]  }
  0xa6   : > { %1182 = vrot.lane.b32.xlu1 %v1091_v5, %s9330_s17 }
  0xa7   : > { %1180 = vrot.lane.b32.xlu0 %v1119_v61, %s9330_s17  ;;  %v9211_v61 = vld [vmem:[%s9578_s12 + $0x30] sm:$0xff]  }
  0xaa   : > { %2546 = vrot.lane.b32.xlu1 %v8730_v6, %s9330_s17  ;;  %v9839_v6 = vld [vmem:[%s9578_s12 + $0x58] sm:$0xff]  }
  0xab   : > { %1188 = vrot.lane.b32.xlu0 %v8731_v7, %s9329_s13 }
  0xae   : > { %1216 = vrot.lane.b32.xlu1 %v9586_v2, %s9331_s18  ;;  %v1142_v2 = vrot.slane %v1140_v13, 1 }
  0xaf   : > { %1190 = vrot.lane.b32.xlu0 %v8732_v8, %s9329_s13 }
  0xb0   : > { %v1146_v24 = vor.u32 %v1144_v17, %v1142_v2  ;;  %v1143_v37 = vsel %vm1131_vm3, %v1138_v26, %v1142_v2  ;;  %v9214_v26 = vld [vmem:[%s9578_s12 + $0x88] sm:$0xff]  }
  0xb2   : > { %2554 = vrot.lane.b32.xlu1 %v8733_v9, %s9329_s13  ;;  %v1176_v30 = vsel %vm9768_vm5, %v1146_v24, 0  ;;  %v1161_v9 = vshll.u32 %v8744_v52, 16 }
  0xb3   : > { %2548 = vrot.lane.b32.xlu0 %v8734_v10, %s9330_s17 }
  0xb4   : > { %v1163_v21 = vrot.slane %v1161_v9, 1 }
  0xb6   : > { %1244 = vrot.lane.b32.xlu1 %v9581_v1, %s9332_s19  ;;  %v1113_v1 = vrot.slane %v1111_v18, 7  ;;  %v9858_v18 = vld [vmem:[%s9578_s12 + $0x1d0] sm:$0xff]   ;;  %v1164_v24 = vor.u32 %v1163_v21, %v1159_v20  ;;  %v9955_v20 = vld [vmem:[%s12345_s1 + $0x20] sm:$0xff]  }
  0xb7   : > { %1218 = vrot.lane.b32.xlu0 %v9596_v4, %s9331_s18  ;;  %v9229_v21 = vld [vmem:[%s9578_s12 + $0x70] sm:$0xff]  }
  0xb8   : > { %v1421_v19 = vpop.permute.xlu1 %1420  ;;  %v1116_v32 = vor.u32 %v1114_v25, %v1113_v1  ;;  %v1168_v1 = vrot.slane %v1166_v22, 1 }
  0xb9   : > { %v1413_v23 = vpop.permute.xlu0 %1412 }
  0xba   : > { %2562 = vrot.lane.b32.xlu1 %v9690_v39, %s9331_s18  ;;  %v1109_v39 = vor.u32 %v1107_v28, %v1106_v27  ;;  %v1485_v40 = vsel %vm1252_vm6, %v8731_v7, %v1413_v23  ;;  %v1117_v42 = vsel %vm1020_vm0, %v1106_v27, %v1116_v32  ;;  %v9215_v28 = vld [vmem:[%s9578_s12 + $0x60] sm:$0xff]  }
  0xbb   : > { %2556 = vrot.lane.b32.xlu0 %v8737_v16, %s9329_s13  ;;  %v1493_v44 = vsel %vm1265_vm7, %v1485_v40, %v1421_v19 }
  0xbc   : > { %v1423_v4 = vpop.permute.xlu1 %1422  ;;  %v1120_v46 = vsel %vm9717_vm2, 0, %v1109_v39 }
  0xbd   : > { %v1415_v29 = vpop.permute.xlu0 %1414 }
  0xbe   : > { %2564 = vrot.lane.b32.xlu1 %v9722_v50, %s9331_s18  ;;  %v1487_v34 = vsel %vm1252_vm6, %v8732_v8, %v1415_v29  ;;  %v9846_v8 = vld [vmem:[%s9578_s12 + $0x50] sm:$0xff]  }
  0xbf   : > { %1246 = vrot.lane.b32.xlu0 %v9591_v3, %s9332_s19  ;;  %v1495_v3 = vsel %vm1265_vm7, %v1487_v34, %v1423_v4 }
  0xc0   : > { %v1451_v36 = vpop.permute.xlu1 %1450 }
  0xc1   : > { %v1449_v41 = vpop.permute.xlu0 %1448  ;;  %v1503_v43 = vsel %vm1274_vm8, %v1495_v3, %v1451_v36  ;;  %v9216_v36 = vld [vmem:[%s9578_s12 + $0x80] sm:$0xff]  }
  0xc2   : > { %2574 = vrot.lane.b32.xlu1 %v1176_v30, %s9332_s19  ;;  %v1501_v48 = vsel %vm1274_vm8, %v1493_v44, %v1449_v41  ;;  %v1170_v30 = vshrl.u32 %v9802_v47, 16 }
  0xc3   : > { %2572 = vrot.lane.b32.xlu0 %v1143_v37, %s9332_s19 }
  0xc4   : > { %v1479_v45 = vpop.permute.xlu1 %1478  ;;  %v1172_v41 = vor.u32 %v1170_v30, %v1168_v1  ;;  %v9234_v30 = vld [vmem:[%s9578_s12 + $0x100] sm:$0xff]  }
  0xc5   : > { %v1511_v50 = vsel %vm1283_vm9, %v1503_v43, %v1479_v45  ;;  %v1477_v51 = vpop.permute.xlu0 %1476  ;;  %v9217_v45 = vld [vmem:[%s9578_s12 + $0x68] sm:$0xff]  }
  0xc6   : > { %1186 = vrot.lane.b32.xlu1 %v1117_v42, %s9330_s17  ;;  %v1509_v53 = vsel %vm1283_vm9, %v1501_v48, %v1477_v51  ;;  %v9907_v48 = vld [vmem:[%s12345_s1 + $0x8] sm:$0xff]  }
  0xc7   : > { %8381 = vmatprep.mubr.msk.bf16.mxu1 %vm1326_vm10, %v1509_v53  ;;  %1184 = vrot.lane.b32.xlu0 %v1120_v46, %s9330_s17  ;;  %v1177_v46 = vsel %vm9768_vm5, %v1172_v41, 0 }
  0xc8   : > { %8382 = vmatmul.mubr.msk.bf16.vlgmr.msra.gmra.mrb[0].mxu1 %vm1326_vm10, %v1511_v50  ;;  %v1419_v54 = vpop.permute.xlu1 %1418 }
  0xc9   : > { %v1417_v55 = vpop.permute.xlu0 %1416  ;;  %8408 = vmatpush3.bf16.msra.mxu1 %v9815_v56  ;;  %v1491_v59 = vsel %vm1252_vm6, %v9802_v47, %v1419_v54  ;;  %v9220_v54 = vld [vmem:[%s9578_s12 + $0xa8] sm:$0xff]  }
  0xca   : > { %1194 = vrot.lane.b32.xlu1 %v9802_v47, %s9329_s13  ;;  %8409 = vmatprep.subr.bf16.mxu1 %v9655_v31  ;;  %v1489_v7 = vsel %vm1252_vm6, %v8744_v52, %v1417_v55  ;;  %v9919_v55 = vld [vmem:[%s12345_s1 + $0x10] sm:$0xff]  }
  0xcb   : > { %1192 = vrot.lane.b32.xlu0 %v8744_v52, %s9329_s13  ;;  %v9219_v52 = vld [vmem:[%s9578_s12 + $0x98] sm:$0xff]  }
  0xcc   : > { %v1427_v57 = vpop.permute.xlu1 %1426 }
  0xcd   : > { %v1425_v58 = vpop.permute.xlu0 %1424  ;;  %8410 = vmatpush3.bf16.msra.mxu1 %v9655_v31  ;;  %v1499_v0 = vsel %vm1265_vm7, %v1491_v59, %v1427_v57  ;;  %v9835_v31 = vld [vmem:[%s9578_s12 + $0x1b0] sm:$0xff]   ;;  %v9222_v57 = vld [vmem:[%s9578_s12 + $0xa0] sm:$0xff]  }
  0xce   : > { %1222 = vrot.lane.b32.xlu1 %v9210_v60, %s9331_s18  ;;  %8411 = vmatprep.subr.bf16.mxu1 %v9662_v33  ;;  %v1497_v10 = vsel %vm1265_vm7, %v1489_v7, %v1425_v58  ;;  %v9940_v7 = vld [vmem:[%s9578_s12 + $0xc0] sm:$0xff]  }
  0xcf   : > { %1220 = vrot.lane.b32.xlu0 %v9211_v61, %s9331_s18  ;;  %v9927_v61 = vld [vmem:[%s9578_s12 + $0xc8] sm:$0xff]  }
  0xd0   : > { %v1455_v62 = vpop.permute.xlu1 %1454 }
  0xd1   : > { %v1453_v5 = vpop.permute.xlu0 %1452  ;;  %8412 = vmatpush3.bf16.msra.mxu1 %v9662_v33  ;;  %v1507_v13 = vsel %vm1274_vm8, %v1499_v0, %v1455_v62  ;;  %v9934_v62 = vld [vmem:[%s12345_s1 + $0x18] sm:$0xff]   ;;  %v9225_v0 = vld [vmem:[%s9578_s12 + $0x90] sm:$0xff]  }
  0xd2   : > { %1250 = vrot.lane.b32.xlu1 %v9839_v6, %s9332_s19  ;;  %8413 = vmatprep.subr.bf16.mxu1 %v9673_v35  ;;  %v1505_v16 = vsel %vm1274_vm8, %v1497_v10, %v1453_v5 }
  0xd3   : > { %1248 = vrot.lane.b32.xlu0 %v9846_v8, %s9332_s19 }
  0xd4   : > { %v1483_v33 = vpop.permute.xlu1 %1482 }
  0xd5   : > { %v1515_v2 = vsel %vm1283_vm9, %v1507_v13, %v1483_v33  ;;  %v1481_v17 = vpop.permute.xlu0 %1480  ;;  %8414 = vmatpush3.bf16.msra.mxu1 %v9673_v35 }
  0xd6   : > { %v1513_v19 = vsel %vm1283_vm9, %v1505_v16, %v1481_v17  ;;  %2552 = vrot.lane.b32.xlu1 %v9831_v63, %s9330_s17  ;;  %8415 = vmatprep.subr.bf16.mxu1 %v9686_v38 }
  0xd7   : > { %8385 = vmatprep.mubr.msk.bf16.mxu1 %vm1326_vm10, %v1513_v19  ;;  %2550 = vrot.lane.b32.xlu0 %v9835_v31, %s9330_s17  ;;  %v9227_v19 = vld [vmem:[%s9578_s12 + $0x78] sm:$0xff]  }
  0xd8   : > { %8386 = vmatmul.mubr.msk.bf16.gmra.mrb[4].mxu1 %vm1326_vm10, %v1515_v2  ;;  %v1797_v35 = vpop.permute.xlu1 %1796 }
  0xd9   : > { %v1795_v23 = vpop.permute.xlu0 %1794  ;;  %8416 = vmatpush3.bf16.msra.mxu1 %v9686_v38  ;;  %v1871_v27 = vsel %vm1252_vm6, %v9214_v26, %v1797_v35  ;;  %v1169_v38 = vsel %vm1131_vm3, %v1164_v24, %v1168_v1  ;;  %v9230_v1 = vld [vmem:[%s9578_s12 + $0x108] sm:$0xff]  }
  0xda   : > { %2560 = vrot.lane.b32.xlu1 %v9853_v15, %s9329_s13  ;;  %8443 = vmatprep.subr.bf16.mxu1 %v9815_v56  ;;  %v1868_v37 = vsel %vm1252_vm6, %v9216_v36, %v1795_v23 }
  0xdb   : > { %2558 = vrot.lane.b32.xlu0 %v9858_v18, %s9329_s13 }
  0xdc   : > { %v1805_v25 = vpop.permute.xlu1 %1804 }
  0xdd   : > { %v1803_v4 = vpop.permute.xlu0 %1802  ;;  %v1881_v32 = vsel %vm1265_vm7, %v1871_v27, %v1805_v25 }
  0xde   : > { %1601 = vrot.lane.b32.xlu1 %v9215_v28, %s9330_s17  ;;  %v1879_v39 = vsel %vm1265_vm7, %v1868_v37, %v1803_v4  ;;  %v9231_v4 = vld [vmem:[%s9578_s12 + $0xb8] sm:$0xff]  }
  0xdf   : > { %2566 = vrot.lane.b32.xlu0 %v9764_v12, %s9331_s18 }
  0xe0   : > { %v1833_v29 = vpop.permute.xlu1 %1832 }
  0xe1   : > { %v1831_v34 = vpop.permute.xlu0 %1830  ;;  %v1889_v12 = vsel %vm1274_vm8, %v1881_v32, %v1833_v29  ;;  %v9974_v29 = vld [vmem:[%s9578_s12 + $0xd8] sm:$0xff]  }
  0xe2   : > { %2576 = vrot.lane.b32.xlu1 %v1169_v38, %s9332_s19  ;;  %v1887_v3 = vsel %vm1274_vm8, %v1879_v39, %v1831_v34  ;;  %v9981_v34 = vld [vmem:[%s9578_s12 + $0xd0] sm:$0xff]  }
  0xe3   : > { %2568 = vrot.lane.b32.xlu0 %v9760_v11, %s9331_s18 }
  0xe4   : > { %v1861_v40 = vpop.permute.xlu1 %1860 }
  0xe5   : > { %v1897_v42 = vsel %vm1283_vm9, %v1889_v12, %v1861_v40  ;;  %v1859_v43 = vpop.permute.xlu0 %1858 }
  0xe6   : > { %v1895_v44 = vsel %vm1283_vm9, %v1887_v3, %v1859_v43  ;;  %1609 = vrot.lane.b32.xlu1 %v9216_v36, %s9329_s13  ;;  %v9237_v43 = vld [vmem:[%s9578_s12 + $0xe0] sm:$0xff]  }
  0xe7   : > { %8417 = vmatprep.mubr.msk.bf16.mxu1 %vm1326_vm10, %v1895_v44  ;;  %1603 = vrot.lane.b32.xlu0 %v9217_v45, %s9330_s17 }
  0xe8   : > { %8418 = vmatmul.mubr.msk.bf16.vlgmr.msra.gmra.mrb[8].mxu1 %vm1326_vm10, %v1897_v42  ;;  %v1801_v11 = vpop.permute.xlu1 %1800  ;;  %v9236_v42 = vld [vmem:[%s9578_s12 + $0xe8] sm:$0xff]  }
  0xe9   : > { %v1799_v47 = vpop.permute.xlu0 %1798  ;;  %8444 = vmatpush3.bf16.msra.mxu1 %v9815_v56  ;;  %v1877_v53 = vsel %vm1252_vm6, %v9219_v52, %v1801_v11 }
  0xea   : > { %1611 = vrot.lane.b32.xlu1 %v9214_v26, %s9329_s13  ;;  %8445 = vmatprep.subr.bf16.mxu1 %v9907_v48  ;;  %v1874_v5 = vsel %vm1252_vm6, %v9225_v0, %v1799_v47  ;;  %v9232_v26 = vld [vmem:[%s9578_s12 + $0xb0] sm:$0xff]   ;;  %v9238_v47 = vld [vmem:[%s9578_s12 + $0x118] sm:$0xff]  }
  0xeb   : > { %2578 = vrot.lane.b32.xlu0 %v1177_v46, %s9332_s19 }
  0xec   : > { %v1809_v50 = vpop.permute.xlu1 %1808 }
  0xed   : > { %v1807_v51 = vpop.permute.xlu0 %1806  ;;  %8446 = vmatpush3.bf16.msra.mxu1 %v9907_v48  ;;  %v1885_v59 = vsel %vm1265_vm7, %v1877_v53, %v1809_v50 }
  0xee   : > { %1639 = vrot.lane.b32.xlu1 %v9220_v54, %s9331_s18  ;;  %8447 = vmatprep.subr.bf16.mxu1 %v9919_v55  ;;  %v1883_v9 = vsel %vm1265_vm7, %v1874_v5, %v1807_v51  ;;  %v9239_v51 = vld [vmem:[%s9578_s12 + $0x128] sm:$0xff]  }
  0xef   : > { %1637 = vrot.lane.b32.xlu0 %v9222_v57, %s9331_s18 }
  0xf0   : > { %v1837_v58 = vpop.permute.xlu1 %1836 }
  0xf1   : > { %v1835_v60 = vpop.permute.xlu0 %1834  ;;  %8448 = vmatpush3.bf16.msra.mxu1 %v9919_v55  ;;  %v1893_v10 = vsel %vm1274_vm8, %v1885_v59, %v1837_v58  ;;  %v10011_v58 = vld [vmem:[%s9578_s12 + $0x148] sm:$0xff]   ;;  %v9242_v59 = vld [vmem:[%s9578_s12 + $0x110] sm:$0xff]  }
  0xf2   : > { %1667 = vrot.lane.b32.xlu1 %v9927_v61, %s9332_s19  ;;  %8449 = vmatprep.subr.bf16.mxu1 %v9934_v62  ;;  %v1891_v33 = vsel %vm1274_vm8, %v1883_v9, %v1835_v60 }
  0xf3   : > { %1665 = vrot.lane.b32.xlu0 %v9940_v7, %s9332_s19 }
  0xf4   : > { %v1865_v13 = vpop.permute.xlu1 %1864 }
  0xf5   : > { %v1901_v16 = vsel %vm1283_vm9, %v1893_v10, %v1865_v13  ;;  %v1863_v2 = vpop.permute.xlu0 %1862  ;;  %8450 = vmatpush3.bf16.msra.mxu1 %v9934_v62 }
  0xf6   : > { %v1899_v17 = vsel %vm1283_vm9, %v1891_v33, %v1863_v2  ;;  %1607 = vrot.lane.b32.xlu1 %v9227_v19, %s9330_s17  ;;  %8451 = vmatprep.subr.bf16.mxu1 %v9955_v20  ;;  %v9245_v19 = vld [vmem:[%s9578_s12 + $0xf0] sm:$0xff]  }
  0xf7   : > { %8421 = vmatprep.mubr.msk.bf16.mxu1 %vm1326_vm10, %v1899_v17  ;;  %1605 = vrot.lane.b32.xlu0 %v9229_v21, %s9330_s17  ;;  %v9244_v17 = vld [vmem:[%s9578_s12 + $0xf8] sm:$0xff]   ;;  %v10036_v21 = vld [vmem:[%s9578_s12 + $0x1c0] sm:$0xff]  }
  0xf8   : > { %8422 = vmatmul.mubr.msk.bf16.gmra.mrb[12].mxu1 %vm1326_vm10, %v1901_v16  ;;  %v2183_v22 = vpop.permute.xlu1 %2182 }
  0xf9   : > { %v2181_v35 = vpop.permute.xlu0 %2180  ;;  %8452 = vmatpush3.bf16.msra.mxu1 %v9955_v20  ;;  %v2257_v25 = vsel %vm1252_vm6, %v9230_v1, %v2183_v22  ;;  %v1022_v22 = vshrl.u32 %v10036_v21, 16 }
  0xfa   : > { %1615 = vrot.lane.b32.xlu1 %v9219_v52, %s9329_s13  ;;  %8479 = vmatprep.subr.bf16.mxu1 %v9815_v56  ;;  %v2254_v32 = vsel %vm1252_vm6, %v9234_v30, %v2181_v35  ;;  %v9240_v52 = vld [vmem:[%s9578_s12 + $0x120] sm:$0xff]  }
  0xfb   : > { %1613 = vrot.lane.b32.xlu0 %v9225_v0, %s9329_s13  ;;  %v10019_v0 = vld [vmem:[%s9578_s12 + $0x140] sm:$0xff]  }
  0xfc   : > { %v2191_v23 = vpop.permute.xlu1 %2190 }
  0xfd   : > { %v2189_v24 = vpop.permute.xlu0 %2188  ;;  %v2267_v28 = vsel %vm1265_vm7, %v2257_v25, %v2191_v23 }
  0xfe   : > { %1643 = vrot.lane.b32.xlu1 %v9231_v4, %s9331_s18  ;;  %v2265_v36 = vsel %vm1265_vm7, %v2254_v32, %v2189_v24  ;;  %v1024_v24 = vrot.slane %v1022_v22, 7 }
  0xff   : > { %1641 = vrot.lane.b32.xlu0 %v9232_v26, %s9331_s18  ;;  %v9247_v26 = vld [vmem:[%s9578_s12 + $0x1c8] sm:$0xff]  }
 0x100   : > { %v2219_v27 = vpop.permute.xlu1 %2218 }
 0x101   : > { %v2217_v38 = vpop.permute.xlu0 %2216  ;;  %v2275_v37 = vsel %vm1274_vm8, %v2267_v28, %v2219_v27  ;;  %v1029_v27 = vshrl.u32 %v9247_v26, 16  ;;  %v9248_v28 = vld [vmem:[%s9578_s12 + $0x138] sm:$0xff]  }
 0x102   : > { %1671 = vrot.lane.b32.xlu1 %v9974_v29, %s9332_s19  ;;  %v2273_v12 = vsel %vm1274_vm8, %v2265_v36, %v2217_v38 }
 0x103   : > { %1669 = vrot.lane.b32.xlu0 %v9981_v34, %s9332_s19 }
 0x104   : > { %v2247_v39 = vpop.permute.xlu1 %2246 }
 0x105   : > { %v2283_v40 = vsel %vm1283_vm9, %v2275_v37, %v2247_v39  ;;  %v2245_v41 = vpop.permute.xlu0 %2244  ;;  %v1031_v37 = vrot.slane %v1029_v27, 7  ;;  %v1032_v39 = vshll.u32 %v9247_v26, 16 }
 0x106   : > { %v2281_v3 = vsel %vm1283_vm9, %v2273_v12, %v2245_v41  ;;  %1989 = vrot.lane.b32.xlu1 %v9236_v42, %s9330_s17  ;;  %v10050_v12 = vld [vmem:[%s9578_s12 + $0x158] sm:$0xff]   ;;  %v10057_v41 = vld [vmem:[%s9578_s12 + $0x150] sm:$0xff]  }
 0x107   : > { %8453 = vmatprep.mubr.msk.bf16.mxu1 %vm1326_vm10, %v2281_v3  ;;  %1987 = vrot.lane.b32.xlu0 %v9237_v43, %s9330_s17  ;;  %v1034_v43 = vor.u32 %v1032_v39, %v1031_v37 }
 0x108   : > { %8454 = vmatmul.mubr.msk.bf16.vlgmr.msra.gmra.mrb[16].mxu1 %vm1326_vm10, %v2283_v40  ;;  %v2187_v44 = vpop.permute.xlu1 %2186 }
 0x109   : > { %v2185_v45 = vpop.permute.xlu0 %2184  ;;  %8480 = vmatpush3.bf16.msra.mxu1 %v9815_v56  ;;  %v2263_v50 = vsel %vm1252_vm6, %v9238_v47, %v2187_v44 }
 0x10a   : > { %1997 = vrot.lane.b32.xlu1 %v9230_v1, %s9329_s13  ;;  %8481 = vmatprep.subr.bf16.mxu1 %v9907_v48  ;;  %v2260_v60 = vsel %vm1252_vm6, %v9242_v59, %v2185_v45  ;;  %v1025_v1 = vshll.u32 %v10036_v21, 16  ;;  %v9252_v45 = vld [vmem:[%s9578_s12 + $0x168] sm:$0xff]  }
 0x10b   : > { %1995 = vrot.lane.b32.xlu0 %v9234_v30, %s9329_s13  ;;  %v9249_v30 = vld [vmem:[%s9578_s12 + $0x130] sm:$0xff]  }
 0x10c   : > { %v2195_v11 = vpop.permute.xlu1 %2194  ;;  %v1027_v38 = vor.u32 %v1025_v1, %v1024_v24  ;;  %v1058_v1 = vshll.u32 %v9853_v15, 16 }
 0x10d   : > { %v2193_v46 = vpop.permute.xlu0 %2192  ;;  %8482 = vmatpush3.bf16.msra.mxu1 %v9907_v48  ;;  %v2271_v54 = vsel %vm1265_vm7, %v2263_v50, %v2195_v11 }
 0x10e   : > { %2025 = vrot.lane.b32.xlu1 %v9239_v51, %s9331_s18  ;;  %8483 = vmatprep.subr.bf16.mxu1 %v9919_v55  ;;  %v2269_v5 = vsel %vm1265_vm7, %v2260_v60, %v2193_v46  ;;  %v1065_v40 = vsel %vm9717_vm2, 0, %v1027_v38  ;;  %v9253_v46 = vld [vmem:[%s9578_s12 + $0x160] sm:$0xff]  }
 0x10f   : > { %2023 = vrot.lane.b32.xlu0 %v9240_v52, %s9331_s18 }
 0x110   : > { %v2223_v53 = vpop.permute.xlu1 %2222 }
 0x111   : > { %v2221_v57 = vpop.permute.xlu0 %2220  ;;  %8484 = vmatpush3.bf16.msra.mxu1 %v9919_v55  ;;  %v2279_v9 = vsel %vm1274_vm8, %v2271_v54, %v2223_v53  ;;  %v1035_v53 = vsel %vm1020_vm0, %v1024_v24, %v1034_v43  ;;  %v9254_v54 = vld [vmem:[%s9578_s12 + $0x188] sm:$0xff]   ;;  %v9260_v43 = vld [vmem:[%s9578_s12 + $0x198] sm:$0xff]  }
 0x112   : > { %2053 = vrot.lane.b32.xlu1 %v10011_v58, %s9332_s19  ;;  %8485 = vmatprep.subr.bf16.mxu1 %v9934_v62  ;;  %v2277_v13 = vsel %vm1274_vm8, %v2269_v5, %v2221_v57  ;;  %v9255_v57 = vld [vmem:[%s9578_s12 + $0x180] sm:$0xff]  }
 0x113   : > { %2051 = vrot.lane.b32.xlu0 %v10019_v0, %s9332_s19 }
 0x114   : > { %v2251_v10 = vpop.permute.xlu1 %2250 }
 0x115   : > { %v2287_v33 = vsel %vm1283_vm9, %v2279_v9, %v2251_v10  ;;  %v2249_v16 = vpop.permute.xlu0 %2248  ;;  %8486 = vmatpush3.bf16.msra.mxu1 %v9934_v62  ;;  %v9256_v9 = vld [vmem:[%s9578_s12 + $0x1a8] sm:$0xff]   ;;  %v9257_v10 = vld [vmem:[%s9578_s12 + $0x1a0] sm:$0xff]  }
 0x116   : > { %v2285_v2 = vsel %vm1283_vm9, %v2277_v13, %v2249_v16  ;;  %1993 = vrot.lane.b32.xlu1 %v9244_v17, %s9330_s17  ;;  %8487 = vmatprep.subr.bf16.mxu1 %v9955_v20  ;;  %v1055_v13 = vshrl.u32 %v9853_v15, 16 }
 0x117   : > { %8457 = vmatprep.mubr.msk.bf16.mxu1 %vm1326_vm10, %v2285_v2  ;;  %1991 = vrot.lane.b32.xlu0 %v9245_v19, %s9330_s17 }
 0x118   : > { %8458 = vmatmul.mubr.msk.bf16.gmra.mrb[20].mxu1 %vm1326_vm10, %v2287_v33  ;;  %v1183_v35 = vpop.permute.xlu1 %1182  ;;  %v1057_v24 = vrot.slane %v1055_v13, 7 }
 0x119   : > { %v1181_v23 = vpop.permute.xlu0 %1180  ;;  %8488 = vmatpush3.bf16.msra.mxu1 %v9955_v20  ;;  %v1258_v60 = vsel %vm1252_vm6, %v1035_v53, %v1183_v35 }
 0x11a   : > { %2001 = vrot.lane.b32.xlu1 %v9238_v47, %s9329_s13  ;;  %v1255_v44 = vsel %vm1252_vm6, %v1065_v40, %v1181_v23  ;;  %v1060_v37 = vor.u32 %v1058_v1, %v1057_v24 }
 0x11b   : > { %1999 = vrot.lane.b32.xlu0 %v9242_v59, %s9329_s13 }
 0x11c   : > { %v2547_v25 = vpop.permute.xlu1 %2546 }
 0x11d   : > { %v1189_v4 = vpop.permute.xlu0 %1188  ;;  %v2582_v2 = vsel %vm1252_vm6, %v9255_v57, %v2547_v25 }
 0x11e   : > { %2029 = vrot.lane.b32.xlu1 %v9248_v28, %s9331_s18  ;;  %v1267_v11 = vsel %vm1265_vm7, %v1255_v44, %v1189_v4  ;;  %v1048_v28 = vshrl.u32 %v9858_v18, 16 }
 0x11f   : > { %2027 = vrot.lane.b32.xlu0 %v9249_v30, %s9331_s18 }
 0x120   : > { %v1217_v32 = vpop.permute.xlu1 %1216  ;;  %v1050_v39 = vrot.slane %v1048_v28, 7 }
 0x121   : > { %v1191_v36 = vpop.permute.xlu0 %1190  ;;  %v1276_v47 = vsel %vm1274_vm8, %v1267_v11, %v1217_v32  ;;  %v9258_v32 = vld [vmem:[%s9578_s12 + $0x178] sm:$0xff]  }
 0x122   : > { %2057 = vrot.lane.b32.xlu1 %v10050_v12, %s9332_s19  ;;  %v1269_v33 = vsel %vm1265_vm7, %v1258_v60, %v1191_v36  ;;  %v9259_v36 = vld [vmem:[%s9578_s12 + $0x170] sm:$0xff]   ;;  %v1061_v44 = vsel %vm1020_vm0, %v1050_v39, %v1060_v37  ;;  %v9263_v37 = vld [vmem:[%s9578_s12 + $0x48] sm:$0xff]  }
 0x123   : > { %2055 = vrot.lane.b32.xlu0 %v10057_v41, %s9332_s19 }
 0x124   : > { %v2555_v3 = vpop.permute.xlu1 %2554 }
 0x125   : > { %v2549_v42 = vpop.permute.xlu0 %2548  ;;  %v2593_v25 = vsel %vm1265_vm7, %v2582_v2, %v2555_v3  ;;  %v1051_v3 = vshll.u32 %v9858_v18, 16 }
 0x126   : > { %2375 = vrot.lane.b32.xlu1 %v9252_v45, %s9330_s17  ;;  %v2585_v22 = vsel %vm1252_vm6, %v9254_v54, %v2549_v42  ;;  %v9261_v45 = vld [vmem:[%s9578_s12 + $0x190] sm:$0xff]  }
 0x127   : > { %2373 = vrot.lane.b32.xlu0 %v9253_v46, %s9330_s17  ;;  %v1053_v11 = vor.u32 %v1051_v3, %v1050_v39 }
 0x128   : > { %v1245_v50 = vpop.permute.xlu1 %1244 }
 0x129   : > { %v1219_v51 = vpop.permute.xlu0 %1218  ;;  %v1285_v52 = vsel %vm1283_vm9, %v1276_v47, %v1245_v50 }
 0x12a   : > { %8363 = vmatprep.mubr.msk.bf16.mxu0 %vm1326_vm10, %v1285_v52  ;;  %2383 = vrot.lane.b32.xlu1 %v9254_v54, %s9329_s13  ;;  %v1278_v17 = vsel %vm1274_vm8, %v1269_v33, %v1219_v51  ;;  %v1066_v51 = vsel %vm9717_vm2, 0, %v1053_v11 }
 0x12b   : > { %2381 = vrot.lane.b32.xlu0 %v9255_v57, %s9329_s13 }
 0x12c   : > { %v2563_v59 = vpop.permute.xlu1 %2562 }
 0x12d   : > { %v2557_v5 = vpop.permute.xlu0 %2556 }
 0x12e   : > { %2411 = vrot.lane.b32.xlu1 %v9256_v9, %s9331_s18  ;;  %v2595_v23 = vsel %vm1265_vm7, %v2585_v22, %v2557_v5 }
 0x12f   : > { %2409 = vrot.lane.b32.xlu0 %v9257_v10, %s9331_s18 }
 0x130   : > { %v2565_v16 = vpop.permute.xlu1 %2564 }
 0x131   : > { %v1247_v19 = vpop.permute.xlu0 %1246  ;;  %v2603_v4 = vsel %vm1274_vm8, %v2595_v23, %v2565_v16 }
 0x132   : > { %v1287_v35 = vsel %vm1283_vm9, %v1278_v17, %v1247_v19  ;;  %2419 = vrot.lane.b32.xlu1 %v9247_v26, %s9332_s19  ;;  %v2601_v26 = vsel %vm1274_vm8, %v2593_v25, %v2563_v59 }
 0x133   : > { %8364 = vmatmul.mubr.msk.bf16.vlgmr.msra.gmra.mrb[0].mxu0 %vm1326_vm10, %v1287_v35  ;;  %2417 = vrot.lane.b32.xlu0 %v10036_v21, %s9332_s19 }
 0x134   : > { %v2575_v27 = vpop.permute.xlu1 %2574  ;;  %8390 = vmatpush3.bf16.msra.mxu0 %v9815_v56 }
 0x135   : > { %v2611_v38 = vsel %vm1283_vm9, %v2603_v4, %v2575_v27  ;;  %v2573_v30 = vpop.permute.xlu0 %2572  ;;  %8391 = vmatprep.subr.bf16.mxu0 %v9907_v48 }
 0x136   : > { %v2609_v21 = vsel %vm1283_vm9, %v2601_v26, %v2573_v30  ;;  %2379 = vrot.lane.b32.xlu1 %v9258_v32, %s9330_s17 }
 0x137   : > { %2377 = vrot.lane.b32.xlu0 %v9259_v36, %s9330_s17  ;;  %8489 = vmatprep.mubr.msk.bf16.mxu1 %vm1326_vm10, %v2609_v21  ;;  %v9262_v21 = vld [vmem:[%s9578_s12 + $0x40] sm:$0xff]   ;;  %s7165_s12 = scalar_lea.sflag [#allocation4], %s9568_s24  ;;  %s9269_s17 = sshll.u32 %s9333_s9, 4  ;;  %s9270_s17 = int_to_ptr.vmem [resolvable:$false] %s9269_s17 }
 0x138   : > { %8490 = vmatmul.mubr.msk.bf16.vlgmr.msra.gmra.mrb[24].mxu1 %vm1326_vm10, %v2611_v38  ;;  %v1187_v40 = vpop.permute.xlu1 %1186  ;;  %8392 = vmatpush3.bf16.msra.mxu0 %v9907_v48 }
 0x139   : > { %v1185_v42 = vpop.permute.xlu0 %1184  ;;  %8393 = vmatprep.subr.bf16.mxu0 %v9919_v55  ;;  %v1264_v50 = vsel %vm1252_vm6, %v1061_v44, %v1187_v40 }
 0x13a   : > { %2387 = vrot.lane.b32.xlu1 %v9260_v43, %s9329_s13  ;;  %v1261_v57 = vsel %vm1252_vm6, %v1066_v51, %v1185_v42  ;;  %v9264_v51 = vld [vmem:[%s12345_s1] sm:$0xff]  }
 0x13b   : > { %2385 = vrot.lane.b32.xlu0 %v9261_v45, %s9329_s13 }
 0x13c   : > { %v1195_v46 = vpop.permute.xlu1 %1194  ;;  %8394 = vmatpush3.bf16.msra.mxu0 %v9919_v55 }
 0x13d   : > { %v1193_v47 = vpop.permute.xlu0 %1192  ;;  %8395 = vmatprep.subr.bf16.mxu0 %v9934_v62  ;;  %v1273_v53 = vsel %vm1265_vm7, %v1264_v50, %v1195_v46 }
 0x13e   : > { %2415 = vrot.lane.b32.xlu1 %v9831_v63, %s9331_s18  ;;  %v1271_v63 = vsel %vm1265_vm7, %v1261_v57, %v1193_v47 }
 0x13f   : > { %2413 = vrot.lane.b32.xlu0 %v9835_v31, %s9331_s18  ;;  %s7251_s18 = sshll.u32 %s9568_s24, 1 }
 0x140   : > { %v1223_v52 = vpop.permute.xlu1 %1222  ;;  %8396 = vmatpush3.bf16.msra.mxu0 %v9934_v62  ;;  %s853_s20 = scalar_lea.vmem [#allocation3], %s7251_s18  ;;  %s9271_s18 = scalar_lea.vmem %s9270_s17, 64 }
 0x141   : > { %v1221_v54 = vpop.permute.xlu0 %1220  ;;  %8397 = vmatprep.subr.bf16.mxu0 %v9955_v20  ;;  %v1282_v31 = vsel %vm1274_vm8, %v1273_v53, %v1223_v52  ;;  %s7178_s21 = sshll.u32 %s853_s20, 4  ;;  %s12302_s21 = int_to_ptr.vmem [resolvable:$true] %s7178_s21 }
 0x142   : > { %2423 = vrot.lane.b32.xlu1 %v9853_v15, %s9332_s19  ;;  %v1280_v60 = vsel %vm1274_vm8, %v1271_v63, %v1221_v54  ;;  %s9265_s13 = scalar_lea.vmem %s12302_s21, 32  ;;  %p9272_p2 = scmp.lt.s32.totalorder %s12302_s21, %s9270_s17 }
 0x143   : > { %2421 = vrot.lane.b32.xlu0 %v9858_v18, %s9332_s19  ;;  %p9266_p13 = scmp.ne.s32.totalorder %s12302_s21, %s9265_s13  ;;  %p9273_p3 = scmp.lt.s32.totalorder %s9271_s18, %s9265_s13 }
 0x144   : > { %v1251_v59 = vpop.permute.xlu1 %1250  ;;  %8398 = vmatpush3.bf16.msra.mxu0 %v9955_v20 }
 0x145   : > { %v1291_v5 = vsel %vm1283_vm9, %v1282_v31, %v1251_v59  ;;  %v1249_v9 = vpop.permute.xlu0 %1248  ;;  %8425 = vmatprep.subr.bf16.mxu0 %v9815_v56  ;;  %p9267_p0 = pnand %p9266_p13, %p9417_p6  ;;  %p9274_p4 = por %p9273_p3, %p9272_p2 }
 0x146   : > { %v1289_v15 = vsel %vm1283_vm9, %v1280_v60, %v1249_v9 }
 0x147   : > { %8367 = vmatprep.mubr.msk.bf16.mxu0 %vm1326_vm10, %v1289_v15  ;;  %p9268_p1 = pneg %p9267_p0 }
 0x148   : > { %8368 = vmatmul.mubr.msk.bf16.gmra.mrb[4].mxu0 %vm1326_vm10, %v1291_v5  ;;  %v2553_v18 = vpop.permute.xlu1 %2552 }
 0x149   : > { %v2551_v10 = vpop.permute.xlu0 %2550  ;;  %v2591_v1 = vsel %vm1252_vm6, %v9260_v43, %v2553_v18  ;;  %p9275_p5 = pnand %p9274_p4, %p9268_p1 }
 0x14a   : > { %v2588_v17 = vsel %vm1252_vm6, %v9261_v45, %v2551_v10 }
 0x14c   : > { %v2561_v13 = vpop.permute.xlu1 %2560 }
 0x14d   : > { %v2559_v33 = vpop.permute.xlu0 %2558  ;;  %v2599_v4 = vsel %vm1265_vm7, %v2591_v1, %v2561_v13 }
 0x14e   : > { %v2597_v19 = vsel %vm1265_vm7, %v2588_v17, %v2559_v33 }
 0x150   : > { %v1602_v16 = vpop.permute.xlu1 %1601 }
 0x151   : > { %v2567_v2 = vpop.permute.xlu0 %2566  ;;  %v1675_v32 = vsel %vm1252_vm6, %v9262_v21, %v1602_v16 }
 0x152   : > { %v2605_v22 = vsel %vm1274_vm8, %v2597_v19, %v2567_v2 }
 0x154   : > { %v2577_v56 = vpop.permute.xlu1 %2576 }
 0x155   : > { %v2613_v35 = vsel %vm1283_vm9, %v2605_v22, %v2577_v56  ;;  %v2569_v23 = vpop.permute.xlu0 %2568 }
 0x156   : > { %8493 = vmatprep.mubr.msk.bf16.mxu1 %vm1326_vm10, %v2613_v35  ;;  %v2607_v28 = vsel %vm1274_vm8, %v2599_v4, %v2569_v23 }
 0x158   : > { %v1610_v24 = vpop.permute.xlu1 %1609 }
 0x159   : > { %v1604_v25 = vpop.permute.xlu0 %1603  ;;  %v1686_v3 = vsel %vm1265_vm7, %v1675_v32, %v1610_v24 }
 0x15a   : > { %v1678_v39 = vsel %vm1252_vm6, %v9263_v37, %v1604_v25 }
 0x15c   : > { %v1612_v27 = vpop.permute.xlu1 %1611 }
 0x15d   : > { %v2579_v26 = vpop.permute.xlu0 %2578  ;;  %v1688_v40 = vsel %vm1265_vm7, %v1678_v39, %v1612_v27 }
 0x15e   : > { %v2615_v38 = vsel %vm1283_vm9, %v2607_v28, %v2579_v26 }
 0x15f   : > { %8494 = vmatmul.mubr.msk.bf16.gmra.mrb[28].mxu1 %vm1326_vm10, %v2615_v38 }
 0x160   : > { %v1640_v30 = vpop.permute.xlu1 %1639 }
 0x161   : > { %v1638_v36 = vpop.permute.xlu0 %1637  ;;  %v1696_v42 = vsel %vm1274_vm8, %v1688_v40, %v1640_v30 }
 0x162   : > { %v1694_v44 = vsel %vm1274_vm8, %v1686_v3, %v1638_v36 }
 0x164   : > { %v1668_v43 = vpop.permute.xlu1 %1667 }
 0x165   : > { %v1704_v45 = vsel %vm1283_vm9, %v1696_v42, %v1668_v43  ;;  %v1666_v11 = vpop.permute.xlu0 %1665  ;;  %v10219_v43 = vld [vmem:[%s12347_s3] ss:$0 sm:$0xff] }
 0x166   : > { %v1702_v46 = vsel %vm1283_vm9, %v1694_v44, %v1666_v11 }
 0x167   : > { %8399 = vmatprep.mubr.msk.bf16.mxu0 %vm1326_vm10, %v1702_v46 }
 0x168   : > { %8400 = vmatmul.mubr.msk.bf16.vlgmr.msra.gmra.mrb[8].mxu0 %vm1326_vm10, %v1704_v45  ;;  %v1608_v47 = vpop.permute.xlu1 %1607 }
 0x169   : > { %v1606_v50 = vpop.permute.xlu0 %1605  ;;  %8426 = vmatpush3.bf16.msra.mxu0 %v9264_v51  ;;  %v1684_v52 = vsel %vm1252_vm6, %v9839_v6, %v1608_v47 }
 0x16a   : > { %8427 = vmatprep.subr.bf16.mxu0 %v9907_v48  ;;  %v1681_v54 = vsel %vm1252_vm6, %v9846_v8, %v1606_v50 }
 0x16c   : > { %v1616_v53 = vpop.permute.xlu1 %1615 }
 0x16d   : > { %v1614_v57 = vpop.permute.xlu0 %1613  ;;  %8428 = vmatpush3.bf16.msra.mxu0 %v9907_v48  ;;  %v1692_v63 = vsel %vm1265_vm7, %v1684_v52, %v1616_v53 }
 0x16e   : > { %8429 = vmatprep.subr.bf16.mxu0 %v9919_v55  ;;  %v1690_v31 = vsel %vm1265_vm7, %v1681_v54, %v1614_v57 }
 0x170   : > { %v1644_v59 = vpop.permute.xlu1 %1643 }
 0x171   : > { %v1642_v60 = vpop.permute.xlu0 %1641  ;;  %8430 = vmatpush3.bf16.msra.mxu0 %v9919_v55  ;;  %v1700_v5 = vsel %vm1274_vm8, %v1692_v63, %v1644_v59 }
 0x172   : > { %8431 = vmatprep.subr.bf16.mxu0 %v9934_v62  ;;  %v1698_v6 = vsel %vm1274_vm8, %v1690_v31, %v1642_v60 }
 0x174   : > { %v1672_v8 = vpop.permute.xlu1 %1671 }
 0x175   : > { %v1670_v9 = vpop.permute.xlu0 %1669  ;;  %v1708_v15 = vsel %vm1283_vm9, %v1700_v5, %v1672_v8  ;;  %8432 = vmatpush3.bf16.msra.mxu0 %v9934_v62 }
 0x176   : > { %v1706_v18 = vsel %vm1283_vm9, %v1698_v6, %v1670_v9  ;;  %8433 = vmatprep.subr.bf16.mxu0 %v9955_v20 }
 0x177   : > { %8403 = vmatprep.mubr.msk.bf16.mxu0 %vm1326_vm10, %v1706_v18 }
 0x178   : > { %8404 = vmatmul.mubr.msk.bf16.gmra.mrb[12].mxu0 %vm1326_vm10, %v1708_v15  ;;  %v1990_v10 = vpop.permute.xlu1 %1989 }
 0x179   : > { %v1988_v13 = vpop.permute.xlu0 %1987  ;;  %8434 = vmatpush3.bf16.msra.mxu0 %v9955_v20  ;;  %v2064_v33 = vsel %vm1252_vm6, %v9927_v61, %v1990_v10 }
 0x17a   : > { %8461 = vmatprep.subr.bf16.mxu0 %v9264_v51  ;;  %v2061_v2 = vsel %vm1252_vm6, %v9940_v7, %v1988_v13 }
 0x17c   : > { %v1998_v16 = vpop.permute.xlu1 %1997 }
 0x17d   : > { %v1996_v17 = vpop.permute.xlu0 %1995  ;;  %v2074_v19 = vsel %vm1265_vm7, %v2064_v33, %v1998_v16 }
 0x17e   : > { %v2072_v22 = vsel %vm1265_vm7, %v2061_v2, %v1996_v17 }
 0x180   : > { %v2026_v56 = vpop.permute.xlu1 %2025 }
 0x181   : > { %v2024_v35 = vpop.permute.xlu0 %2023  ;;  %v2082_v23 = vsel %vm1274_vm8, %v2074_v19, %v2026_v56 }
 0x182   : > { %v2080_v24 = vsel %vm1274_vm8, %v2072_v22, %v2024_v35 }
 0x184   : > { %v2054_v1 = vpop.permute.xlu1 %2053 }
 0x185   : > { %v2052_v25 = vpop.permute.xlu0 %2051  ;;  %v2090_v4 = vsel %vm1283_vm9, %v2082_v23, %v2054_v1 }
 0x186   : > { %v2088_v61 = vsel %vm1283_vm9, %v2080_v24, %v2052_v25 }
 0x187   : > { %8435 = vmatprep.mubr.msk.bf16.mxu0 %vm1326_vm10, %v2088_v61 }
 0x188   : > { %8436 = vmatmul.mubr.msk.bf16.vlgmr.msra.gmra.mrb[16].mxu0 %vm1326_vm10, %v2090_v4  ;;  %v1994_v7 = vpop.permute.xlu1 %1993 }
 0x189   : > { %v1992_v27 = vpop.permute.xlu0 %1991  ;;  %8462 = vmatpush3.bf16.msra.mxu0 %v9264_v51  ;;  %v2070_v28 = vsel %vm1252_vm6, %v9974_v29, %v1994_v7 }
 0x18a   : > { %8463 = vmatprep.subr.bf16.mxu0 %v9907_v48  ;;  %v2067_v38 = vsel %vm1252_vm6, %v9981_v34, %v1992_v27 }
 0x18c   : > { %v2002_v26 = vpop.permute.xlu1 %2001 }
 0x18d   : > { %v2000_v30 = vpop.permute.xlu0 %1999  ;;  %8464 = vmatpush3.bf16.msra.mxu0 %v9907_v48  ;;  %v2078_v21 = vsel %vm1265_vm7, %v2070_v28, %v2002_v26 }
 0x18e   : > { %8465 = vmatprep.subr.bf16.mxu0 %v9919_v55  ;;  %v2076_v32 = vsel %vm1265_vm7, %v2067_v38, %v2000_v30 }
 0x190   : > { %v2030_v36 = vpop.permute.xlu1 %2029 }
 0x191   : > { %v2028_v37 = vpop.permute.xlu0 %2027  ;;  %8466 = vmatpush3.bf16.msra.mxu0 %v9919_v55  ;;  %v2086_v39 = vsel %vm1274_vm8, %v2078_v21, %v2030_v36 }
 0x192   : > { %8467 = vmatprep.subr.bf16.mxu0 %v9934_v62  ;;  %v2084_v29 = vsel %vm1274_vm8, %v2076_v32, %v2028_v37 }
 0x194   : > { %v2058_v34 = vpop.permute.xlu1 %2057 }
 0x195   : > { %v2056_v40 = vpop.permute.xlu0 %2055  ;;  %v2094_v48 = vsel %vm1283_vm9, %v2086_v39, %v2058_v34  ;;  %8468 = vmatpush3.bf16.msra.mxu0 %v9934_v62 }
 0x196   : > { %v2092_v3 = vsel %vm1283_vm9, %v2084_v29, %v2056_v40  ;;  %8469 = vmatprep.subr.bf16.mxu0 %v9955_v20 }
 0x197   : > { %8439 = vmatprep.mubr.msk.bf16.mxu0 %vm1326_vm10, %v2092_v3 }
 0x198   : > { %8440 = vmatmul.mubr.msk.bf16.gmra.mrb[20].mxu0 %vm1326_vm10, %v2094_v48  ;;  %v2376_v55 = vpop.permute.xlu1 %2375 }
 0x199   : > { %v2374_v42 = vpop.permute.xlu0 %2373  ;;  %8470 = vmatpush3.bf16.msra.mxu0 %v9955_v20  ;;  %v2430_v62 = vsel %vm1252_vm6, %v10011_v58, %v2376_v55 }
 0x19a   : > { %v2427_v47 = vsel %vm1252_vm6, %v10019_v0, %v2374_v42 }
 0x19b   : > { %v8383_v44 = vpop.f32.mrb[0].mxu1 }
 0x19c   : > { %v1567_v45 = vadd.f32 %v8383_v44, %v10219_v43  ;;  %v1558_v11 = vpop.f32.mrb[1].mxu1  ;;  %v2384_v46 = vpop.permute.xlu1 %2383 }
 0x19d   : > { %v1559_v50 = vadd.f32 %v10219_v43, %v1558_v11  ;;  %v8384_v51 = vpop.f32.mrb[2].mxu1  ;;  %v2382_v52 = vpop.permute.xlu0 %2381  ;;  %v2440_v20 = vsel %vm1265_vm7, %v2430_v62, %v2384_v46 }
 0x19e   : > { %v1570_v53 = vadd.f32 %v8384_v51, %v10219_v43  ;;  %v1561_v54 = vpop.f32.mrb[3].mxu1  ;;  %v1591_v63 = vmax.f32 %v1567_v45, 0.0  ;;  %v2438_v31 = vsel %vm1265_vm7, %v2427_v47, %v2382_v52 }
 0x19f   : > { %v1562_v57 = vadd.f32 %v10219_v43, %v1561_v54  ;;  %v1589_v60 = vmax.f32 %v1559_v50, 0.0 }
 0x1a0   : > { %v1592_v58 = vmax.f32 %v1570_v53, 0.0  ;;  %v2412_v59 = vpop.permute.xlu1 %2411 }
 0x1a1   : > { %v1590_v5 = vmax.f32 %v1562_v57, 0.0  ;;  %v2410_v6 = vpop.permute.xlu0 %2409  ;;  %v2448_v8 = vsel %vm1274_vm8, %v2440_v20, %v2412_v59 }
 0x1a2   : > { %v1598_v0 = vpack.c.bf16 %v1592_v58, %v1591_v63  ;;  %v2446_v15 = vsel %vm1274_vm8, %v2438_v31, %v2410_v6 }
 0x1a3   : > { %v1597_v9 = vpack.c.bf16 %v1590_v5, %v1589_v60 }
 0x1a4   : > { %v2420_v18 = vpop.permute.xlu1 %2419 }
 0x1a5   : > { %2858 = vrot.lane.b32.xlu0 %v1597_v9, %s9332_s19  ;;  %v2418_v10 = vpop.permute.xlu0 %2417  ;;  %v2456_v13 = vsel %vm1283_vm9, %v2448_v8, %v2420_v18 }
 0x1a6   : > { %v2454_v33 = vsel %vm1283_vm9, %v2446_v15, %v2418_v10 }
 0x1a7   : > { %8471 = vmatprep.mubr.msk.bf16.mxu0 %vm1326_vm10, %v2454_v33 }
 0x1a8   : > { %8472 = vmatmul.mubr.msk.bf16.vlgmr.msra.gmra.mrb[24].mxu0 %vm1326_vm10, %v2456_v13  ;;  %v2380_v16 = vpop.permute.xlu1 %2379 }
 0x1a9   : > { %2860 = vrot.lane.b32.xlu0 %v1598_v0, %s9332_s19  ;;  %v2378_v2 = vpop.permute.xlu0 %2377  ;;  %v2436_v19 = vsel %vm1252_vm6, %v10050_v12, %v2380_v16 }
 0x1aa   : > { %v2433_v23 = vsel %vm1252_vm6, %v10057_v41, %v2378_v2 }
 0x1ab   : > { %v8387_v17 = vpop.f32.mrb[4].mxu1 }
 0x1ac   : > { %v1583_v22 = vadd.f32 %v8387_v17, %v10219_v43  ;;  %v1574_v56 = vpop.f32.mrb[5].mxu1  ;;  %v2388_v35 = vpop.permute.xlu1 %2387 }
 0x1ad   : > { %v1575_v24 = vadd.f32 %v10219_v43, %v1574_v56  ;;  %v8388_v1 = vpop.f32.mrb[6].mxu1  ;;  %v2386_v25 = vpop.permute.xlu0 %2385  ;;  %v2444_v7 = vsel %vm1265_vm7, %v2436_v19, %v2388_v35 }
 0x1ae   : > { %v1586_v4 = vadd.f32 %v8388_v1, %v10219_v43  ;;  %v1577_v61 = vpop.f32.mrb[7].mxu1  ;;  %v1595_v28 = vmax.f32 %v1583_v22, 0.0  ;;  %v2442_v26 = vsel %vm1265_vm7, %v2433_v23, %v2386_v25  ;;  %v10278_v22 = vld [vmem:[%s12346_s2 + $0x80] sm:$0xff]  }
 0x1af   : > { %v1578_v27 = vadd.f32 %v10219_v43, %v1577_v61  ;;  %v1593_v30 = vmax.f32 %v1575_v24, 0.0  ;;  %8513 = vmatprep.subr.bf16.mxu0 %v10278_v22 }
 0x1b0   : > { %v1596_v12 = vmax.f32 %v1586_v4, 0.0  ;;  %v2416_v38 = vpop.permute.xlu1 %2415  ;;  %8514 = vmatpush3.bf16.msra.mxu0 %v10278_v22  ;;  %v10288_v4 = vld [vmem:[%s12346_s2 + $0x88] sm:$0xff]  }
 0x1b1   : > { %v1594_v21 = vmax.f32 %v1578_v27, 0.0  ;;  %v2414_v32 = vpop.permute.xlu0 %2413  ;;  %v2452_v36 = vsel %vm1274_vm8, %v2444_v7, %v2416_v38  ;;  %8515 = vmatprep.subr.bf16.mxu0 %v10288_v4  ;;  %v10296_v7 = vld [vmem:[%s12346_s2 + $0x90] sm:$0xff]   ;;  %v10303_v27 = vld [vmem:[%s12346_s2 + $0x98] sm:$0xff]  }
 0x1b2   : > { %v1600_v41 = vpack.c.bf16 %v1596_v12, %v1595_v28  ;;  %v2450_v39 = vsel %vm1274_vm8, %v2442_v26, %v2414_v32 }
 0x1b3   : > { %v1599_v37 = vpack.c.bf16 %v1594_v21, %v1593_v30 }
 0x1b4   : > { %v2424_v29 = vpop.permute.xlu1 %2423  ;;  %8516 = vmatpush3.bf16.msra.mxu0 %v10288_v4 }
 0x1b5   : > { %2862 = vrot.lane.b32.xlu0 %v1599_v37, %s9332_s19  ;;  %v2422_v34 = vpop.permute.xlu0 %2421  ;;  %v2460_v40 = vsel %vm1283_vm9, %v2452_v36, %v2424_v29  ;;  %8517 = vmatprep.subr.bf16.mxu0 %v10296_v7  ;;  %v10320_v37 = vld [vmem:[%s12346_s2] sm:$0xff]  }
 0x1b6   : > { %v2458_v48 = vsel %vm1283_vm9, %v2450_v39, %v2422_v34 }
 0x1b7   : > { %8475 = vmatprep.mubr.msk.bf16.mxu0 %vm1326_vm10, %v2458_v48 }
 0x1b8   : > { %8476 = vmatmul.mubr.msk.bf16.gmra.mrb[28].mxu0 %vm1326_vm10, %v2460_v40 }
 0x1b9   : > { %2864 = vrot.lane.b32.xlu0 %v1600_v41, %s9332_s19  ;;  %8518 = vmatpush3.bf16.msra.mxu0 %v10296_v7  ;;  %v10313_v41 = vld [vmem:[%s12346_s2 + $0x40] sm:$0xff]  }
 0x1ba   : > { %8519 = vmatprep.subr.bf16.mxu0 %v10303_v27  ;;  %7995 = vmatprep.subr.bf16.mxu1 %v10313_v41 }
 0x1bb   : > { %v8419_v3 = vpop.f32.mrb[8].mxu1  ;;  %7996 = vmatpush3.bf16.msra.mxu1 %v10320_v37 }
 0x1bc   : > { %v1953_v55 = vadd.f32 %v8419_v3, %v10219_v43  ;;  %v1944_v42 = vpop.f32.mrb[9].mxu1  ;;  %v10329_v3 = vld [vmem:[%s12346_s2 + $0x48] sm:$0xff]  }
 0x1bd   : > { %v1945_v44 = vadd.f32 %v10219_v43, %v1944_v42  ;;  %v8420_v62 = vpop.f32.mrb[10].mxu1  ;;  %8520 = vmatpush3.bf16.msra.mxu0 %v10303_v27  ;;  %v10334_v42 = vld [vmem:[%s12346_s2 + $0x8] sm:$0xff]   ;;  %7997 = vmatprep.subr.bf16.mxu1 %v10329_v3 }
 0x1be   : > { %v1956_v45 = vadd.f32 %v8420_v62, %v10219_v43  ;;  %v1947_v11 = vpop.f32.mrb[11].mxu1  ;;  %v1977_v47 = vmax.f32 %v1953_v55, 0.0  ;;  %8529 = vmatprep.subr.bf16.mxu0 %v10278_v22  ;;  %v10347_v62 = vld [vmem:[%s12346_s2 + $0x10] sm:$0xff]  }
 0x1bf   : > { %v1948_v46 = vadd.f32 %v10219_v43, %v1947_v11  ;;  %v1975_v51 = vmax.f32 %v1945_v44, 0.0  ;;  %v10339_v44 = vld [vmem:[%s12346_s2 + $0x50] sm:$0xff]   ;;  %7998 = vmatpush3.bf16.msra.mxu1 %v10334_v42  ;;  %v10359_v11 = vld [vmem:[%s12346_s2 + $0x18] sm:$0xff]  }
 0x1c0   : > { %v1978_v50 = vmax.f32 %v1956_v45, 0.0  ;;  %7999 = vmatprep.subr.bf16.mxu1 %v10339_v44  ;;  %v10354_v45 = vld [vmem:[%s12346_s2 + $0x58] sm:$0xff]  }
 0x1c1   : > { %v1976_v52 = vmax.f32 %v1948_v46, 0.0  ;;  %v10366_v46 = vld [vmem:[%s12346_s2 + $0x60] sm:$0xff]  }
 0x1c2   : > { %v10262_v53 = vpack.c.bf16 %v1978_v50, %v1977_v47  ;;  %v10371_v47 = vld [vmem:[%s12346_s2 + $0x20] sm:$0xff]   ;;  %v10378_v50 = vld [vmem:[%s12346_s2 + $0x68] sm:$0xff]  }
 0x1c3   : > { %v1983_v54 = vpack.c.bf16 %v1976_v52, %v1975_v51  ;;  %8000 = vmatpush3.bf16.msra.mxu1 %v10347_v62  ;;  %v10383_v51 = vld [vmem:[%s12346_s2 + $0x28] sm:$0xff]  }
 0x1c4   : > { %8001 = vmatprep.subr.bf16.mxu1 %v10354_v45 }
 0x1c5   : > { %3176 = vrot.lane.b32.xlu0 %v1983_v54, %s9332_s19 }
 0x1c7   : > { %8002 = vmatpush3.bf16.msra.mxu1 %v10359_v11 }
 0x1c8   : > { %8003 = vmatprep.subr.bf16.mxu1 %v10366_v46 }
 0x1cb   : > { %v8423_v20 = vpop.f32.mrb[12].mxu1  ;;  %8004 = vmatpush3.bf16.msra.mxu1 %v10371_v47 }
 0x1cc   : > { %v1969_v57 = vadd.f32 %v8423_v20, %v10219_v43  ;;  %v1960_v63 = vpop.f32.mrb[13].mxu1  ;;  %8005 = vmatprep.subr.bf16.mxu1 %v10378_v50 }
 0x1cd   : > { %v1961_v58 = vadd.f32 %v10219_v43, %v1960_v63  ;;  %v8424_v31 = vpop.f32.mrb[14].mxu1  ;;  %v10396_v63 = vld [vmem:[%s12346_s2 + $0x30] sm:$0xff]  }
 0x1ce   : > { %v1972_v59 = vadd.f32 %v8424_v31, %v10219_v43  ;;  %v1963_v60 = vpop.f32.mrb[15].mxu1  ;;  %v1981_v6 = vmax.f32 %v1969_v57, 0.0  ;;  %v10391_v57 = vld [vmem:[%s12346_s2 + $0x70] sm:$0xff]  }
 0x1cf   : > { %v1964_v5 = vadd.f32 %v10219_v43, %v1963_v60  ;;  %v1979_v8 = vmax.f32 %v1961_v58, 0.0  ;;  %8006 = vmatpush3.bf16.msra.mxu1 %v10383_v51 }
 0x1d0   : > { %v1982_v0 = vmax.f32 %v1972_v59, 0.0  ;;  %8007 = vmatprep.subr.bf16.mxu1 %v10391_v57 }
 0x1d1   : > { %v1980_v9 = vmax.f32 %v1964_v5, 0.0 }
 0x1d2   : > { %v10269_v15 = vpack.c.bf16 %v1982_v0, %v1981_v6 }
 0x1d3   : > { %v1985_v18 = vpack.c.bf16 %v1980_v9, %v1979_v8  ;;  %8008 = vmatpush3.bf16.msra.mxu1 %v10396_v63  ;;  %v10406_v9 = vld [vmem:[%s12346_s2 + $0x78] sm:$0xff]  }
 0x1d4   : > { %8009 = vmatprep.subr.bf16.mxu1 %v10406_v9 }
 0x1d5   : > { %3180 = vrot.lane.b32.xlu0 %v1985_v18, %s9332_s19 }
 0x1db   : > { %v8455_v10 = vpop.f32.mrb[16].mxu1 }
 0x1dc   : > { %v2339_v13 = vadd.f32 %v8455_v10, %v10219_v43  ;;  %v2330_v33 = vpop.f32.mrb[17].mxu1 }
 0x1dd   : > { %v2331_v16 = vadd.f32 %v10219_v43, %v2330_v33  ;;  %v8456_v2 = vpop.f32.mrb[18].mxu1 }
 0x1de   : > { %v2342_v17 = vadd.f32 %v8456_v2, %v10219_v43  ;;  %v2333_v19 = vpop.f32.mrb[19].mxu1  ;;  %v2363_v35 = vmax.f32 %v2339_v13, 0.0 }
 0x1df   : > { %v2334_v56 = vadd.f32 %v10219_v43, %v2333_v19  ;;  %v2361_v24 = vmax.f32 %v2331_v16, 0.0  ;;  %v10412_v16 = vld [vmem:[%s12346_s2 + $0x38] sm:$0xff]  }
 0x1e0   : > { %v2364_v23 = vmax.f32 %v2342_v17, 0.0  ;;  %8010 = vmatpush3.bf16.msra.mxu1 %v10412_v16 }
 0x1e1   : > { %v2362_v1 = vmax.f32 %v2334_v56, 0.0  ;;  %8497 = vmatprep.subr.bf16.mxu1 %v10278_v22 }
 0x1e2   : > { %v10283_v25 = vpack.c.bf16 %v2364_v23, %v2363_v35 }
 0x1e3   : > { %v2369_v61 = vpack.c.bf16 %v2362_v1, %v2361_v24 }
 0x1e5   : > { %3354 = vrot.lane.b32.xlu0 %v2369_v61, %s9332_s19 }
 0x1eb   : > { %v8459_v28 = vpop.f32.mrb[20].mxu1 }
 0x1ec   : > { %v2355_v12 = vadd.f32 %v8459_v28, %v10219_v43  ;;  %v2346_v26 = vpop.f32.mrb[21].mxu1 }
 0x1ed   : > { %v2347_v38 = vadd.f32 %v10219_v43, %v2346_v26  ;;  %v8460_v30 = vpop.f32.mrb[22].mxu1 }
 0x1ee   : > { %v2358_v21 = vadd.f32 %v8460_v30, %v10219_v43  ;;  %v2349_v32 = vpop.f32.mrb[23].mxu1  ;;  %v2367_v39 = vmax.f32 %v2355_v12, 0.0 }
 0x1ef   : > { %v2350_v36 = vadd.f32 %v10219_v43, %v2349_v32  ;;  %v2365_v34 = vmax.f32 %v2347_v38, 0.0 }
 0x1f0   : > { %v2368_v29 = vmax.f32 %v2358_v21, 0.0 }
 0x1f1   : > { %v2366_v40 = vmax.f32 %v2350_v36, 0.0 }
 0x1f2   : > { %v10324_v48 = vpack.c.bf16 %v2368_v29, %v2367_v39 }
 0x1f3   : > { %v2371_v55 = vpack.c.bf16 %v2366_v40, %v2365_v34 }
 0x1f5   : > { %3358 = vrot.lane.b32.xlu0 %v2371_v55, %s9332_s19 }
 0x206   : > { %v8365_v52 = vpop.f32.mrb[0].mxu0 }
 0x207   : > { %v1378_v54 = vadd.f32 %v8365_v52, %v10219_v43  ;;  %v1369_v20 = vpop.f32.mrb[1].mxu0 }
 0x208   : > { %v1370_v58 = vadd.f32 %v10219_v43, %v1369_v20  ;;  %v8366_v31 = vpop.f32.mrb[2].mxu0 }
 0x209   : > { %v1381_v59 = vadd.f32 %v8366_v31, %v10219_v43  ;;  %v1372_v60 = vpop.f32.mrb[3].mxu0  ;;  %v1402_v6 = vmax.f32 %v1378_v54, 0.0 }
 0x20a   : > { %v1373_v5 = vadd.f32 %v10219_v43, %v1372_v60  ;;  %v1400_v18 = vmax.f32 %v1370_v58, 0.0 }
 0x20b   : > { %v1403_v0 = vmax.f32 %v1381_v59, 0.0  ;;  %v8491_v8 = vpop.f32.mrb[24].mxu1 }
 0x20c   : > { %v1401_v10 = vmax.f32 %v1373_v5, 0.0  ;;  %v2667_v13 = vadd.f32 %v8491_v8, %v10219_v43  ;;  %v2658_v33 = vpop.f32.mrb[25].mxu1 }
 0x20d   : > { %v10414_v2 = vpack.c.bf16 %v1403_v0, %v1402_v6  ;;  %v2659_v17 = vadd.f32 %v10219_v43, %v2658_v33  ;;  %v8492_v19 = vpop.f32.mrb[26].mxu1 }
 0x20e   : > { %v1408_v56 = vpack.c.bf16 %v1401_v10, %v1400_v18  ;;  %v2670_v35 = vadd.f32 %v8492_v19, %v10219_v43  ;;  %v2661_v23 = vpop.f32.mrb[27].mxu1  ;;  %v2691_v28 = vmax.f32 %v2667_v13, 0.0 }
 0x20f   : > { %v2662_v24 = vadd.f32 %v10219_v43, %v2661_v23  ;;  %v2818_v1 = vshll.u32 %v10414_v2, 16  ;;  %v2689_v26 = vmax.f32 %v2659_v17, 0.0 }
 0x210   : > { %v2813_v61 = vshll.u32 %v1408_v56, 16  ;;  %v2692_v12 = vmax.f32 %v2670_v35, 0.0  ;;  %v2811_v30 = vshrl.u32 %v1408_v56, 16 }
 0x211   : > { %v2690_v38 = vmax.f32 %v2662_v24, 0.0  ;;  %v10426_v34 = vrot.slane %v2818_v1, 1 }
 0x212   : > { %v2815_v21 = vrot.slane %v2813_v61, 1  ;;  %v10423_v32 = vpack.c.bf16 %v2692_v12, %v2691_v28 }
 0x213   : > { %v2697_v36 = vpack.c.bf16 %v2690_v38, %v2689_v26 }
 0x214   : > { %v2784_v39 = vshrl.u32 %v10423_v32, 16  ;;  %v2816_v29 = vor.u32 %v2815_v21, %v2811_v30  ;;  %v2787_v59 = vshll.u32 %v10423_v32, 16 }
 0x215   : > { %v2777_v40 = vshrl.u32 %v2697_v36, 16  ;;  %3528 = vrot.lane.b32.xlu0 %v2697_v36, %s9332_s19  ;;  %v2780_v58 = vshll.u32 %v2697_v36, 16 }
 0x216   : > { %v10431_v55 = vsel %vm1131_vm3, %v2816_v29, %v10426_v34  ;;  %v2786_v52 = vrot.slane %v2784_v39, 7 }
 0x217   : > { %v2859_v54 = vpop.permute.xlu0 %2858  ;;  %v2779_v20 = vrot.slane %v2777_v40, 7 }
 0x218   : > { %v10434_v31 = vsel %vm1283_vm9, %v1408_v56, %v2859_v54  ;;  %v2789_v0 = vor.u32 %v2787_v59, %v2786_v52 }
 0x219   : > { %3062 = vmatprep.mubr.bf16.mxu1 %v10434_v31  ;;  %v2782_v60 = vor.u32 %v2780_v58, %v2779_v20 }
 0x21a   : > { %v2790_v56 = vsel %vm1020_vm0, %v2779_v20, %v2789_v0 }
 0x21b   : > { %v8369_v5 = vpop.f32.mrb[4].mxu0  ;;  %v2808_v6 = vsel %vm9717_vm2, 0, %v2782_v60  ;;  %v10463_v60 = vpop.permute.xlu0 %2860 }
 0x21c   : > { %v1394_v8 = vadd.f32 %v8369_v5, %v10219_v43  ;;  %2846 = vrot.lane.b32.xlu1 %v2808_v6, %s9332_s19  ;;  %v1385_v18 = vpop.f32.mrb[5].mxu0 }
 0x21d   : > { %v1386_v10 = vadd.f32 %v10219_v43, %v1385_v18  ;;  %v8370_v13 = vpop.f32.mrb[6].mxu0 }
 0x21e   : > { %v1397_v33 = vadd.f32 %v8370_v13, %v10219_v43  ;;  %v1388_v17 = vpop.f32.mrb[7].mxu0  ;;  %v1406_v35 = vmax.f32 %v1394_v8, 0.0 }
 0x21f   : > { %v1389_v19 = vadd.f32 %v10219_v43, %v1388_v17  ;;  %v1404_v24 = vmax.f32 %v1386_v10, 0.0 }
 0x220   : > { %v1407_v23 = vmax.f32 %v1397_v33, 0.0  ;;  %2848 = vrot.lane.b32.xlu1 %v2790_v56, %s9332_s19 }
 0x221   : > { %v1405_v1 = vmax.f32 %v1389_v19, 0.0 }
 0x222   : > { %v10447_v61 = vpack.c.bf16 %v1407_v23, %v1406_v35 }
 0x223   : > { %v10449_v28 = vpack.c.bf16 %v1405_v1, %v1404_v24 }
 0x224   : > { %v2834_v12 = vshll.u32 %v10447_v61, 16 }
 0x225   : > { %v2829_v26 = vshll.u32 %v10449_v28, 16  ;;  %v2827_v38 = vshrl.u32 %v10449_v28, 16 }
 0x226   : > { %v10454_v36 = vrot.slane %v2834_v12, 1 }
 0x227   : > { %v2831_v30 = vrot.slane %v2829_v26, 1  ;;  %v10468_v13 = vpop.permute.xlu0 %2862 }
 0x228   : > { %12360 = vst [vmem:[#allocation6_spill] sm:$0xff] %v10454_v36 }
 0x229   : > { %v2832_v21 = vor.u32 %v2831_v30, %v2827_v38 }
 0x22b   : > { %v10458_v39 = vsel %vm1131_vm3, %v2832_v21, %v10454_v36 }
 0x232   : > { %v8495_v29 = vpop.f32.mrb[28].mxu1 }
 0x233   : > { %v2683_v40 = vadd.f32 %v8495_v29, %v10219_v43  ;;  %v2674_v52 = vpop.f32.mrb[29].mxu1 }
 0x234   : > { %v2675_v54 = vadd.f32 %v10219_v43, %v2674_v52  ;;  %v8496_v20 = vpop.f32.mrb[30].mxu1 }
 0x235   : > { %v2686_v58 = vadd.f32 %v8496_v20, %v10219_v43  ;;  %v2677_v59 = vpop.f32.mrb[31].mxu1  ;;  %v2695_v6 = vmax.f32 %v2683_v40, 0.0 }
 0x236   : > { %v2678_v5 = vadd.f32 %v10219_v43, %v2677_v59  ;;  %v2693_v8 = vmax.f32 %v2675_v54, 0.0  ;;  %v10477_v54 = vpop.permute.xlu0 %2864 }
 0x237   : > { %v2696_v0 = vmax.f32 %v2686_v58, 0.0 }
 0x238   : > { %v2694_v18 = vmax.f32 %v2678_v5, 0.0 }
 0x239   : > { %v10466_v10 = vpack.c.bf16 %v2696_v0, %v2695_v6 }
 0x23a   : > { %v2699_v33 = vpack.c.bf16 %v2694_v18, %v2693_v8 }
 0x23b   : > { %v2800_v17 = vshrl.u32 %v10466_v10, 16  ;;  %v8401_v19 = vpop.f32.mrb[8].mxu0  ;;  %v2803_v1 = vshll.u32 %v10466_v10, 16 }
 0x23c   : > { %v2793_v56 = vshrl.u32 %v2699_v33, 16  ;;  %v1760_v35 = vadd.f32 %v8401_v19, %v10219_v43  ;;  %3532 = vrot.lane.b32.xlu0 %v2699_v33, %s9332_s19  ;;  %v1751_v23 = vpop.f32.mrb[9].mxu0  ;;  %v2796_v29 = vshll.u32 %v2699_v33, 16  ;;  %v3177_v33 = vpop.permute.xlu0 %3176 }
 0x23d   : > { %v2802_v24 = vrot.slane %v2800_v17, 7  ;;  %v1752_v12 = vadd.f32 %v10219_v43, %v1751_v23  ;;  %v8402_v26 = vpop.f32.mrb[10].mxu0 }
 0x23e   : > { %v1763_v38 = vadd.f32 %v8402_v26, %v10219_v43  ;;  %v1754_v30 = vpop.f32.mrb[11].mxu0  ;;  %v2795_v21 = vrot.slane %v2793_v56, 7  ;;  %v1784_v20 = vmax.f32 %v1760_v35, 0.0 }
 0x23f   : > { %v1755_v40 = vadd.f32 %v10219_v43, %v1754_v30  ;;  %v2805_v52 = vor.u32 %v2803_v1, %v2802_v24  ;;  %v1782_v5 = vmax.f32 %v1752_v12, 0.0 }
 0x240   : > { %v1785_v58 = vmax.f32 %v1763_v38, 0.0  ;;  %v2798_v59 = vor.u32 %v2796_v29, %v2795_v21 }
 0x241   : > { %v1783_v6 = vmax.f32 %v1755_v40, 0.0  ;;  %v2806_v0 = vsel %vm1020_vm0, %v2795_v21, %v2805_v52 }
 0x242   : > { %v10480_v8 = vpack.c.bf16 %v1785_v58, %v1784_v20  ;;  %v2809_v18 = vsel %vm9717_vm2, 0, %v2798_v59 }
 0x243   : > { %v10484_v17 = vpack.c.bf16 %v1783_v6, %v1782_v5  ;;  %2850 = vrot.lane.b32.xlu1 %v2809_v18, %s9332_s19 }
 0x245   : > { %v10489_v19 = vsel %vm1283_vm9, %v10484_v17, %v3177_v33 }
 0x247   : > { %2852 = vrot.lane.b32.xlu1 %v2806_v0, %s9332_s19  ;;  %v3181_v20 = vpop.permute.xlu0 %3180 }
 0x24b   : > { %3178 = vrot.lane.b32.xlu1 %v10262_v53, %s9332_s19  ;;  %v8405_v56 = vpop.f32.mrb[12].mxu0 }
 0x24c   : > { %v1776_v35 = vadd.f32 %v8405_v56, %v10219_v43  ;;  %v1767_v23 = vpop.f32.mrb[13].mxu0 }
 0x24d   : > { %v1768_v24 = vadd.f32 %v10219_v43, %v1767_v23  ;;  %v8406_v1 = vpop.f32.mrb[14].mxu0 }
 0x24e   : > { %v1788_v12 = vmax.f32 %v1776_v35, 0.0  ;;  %v1779_v26 = vadd.f32 %v8406_v1, %v10219_v43  ;;  %v1770_v38 = vpop.f32.mrb[15].mxu0 }
 0x24f   : > { %v1786_v30 = vmax.f32 %v1768_v24, 0.0  ;;  %v1771_v21 = vadd.f32 %v10219_v43, %v1770_v38  ;;  %3182 = vrot.lane.b32.xlu1 %v10269_v15, %s9332_s19 }
 0x250   : > { %v1789_v29 = vmax.f32 %v1779_v26, 0.0 }
 0x251   : > { %v1787_v40 = vmax.f32 %v1771_v21, 0.0 }
 0x252   : > { %v10500_v53 = vpack.c.bf16 %v1789_v29, %v1788_v12 }
 0x253   : > { %v10502_v52 = vpack.c.bf16 %v1787_v40, %v1786_v30  ;;  %3356 = vrot.lane.b32.xlu1 %v10283_v25, %s9332_s19 }
 0x255   : > { %v10508_v58 = vsel %vm1283_vm9, %v10502_v52, %v3181_v20 }
 0x257   : > { %3360 = vrot.lane.b32.xlu1 %v10324_v48, %s9332_s19 }
 0x25b   : > { %3530 = vrot.lane.b32.xlu1 %v10423_v32, %s9332_s19  ;;  %v8437_v15 = vpop.f32.mrb[16].mxu0 }
 0x25c   : > { %v2146_v59 = vadd.f32 %v8437_v15, %v10219_v43  ;;  %v2137_v5 = vpop.f32.mrb[17].mxu0  ;;  %v10537_v15 = vpop.permute.xlu0 %3354 }
 0x25d   : > { %v2138_v6 = vadd.f32 %v10219_v43, %v2137_v5  ;;  %v8438_v0 = vpop.f32.mrb[18].mxu0 }
 0x25e   : > { %v2170_v18 = vmax.f32 %v2146_v59, 0.0  ;;  %v2149_v25 = vadd.f32 %v8438_v0, %v10219_v43  ;;  %v2140_v33 = vpop.f32.mrb[19].mxu0 }
 0x25f   : > { %v2168_v56 = vmax.f32 %v2138_v6, 0.0  ;;  %v2141_v35 = vadd.f32 %v10219_v43, %v2140_v33  ;;  %3534 = vrot.lane.b32.xlu1 %v10466_v10, %s9332_s19 }
 0x260   : > { %v2171_v48 = vmax.f32 %v2149_v25, 0.0 }
 0x261   : > { %v2169_v23 = vmax.f32 %v2141_v35, 0.0 }
 0x262   : > { %v10520_v32 = vpack.c.bf16 %v2171_v48, %v2170_v18 }
 0x263   : > { %v10522_v24 = vpack.c.bf16 %v2169_v23, %v2168_v56 }
 0x265   : > { %8521 = vmatprep.mubr.msk.bf16.mxu0 %vm1283_vm9, %v10522_v24 }
 0x266   : > { %8522 = vmatmul.mubr.msk.bf16.vlgmr.msra.gmra.mrb[32].mxu0 %vm1283_vm9, %v10520_v32 }
 0x267   : > { %8530 = vmatpush3.bf16.msra.mxu0 %v10278_v22  ;;  %v3359_v18 = vpop.permute.xlu0 %3358 }
 0x268   : > { %8531 = vmatprep.subr.bf16.mxu0 %v10288_v4 }
 0x26b   : > { %v8441_v1 = vpop.f32.mrb[20].mxu0  ;;  %8532 = vmatpush3.bf16.msra.mxu0 %v10288_v4 }
 0x26c   : > { %v2162_v10 = vadd.f32 %v8441_v1, %v10219_v43  ;;  %v2153_v12 = vpop.f32.mrb[21].mxu0  ;;  %8533 = vmatprep.subr.bf16.mxu0 %v10296_v7 }
 0x26d   : > { %v2154_v26 = vadd.f32 %v10219_v43, %v2153_v12  ;;  %v8442_v38 = vpop.f32.mrb[22].mxu0 }
 0x26e   : > { %v2174_v30 = vmax.f32 %v2162_v10, 0.0  ;;  %v2165_v21 = vadd.f32 %v8442_v38, %v10219_v43  ;;  %v2156_v29 = vpop.f32.mrb[23].mxu0 }
 0x26f   : > { %v2172_v40 = vmax.f32 %v2154_v26, 0.0  ;;  %v2157_v20 = vadd.f32 %v10219_v43, %v2156_v29  ;;  %8534 = vmatpush3.bf16.msra.mxu0 %v10296_v7 }
 0x270   : > { %v2175_v59 = vmax.f32 %v2165_v21, 0.0  ;;  %8535 = vmatprep.subr.bf16.mxu0 %v10303_v27 }
 0x271   : > { %v2173_v5 = vmax.f32 %v2157_v20, 0.0 }
 0x272   : > { %v10540_v6 = vpack.c.bf16 %v2175_v59, %v2174_v30 }
 0x273   : > { %v2178_v0 = vpack.c.bf16 %v2173_v5, %v2172_v40  ;;  %8536 = vmatpush3.bf16.msra.mxu0 %v10303_v27 }
 0x274   : > { %8139 = vmatprep.subr.bf16.mxu0 %v10313_v41 }
 0x275   : > { %8525 = vmatprep.mubr.msk.bf16.mxu0 %vm1283_vm9, %v2178_v0  ;;  %v10546_v25 = vsel %vm1283_vm9, %v2178_v0, %v3359_v18 }
 0x276   : > { %8526 = vmatmul.mubr.msk.bf16.gmra.mrb[36].mxu0 %vm1283_vm9, %v10540_v6 }
 0x27b   : > { %v8473_v33 = vpop.f32.mrb[24].mxu0 }
 0x27c   : > { %v2512_v56 = vadd.f32 %v8473_v33, %v10219_v43  ;;  %v2503_v35 = vpop.f32.mrb[25].mxu0 }
 0x27d   : > { %v2504_v48 = vadd.f32 %v10219_v43, %v2503_v35  ;;  %v8474_v23 = vpop.f32.mrb[26].mxu0 }
 0x27e   : > { %v2536_v1 = vmax.f32 %v2512_v56, 0.0  ;;  %v2515_v10 = vadd.f32 %v8474_v23, %v10219_v43  ;;  %v2506_v12 = vpop.f32.mrb[27].mxu0 }
 0x27f   : > { %v2534_v26 = vmax.f32 %v2504_v48, 0.0  ;;  %v2507_v38 = vadd.f32 %v10219_v43, %v2506_v12 }
 0x280   : > { %v2537_v30 = vmax.f32 %v2515_v10, 0.0 }
 0x281   : > { %v2535_v21 = vmax.f32 %v2507_v38, 0.0 }
 0x282   : > { %v10554_v29 = vpack.c.bf16 %v2537_v30, %v2536_v1 }
 0x283   : > { %v2542_v40 = vpack.c.bf16 %v2535_v21, %v2534_v26 }
 0x284   : > { %v2750_v0 = vshrl.u32 %v10554_v29, 16  ;;  %v2753_v1 = vshll.u32 %v10554_v29, 16 }
 0x285   : > { %8537 = vmatprep.mubr.msk.bf16.mxu0 %vm1283_vm9, %v2542_v40  ;;  %v2743_v20 = vshrl.u32 %v2542_v40, 16  ;;  %v2746_v59 = vshll.u32 %v2542_v40, 16 }
 0x286   : > { %8538 = vmatmul.mubr.msk.bf16.vlgmr.msra.gmra.mrb[40].mxu0 %vm1283_vm9, %v10554_v29  ;;  %v2752_v23 = vrot.slane %v2750_v0, 7  ;;  %v10576_v0 = vsel %vm1283_vm9, %v10414_v2, %v10463_v60 }
 0x287   : > { %8140 = vmatpush3.bf16.msra.mxu0 %v10320_v37  ;;  %v2745_v5 = vrot.slane %v2743_v20, 7 }
 0x288   : > { %8141 = vmatprep.subr.bf16.mxu0 %v10329_v3 }
 0x289   : > { %v2748_v18 = vor.u32 %v2746_v59, %v2745_v5 }
 0x28b   : > { %8142 = vmatpush3.bf16.msra.mxu0 %v10334_v42  ;;  %v8477_v33 = vpop.f32.mrb[28].mxu0  ;;  %v2774_v48 = vsel %vm9717_vm2, 0, %v2748_v18  ;;  %v2755_v18 = vor.u32 %v2753_v1, %v2752_v23 }
 0x28c   : > { %v2528_v56 = vadd.f32 %v8477_v33, %v10219_v43  ;;  %v2519_v35 = vpop.f32.mrb[29].mxu0  ;;  %8143 = vmatprep.subr.bf16.mxu0 %v10339_v44 }
 0x28d   : > { %v2520_v10 = vadd.f32 %v10219_v43, %v2519_v35  ;;  %v8478_v12 = vpop.f32.mrb[30].mxu0  ;;  %v2756_v60 = vsel %vm1020_vm0, %v2745_v5, %v2755_v18 }
 0x28e   : > { %v2540_v26 = vmax.f32 %v2528_v56, 0.0  ;;  %v2531_v38 = vadd.f32 %v8478_v12, %v10219_v43  ;;  %v2847_v30 = vpop.permute.xlu1 %2846  ;;  %v2522_v21 = vpop.f32.mrb[31].mxu0 }
 0x28f   : > { %v2538_v20 = vmax.f32 %v2520_v10, 0.0  ;;  %v2868_v59 = vsel %vm1283_vm9, %v2774_v48, %v2847_v30  ;;  %v2523_v33 = vadd.f32 %v10219_v43, %v2522_v21  ;;  %8144 = vmatpush3.bf16.msra.mxu0 %v10347_v62  ;;  %v3529_v43 = vpop.permute.xlu0 %3528 }
 0x290   : > { %v2541_v36 = vmax.f32 %v2531_v38, 0.0  ;;  %3063 = vmatmul.mubr.bf16.vlgmr.msra.gmra.mrb[32].mxu1 %v2868_v59  ;;  %8145 = vmatprep.subr.bf16.mxu0 %v10354_v45  ;;  %v3537_v12 = vsel %vm1283_vm9, %v2542_v40, %v3529_v43  ;;  %v10604_v38 = vsel %vm1283_vm9, %v10449_v28, %v10468_v13  ;;  %v10621_v28 = vsel %vm1283_vm9, %v10522_v24, %v10537_v15 }
 0x291   : > { %v2539_v56 = vmax.f32 %v2523_v33, 0.0  ;;  %3070 = vmatprep.mubr.bf16.mxu1 %v10576_v0  ;;  %8498 = vmatpush3.bf16.msra.mxu1 %v10278_v22 }
 0x292   : > { %v10581_v35 = vpack.c.bf16 %v2541_v36, %v2540_v26  ;;  %8499 = vmatprep.subr.bf16.mxu1 %v10288_v4  ;;  %v2849_v10 = vpop.permute.xlu1 %2848 }
 0x293   : > { %v10584_v48 = vpack.c.bf16 %v2539_v56, %v2538_v20  ;;  %8146 = vmatpush3.bf16.msra.mxu0 %v10359_v11  ;;  %v2872_v5 = vsel %vm1283_vm9, %v2756_v60, %v2849_v10  ;;  %v10631_v56 = vsel %vm1283_vm9, %v10447_v61, %v10477_v54 }
 0x294   : > { %8147 = vmatprep.subr.bf16.mxu0 %v10366_v46  ;;  %v2766_v23 = vshrl.u32 %v10581_v35, 16  ;;  %v2769_v1 = vshll.u32 %v10581_v35, 16 }
 0x295   : > { %8541 = vmatprep.mubr.msk.bf16.mxu0 %vm1283_vm9, %v10584_v48  ;;  %8500 = vmatpush3.bf16.msra.mxu1 %v10288_v4  ;;  %v2759_v36 = vshrl.u32 %v10584_v48, 16  ;;  %v2762_v13 = vshll.u32 %v10584_v48, 16 }
 0x296   : > { %8542 = vmatmul.mubr.msk.bf16.gmra.mrb[44].mxu0 %vm1283_vm9, %v10581_v35  ;;  %8501 = vmatprep.subr.bf16.mxu1 %v10296_v7  ;;  %v2768_v26 = vrot.slane %v2766_v23, 7 }
 0x297   : > { %8148 = vmatpush3.bf16.msra.mxu0 %v10371_v47  ;;  %3592 = vmatprep.mubr.bf16.mxu0 %v3537_v12  ;;  %v2761_v30 = vrot.slane %v2759_v36, 7 }
 0x298   : > { %3071 = vmatmul.mubr.bf16.gmra.mrb[36].mxu1 %v2872_v5  ;;  %8149 = vmatprep.subr.bf16.mxu0 %v10378_v50  ;;  %v2771_v21 = vor.u32 %v2769_v1, %v2768_v26 }
 0x299   : > { %3078 = vmatprep.mubr.bf16.mxu1 %v10604_v38  ;;  %8502 = vmatpush3.bf16.msra.mxu1 %v10296_v7  ;;  %v2764_v20 = vor.u32 %v2762_v13, %v2761_v30 }
 0x29a   : > { %v2772_v40 = vsel %vm1020_vm0, %v2761_v30, %v2771_v21  ;;  %8503 = vmatprep.subr.bf16.mxu1 %v10303_v27 }
 0x29b   : > { %8150 = vmatpush3.bf16.msra.mxu0 %v10383_v51  ;;  %v2775_v33 = vsel %vm9717_vm2, 0, %v2764_v20 }
 0x29c   : > { %8151 = vmatprep.subr.bf16.mxu0 %v10391_v57 }
 0x29d   : > { %8504 = vmatpush3.bf16.msra.mxu1 %v10303_v27 }
 0x29e   : > { %8043 = vmatprep.subr.bf16.mxu1 %v10313_v41 }
 0x29f   : > { %8152 = vmatpush3.bf16.msra.mxu0 %v10396_v63 }
 0x2a0   : > { %8153 = vmatprep.subr.bf16.mxu0 %v10406_v9 }
 0x2a3   : > { %8154 = vmatpush3.bf16.msra.mxu0 %v10412_v16 }
 0x2a6   : > { %3593 = vmatmul.mubr.bf16.vlgmr.msra.gmra.mrb[48].mxu0 %v10621_v28 }
 0x2ae   : > { %v3533_v1 = vpop.permute.xlu0 %3532 }
 0x2af   : > { %v3543_v36 = vsel %vm1283_vm9, %v10584_v48, %v3533_v1 }
 0x2b5   : > { %v2851_v59 = vpop.permute.xlu1 %2850 }
 0x2b6   : > { %v2876_v18 = vsel %vm1283_vm9, %v2775_v33, %v2851_v59 }
 0x2b7   : > { %3079 = vmatmul.mubr.bf16.gmra.mrb[40].mxu1 %v2876_v18 }
 0x2b8   : > { %3086 = vmatprep.mubr.bf16.mxu1 %v10631_v56 }
 0x2b9   : > { %v2853_v24 = vpop.permute.xlu1 %2852 }
 0x2ba   : > { %v2880_v43 = vsel %vm1283_vm9, %v2772_v40, %v2853_v24 }
 0x2bd   : > { %v3179_v15 = vpop.permute.xlu1 %3178 }
 0x2bf   : > { %3087 = vmatmul.mubr.bf16.gmra.mrb[44].mxu1 %v2880_v43 }
 0x2c0   : > { %8505 = vmatprep.mubr.msk.bf16.mxu1 %vm1283_vm9, %v10484_v17 }
 0x2c1   : > { %v3183_v10 = vpop.permute.xlu1 %3182 }
 0x2c5   : > { %v3357_v60 = vpop.permute.xlu1 %3356 }
 0x2c7   : > { %8506 = vmatmul.mubr.msk.bf16.vlgmr.msra.gmra.mrb[48].mxu1 %vm1283_vm9, %v10480_v8 }
 0x2c8   : > { %8044 = vmatpush3.bf16.msra.mxu1 %v10320_v37  ;;  %8509 = vmatprep.mubr.msk.bf16.mxu1 %vm1283_vm9, %v10502_v52  ;;  %v3366_v52 = vsel %vm1283_vm9, %v10520_v32, %v3357_v60 }
 0x2c9   : > { %v3361_v54 = vpop.permute.xlu1 %3360  ;;  %8045 = vmatprep.subr.bf16.mxu1 %v10329_v3 }
 0x2ca   : > { %v3372_v32 = vsel %vm1283_vm9, %v10540_v6, %v3361_v54 }
 0x2cc   : > { %8046 = vmatpush3.bf16.msra.mxu1 %v10334_v42 }
 0x2cd   : > { %v3531_v23 = vpop.permute.xlu1 %3530  ;;  %8047 = vmatprep.subr.bf16.mxu1 %v10339_v44 }
 0x2ce   : > { %v3540_v17 = vsel %vm1283_vm9, %v10554_v29, %v3531_v23 }
 0x2cf   : > { %8510 = vmatmul.mubr.msk.bf16.gmra.mrb[52].mxu1 %vm1283_vm9, %v10500_v53  ;;  %3600 = vmatprep.mubr.bf16.mxu0 %v3540_v17 }
 0x2d0   : > { %8048 = vmatpush3.bf16.msra.mxu1 %v10347_v62  ;;  %3240 = vmatprep.mubr.bf16.mxu1 %v10489_v19 }
 0x2d1   : > { %3601 = vmatmul.mubr.bf16.gmra.mrb[52].mxu0 %v3366_v52  ;;  %8049 = vmatprep.subr.bf16.mxu1 %v10354_v45  ;;  %v3535_v29 = vpop.permute.xlu1 %3534 }
 0x2d2   : > { %3608 = vmatprep.mubr.bf16.mxu0 %v3543_v36  ;;  %v3546_v12 = vsel %vm1283_vm9, %v10581_v35, %v3535_v29  ;;  %v3188_v35 = vsel %vm1283_vm9, %v10480_v8, %v3179_v15  ;;  %v10788_v29 = vld [vmem:[%s12347_s3 + $0x1] ss:$0 sm:$0xff] }
 0x2d4   : > { %8050 = vmatpush3.bf16.msra.mxu1 %v10359_v11 }
 0x2d5   : > { %8051 = vmatprep.subr.bf16.mxu1 %v10366_v46 }
 0x2d8   : > { %8052 = vmatpush3.bf16.msra.mxu1 %v10371_v47 }
 0x2d9   : > { %3609 = vmatmul.mubr.bf16.gmra.mrb[56].mxu0 %v10546_v25  ;;  %8053 = vmatprep.subr.bf16.mxu1 %v10378_v50 }
 0x2da   : > { %3616 = vmatprep.mubr.bf16.mxu0 %v3546_v12 }
 0x2dc   : > { %8054 = vmatpush3.bf16.msra.mxu1 %v10383_v51 }
 0x2dd   : > { %8055 = vmatprep.subr.bf16.mxu1 %v10391_v57 }
 0x2e0   : > { %8056 = vmatpush3.bf16.msra.mxu1 %v10396_v63 }
 0x2e1   : > { %3617 = vmatmul.mubr.bf16.gmra.mrb[60].mxu0 %v3372_v32  ;;  %8057 = vmatprep.subr.bf16.mxu1 %v10406_v9 }
 0x2e4   : > { %8058 = vmatpush3.bf16.msra.mxu1 %v10412_v16 }
 0x2e5   : > { %8091 = vmatprep.subr.bf16.mxu1 %v10313_v41  ;;  %v3194_v41 = vsel %vm1283_vm9, %v10500_v53, %v3183_v10 }
 0x2e7   : > { %3241 = vmatmul.mubr.bf16.vlgmr.msra.gmra.mrb[56].mxu1 %v10434_v31 }
 0x2e8   : > { %3248 = vmatprep.mubr.bf16.mxu1 %v3188_v35  ;;  %8092 = vmatpush3.bf16.msra.mxu1 %v10320_v37 }
 0x2e9   : > { %8093 = vmatprep.subr.bf16.mxu1 %v10329_v3 }
 0x2ec   : > { %8094 = vmatpush3.bf16.msra.mxu1 %v10334_v42 }
 0x2ed   : > { %8095 = vmatprep.subr.bf16.mxu1 %v10339_v44 }
 0x2ef   : > { %3249 = vmatmul.mubr.bf16.gmra.mrb[60].mxu1 %v10576_v0 }
 0x2f0   : > { %3256 = vmatprep.mubr.bf16.mxu1 %v10508_v58  ;;  %8096 = vmatpush3.bf16.msra.mxu1 %v10347_v62 }
 0x2f1   : > { %8097 = vmatprep.subr.bf16.mxu1 %v10354_v45 }
 0x2f4   : > { %8098 = vmatpush3.bf16.msra.mxu1 %v10359_v11 }
 0x2f5   : > { %8099 = vmatprep.subr.bf16.mxu1 %v10366_v46 }
 0x2f7   : > { %3257 = vmatmul.mubr.bf16.gmra.mrb[64].mxu1 %v10604_v38 }
 0x2f8   : > { %3264 = vmatprep.mubr.bf16.mxu1 %v3194_v41  ;;  %8100 = vmatpush3.bf16.msra.mxu1 %v10371_v47 }
 0x2f9   : > { %8101 = vmatprep.subr.bf16.mxu1 %v10378_v50 }
 0x2fc   : > { %8102 = vmatpush3.bf16.msra.mxu1 %v10383_v51 }
 0x2fd   : > { %8103 = vmatprep.subr.bf16.mxu1 %v10391_v57 }
 0x2ff   : > { %3265 = vmatmul.mubr.bf16.gmra.mrb[68].mxu1 %v10631_v56 }
 0x300   : > { %8104 = vmatpush3.bf16.msra.mxu1 %v10396_v63  ;;  %3414 = vmatprep.mubr.bf16.mxu1 %v10621_v28 }
 0x301   : > { %8105 = vmatprep.subr.bf16.mxu1 %v10406_v9 }
 0x304   : > { %8106 = vmatpush3.bf16.msra.mxu1 %v10412_v16 }
 0x305   : > { %8545 = vmatprep.subr.bf16.mxu1 %v10278_v22 }
 0x307   : > { %3415 = vmatmul.mubr.bf16.vlgmr.msra.gmra.mrb[72].mxu1 %v10489_v19  ;;  %v10762_v19 = vld [vmem:[%s12346_s2 + $0x130] sm:$0xff]  }
 0x308   : > { %3422 = vmatprep.mubr.bf16.mxu1 %v3366_v52  ;;  %8546 = vmatpush3.bf16.msra.mxu1 %v10278_v22  ;;  %v2822_v22 = vshrl.u32 %v10414_v2, 16  ;;  %v10748_v2 = vld [vmem:[%s12346_s2 + $0x120] sm:$0xff]  }
 0x309   : > { %8547 = vmatprep.subr.bf16.mxu1 %v10288_v4 }
 0x30c   : > { %8548 = vmatpush3.bf16.msra.mxu1 %v10288_v4  ;;  %v2824_v4 = vor.u32 %v2822_v22, %v10426_v34  ;;  %v10755_v34 = vld [vmem:[%s12346_s2 + $0x128] sm:$0xff]  }
 0x30d   : > { %8549 = vmatprep.subr.bf16.mxu1 %v10296_v7 }
 0x30e   : > { %v2842_v37 = vsel %vm9768_vm5, %v2824_v4, 0 }
 0x30f   : > { %3423 = vmatmul.mubr.bf16.gmra.mrb[76].mxu1 %v3188_v35 }
 0x310   : > { %3430 = vmatprep.mubr.bf16.mxu1 %v10546_v25  ;;  %8550 = vmatpush3.bf16.msra.mxu1 %v10296_v7  ;;  %v2838_v7 = vshrl.u32 %v10447_v61, 16  ;;  %v10773_v25 = vld [vmem:[%s12346_s2 + $0x138] sm:$0xff]  }
 0x311   : > { %8551 = vmatprep.subr.bf16.mxu1 %v10303_v27 }
 0x314   : > { %8552 = vmatpush3.bf16.msra.mxu1 %v10303_v27  ;;  %v12361_v27 = vld [vmem:[#allocation6_spill] sm:$0xff] }
 0x315   : > { %v2840_v3 = vor.u32 %v2838_v7, %v12361_v27  ;;  %8561 = vmatprep.subr.bf16.mxu1 %v10748_v2 }
 0x317   : > { %3431 = vmatmul.mubr.bf16.gmra.mrb[80].mxu1 %v10508_v58  ;;  %v2843_v42 = vsel %vm9768_vm5, %v2840_v3, 0 }
 0x318   : > { %3438 = vmatprep.mubr.bf16.mxu1 %v3372_v32 }
 0x31f   : > { %3439 = vmatmul.mubr.bf16.gmra.mrb[84].mxu1 %v3194_v41 }
 0x320   : > { %8553 = vmatprep.mubr.msk.bf16.mxu1 %vm1283_vm9, %v10431_v55 }
 0x327   : > { %8554 = vmatmul.mubr.msk.bf16.vlgmr.msra.gmra.mrb[88].mxu1 %vm1283_vm9, %v2842_v37 }
 0x328   : > { %8557 = vmatprep.mubr.msk.bf16.mxu1 %vm1283_vm9, %v10458_v39  ;;  %8562 = vmatpush3.bf16.msra.mxu1 %v10748_v2 }
 0x329   : > { %8563 = vmatprep.subr.bf16.mxu1 %v10755_v34 }
 0x32c   : > { %8564 = vmatpush3.bf16.msra.mxu1 %v10755_v34 }
 0x32d   : > { %8565 = vmatprep.subr.bf16.mxu1 %v10762_v19 }
 0x32f   : > { %8558 = vmatmul.mubr.msk.bf16.gmra.mrb[92].mxu1 %vm1283_vm9, %v2843_v42 }
 0x330   : > { %8566 = vmatpush3.bf16.msra.mxu1 %v10762_v19 }
 0x331   : > { %8567 = vmatprep.subr.bf16.mxu1 %v10773_v25 }
 0x334   : > { %8568 = vmatpush3.bf16.msra.mxu1 %v10773_v25 }
 0x339   : > { %v10721_v44 = vpop.f32.mrb[32].mxu0 }
 0x33a   : > { %v10723_v62 = vpop.f32.mrb[33].mxu0 }
 0x33b   : > { %v10725_v45 = vpop.f32.mrb[34].mxu0 }
 0x33c   : > { %v10727_v11 = vpop.f32.mrb[35].mxu0 }
 0x349   : > { %v10729_v46 = vpop.f32.mrb[36].mxu0 }
 0x34a   : > { %v10731_v47 = vpop.f32.mrb[37].mxu0 }
 0x34b   : > { %v10733_v50 = vpop.f32.mrb[38].mxu0 }
 0x34c   : > { %v10735_v51 = vpop.f32.mrb[39].mxu0 }
 0x359   : > { %v10737_v57 = vpop.f32.mrb[40].mxu0 }
 0x35a   : > { %v10739_v63 = vpop.f32.mrb[41].mxu0 }
 0x35b   : > { %v10741_v9 = vpop.f32.mrb[42].mxu0 }
 0x35c   : > { %v10743_v16 = vpop.f32.mrb[43].mxu0 }
 0x363   : > { %v8011_v55 = vpop.f32.mrb[32].mxu1 }
 0x364   : > { %v8012_v31 = vpop.f32.mrb[33].mxu1 }
 0x365   : > { %v8013_v61 = vadd.f32 %v8012_v31, %v8011_v55  ;;  %v8014_v39 = vpop.f32.mrb[34].mxu1 }
 0x366   : > { %v8015_v8 = vpop.f32.mrb[35].mxu1 }
 0x367   : > { %v8016_v53 = vadd.f32 %v8015_v8, %v8014_v39  ;;  %v3065_v35 = vadd.f32 %v8013_v61, %v10788_v29 }
 0x369   : > { %v10765_v58 = vpop.f32.mrb[44].mxu0  ;;  %v3068_v27 = vadd.f32 %v8016_v53, %v10788_v29 }
 0x36a   : > { %v10768_v6 = vpop.f32.mrb[45].mxu0 }
 0x36b   : > { %v8017_v0 = vpop.f32.mrb[36].mxu1  ;;  %v10775_v48 = vpop.f32.mrb[46].mxu0 }
 0x36c   : > { %v8018_v26 = vpop.f32.mrb[37].mxu1  ;;  %v10777_v5 = vpop.f32.mrb[47].mxu0 }
 0x36d   : > { %v8019_v38 = vadd.f32 %v8018_v26, %v8017_v0  ;;  %v8020_v30 = vpop.f32.mrb[38].mxu1 }
 0x36e   : > { %v8021_v21 = vpop.f32.mrb[39].mxu1 }
 0x36f   : > { %v8022_v40 = vadd.f32 %v8021_v21, %v8020_v30  ;;  %v3073_v12 = vadd.f32 %v8019_v38, %v10788_v29 }
 0x371   : > { %v3076_v4 = vadd.f32 %v8022_v40, %v10788_v29 }
 0x379   : > { %v8155_v28 = vpop.f32.mrb[48].mxu0 }
 0x37a   : > { %v8156_v13 = vpop.f32.mrb[49].mxu0 }
 0x37b   : > { %v10781_v20 = vadd.f32 %v8156_v13, %v8155_v28  ;;  %v8158_v59 = vpop.f32.mrb[50].mxu0 }
 0x37c   : > { %v8159_v33 = vpop.f32.mrb[51].mxu0 }
 0x37d   : > { %v10783_v18 = vadd.f32 %v8159_v33, %v8158_v59 }
 0x38a   : > { %v8023_v56 = vpop.f32.mrb[40].mxu1 }
 0x38b   : > { %v8024_v24 = vpop.f32.mrb[41].mxu1 }
 0x38c   : > { %v8025_v15 = vadd.f32 %v8024_v24, %v8023_v56  ;;  %v8026_v43 = vpop.f32.mrb[42].mxu1 }
 0x38d   : > { %v8027_v10 = vpop.f32.mrb[43].mxu1 }
 0x38e   : > { %v8028_v60 = vadd.f32 %v8027_v10, %v8026_v43  ;;  %v3081_v21 = vadd.f32 %v8025_v15, %v10788_v29 }
 0x390   : > { %v3084_v56 = vadd.f32 %v8028_v60, %v10788_v29 }
 0x392   : > { %v8029_v54 = vpop.f32.mrb[44].mxu1 }
 0x393   : > { %v8030_v23 = vpop.f32.mrb[45].mxu1 }
 0x394   : > { %v8031_v1 = vadd.f32 %v8030_v23, %v8029_v54  ;;  %v8032_v17 = vpop.f32.mrb[46].mxu1 }
 0x395   : > { %v8033_v52 = vpop.f32.mrb[47].mxu1 }
 0x396   : > { %v8034_v36 = vadd.f32 %v8033_v52, %v8032_v17  ;;  %v3089_v38 = vadd.f32 %v8031_v1, %v10788_v29 }
 0x398   : > { %v3092_v53 = vadd.f32 %v8034_v36, %v10788_v29 }
 0x39a   : > { %v8507_v32 = vpop.f32.mrb[48].mxu1 }
 0x39b   : > { %v3138_v41 = vadd.f32 %v8507_v32, %v3073_v12  ;;  %v3129_v22 = vpop.f32.mrb[49].mxu1 }
 0x39c   : > { %v3130_v37 = vadd.f32 %v3129_v22, %v3065_v35  ;;  %v8508_v7 = vpop.f32.mrb[50].mxu1 }
 0x39d   : > { %v3141_v3 = vadd.f32 %v8508_v7, %v3076_v4  ;;  %v3132_v42 = vpop.f32.mrb[51].mxu1  ;;  %v3162_v31 = vmax.f32 %v3138_v41, 0.0 }
 0x39e   : > { %v3133_v55 = vadd.f32 %v3132_v42, %v3068_v27  ;;  %v3160_v8 = vmax.f32 %v3130_v37, 0.0 }
 0x39f   : > { %v3163_v39 = vmax.f32 %v3141_v3, 0.0 }
 0x3a0   : > { %v3161_v0 = vmax.f32 %v3133_v55, 0.0 }
 0x3a1   : > { %v10794_v26 = vpack.c.bf16 %v3163_v39, %v3162_v31 }
 0x3a2   : > { %v10797_v61 = vpack.c.bf16 %v3161_v0, %v3160_v8  ;;  %v8511_v30 = vpop.f32.mrb[52].mxu1 }
 0x3a3   : > { %v3154_v40 = vadd.f32 %v8511_v30, %v3089_v38  ;;  %v3145_v28 = vpop.f32.mrb[53].mxu1 }
 0x3a4   : > { %v3146_v13 = vadd.f32 %v3145_v28, %v3081_v21  ;;  %v8161_v59 = vpop.f32.mrb[52].mxu0  ;;  %v8512_v33 = vpop.f32.mrb[54].mxu1 }
 0x3a5   : > { %v3157_v24 = vadd.f32 %v8512_v33, %v3092_v53  ;;  %v8162_v43 = vpop.f32.mrb[53].mxu0  ;;  %v3148_v10 = vpop.f32.mrb[55].mxu1  ;;  %v3166_v17 = vmax.f32 %v3154_v40, 0.0 }
 0x3a6   : > { %v10802_v54 = vadd.f32 %v8162_v43, %v8161_v59  ;;  %v3149_v23 = vadd.f32 %v3148_v10, %v3084_v56  ;;  %v8164_v1 = vpop.f32.mrb[54].mxu0  ;;  %v3164_v15 = vmax.f32 %v3146_v13, 0.0 }
 0x3a7   : > { %v3167_v52 = vmax.f32 %v3157_v24, 0.0  ;;  %v8165_v12 = vpop.f32.mrb[55].mxu0 }
 0x3a8   : > { %v3165_v32 = vmax.f32 %v3149_v23, 0.0  ;;  %v10804_v35 = vadd.f32 %v8165_v12, %v8164_v1 }
 0x3a9   : > { %v10806_v36 = vpack.c.bf16 %v3167_v52, %v3166_v17 }
 0x3aa   : > { %v10808_v41 = vpack.c.bf16 %v3165_v32, %v3164_v15 }
 0x3ab   : > { %v3836_v60 = vshll.u32 %v10806_v36, 16 }
 0x3ac   : > { %v3831_v22 = vshll.u32 %v10808_v41, 16  ;;  %v8167_v4 = vpop.f32.mrb[56].mxu0  ;;  %v3829_v7 = vshrl.u32 %v10808_v41, 16 }
 0x3ad   : > { %v8168_v37 = vpop.f32.mrb[57].mxu0  ;;  %v10817_v8 = vrot.slane %v3836_v60, 1 }
 0x3ae   : > { %v3833_v27 = vrot.slane %v3831_v22, 1  ;;  %v10813_v3 = vadd.f32 %v8168_v37, %v8167_v4  ;;  %v8170_v42 = vpop.f32.mrb[58].mxu0 }
 0x3af   : > { %v8171_v55 = vpop.f32.mrb[59].mxu0 }
 0x3b0   : > { %v10815_v31 = vadd.f32 %v8171_v55, %v8170_v42  ;;  %v3834_v39 = vor.u32 %v3833_v27, %v3829_v7 }
 0x3b2   : > { %v10821_v0 = vsel %vm1131_vm3, %v3834_v39, %v10817_v8 }
 0x3b4   : > { %v8173_v38 = vpop.f32.mrb[60].mxu0 }
 0x3b5   : > { %v8174_v30 = vpop.f32.mrb[61].mxu0 }
 0x3b6   : > { %v10823_v21 = vadd.f32 %v8174_v30, %v8173_v38  ;;  %v8176_v40 = vpop.f32.mrb[62].mxu0 }
 0x3b7   : > { %v8177_v28 = vpop.f32.mrb[63].mxu0 }
 0x3b8   : > { %v10825_v53 = vadd.f32 %v8177_v28, %v8176_v40 }
 0x3ba   : > { %v8059_v13 = vpop.f32.mrb[56].mxu1 }
 0x3bb   : > { %v8060_v59 = vpop.f32.mrb[57].mxu1 }
 0x3bc   : > { %v8061_v33 = vadd.f32 %v8060_v59, %v8059_v13  ;;  %v8062_v56 = vpop.f32.mrb[58].mxu1 }
 0x3bd   : > { %v8063_v24 = vpop.f32.mrb[59].mxu1 }
 0x3be   : > { %v3243_v43 = vadd.f32 %v8061_v33, %v10788_v29  ;;  %v8064_v10 = vadd.f32 %v8063_v24, %v8062_v56 }
 0x3c0   : > { %v3308_v23 = vadd.f32 %v10723_v62, %v3243_v43  ;;  %v3246_v1 = vadd.f32 %v8064_v10, %v10788_v29  ;;  %v8773_v10 = vld [vmem:[%s12346_s2 + $0xe0] sm:$0xff]  }
 0x3c1   : > { %8235 = vmatprep.subr.bf16.mxu1 %v8773_v10  ;;  %8187 = vmatprep.subr.bf16.mxu0 %v8773_v10 }
 0x3c2   : > { %v3311_v17 = vadd.f32 %v10727_v11, %v3246_v1  ;;  %v8065_v52 = vpop.f32.mrb[60].mxu1  ;;  %v3338_v15 = vmax.f32 %v3308_v23, 0.0  ;;  %v10847_v1 = vld [vmem:[%s12346_s2 + $0xa0] sm:$0xff]  }
 0x3c3   : > { %v8066_v12 = vpop.f32.mrb[61].mxu1  ;;  %8188 = vmatpush3.bf16.msra.mxu0 %v10847_v1 }
 0x3c4   : > { %v3339_v32 = vmax.f32 %v3311_v17, 0.0  ;;  %v8067_v60 = vadd.f32 %v8066_v12, %v8065_v52  ;;  %v8068_v22 = vpop.f32.mrb[62].mxu1 }
 0x3c5   : > { %v8069_v4 = vpop.f32.mrb[63].mxu1 }
 0x3c6   : > { %v3346_v37 = vpack.c.bf16 %v3339_v32, %v3338_v15  ;;  %v3251_v7 = vadd.f32 %v8067_v60, %v10788_v29  ;;  %v8070_v27 = vadd.f32 %v8069_v4, %v8068_v22  ;;  %v10860_v4 = vld [vmem:[%s12346_s2 + $0xa8] sm:$0xff]  }
 0x3c8   : > { %v3316_v42 = vadd.f32 %v10721_v44, %v3251_v7  ;;  %v3254_v55 = vadd.f32 %v8070_v27, %v10788_v29  ;;  %3860 = vrot.lane.b32.xlu0 %v3346_v37, %s9332_s19  ;;  %v10868_v27 = vld [vmem:[%s12346_s2 + $0xf0] sm:$0xff]  }
 0x3ca   : > { %v3319_v62 = vadd.f32 %v10725_v45, %v3254_v55  ;;  %v8071_v11 = vpop.f32.mrb[64].mxu1  ;;  %v3340_v38 = vmax.f32 %v3316_v42, 0.0 }
 0x3cb   : > { %v8072_v39 = vpop.f32.mrb[65].mxu1 }
 0x3cc   : > { %v3341_v30 = vmax.f32 %v3319_v62, 0.0  ;;  %v8073_v40 = vadd.f32 %v8072_v39, %v8071_v11  ;;  %v8074_v28 = vpop.f32.mrb[66].mxu1 }
 0x3cd   : > { %v8075_v13 = vpop.f32.mrb[67].mxu1 }
 0x3ce   : > { %v3347_v59 = vpack.c.bf16 %v3341_v30, %v3340_v38  ;;  %v3259_v33 = vadd.f32 %v8073_v40, %v10788_v29  ;;  %v8076_v56 = vadd.f32 %v8075_v13, %v8074_v28  ;;  %v10881_v40 = vld [vmem:[%s12346_s2 + $0xf8] sm:$0xff]  }
 0x3d0   : > { %v3324_v24 = vadd.f32 %v10731_v47, %v3259_v33  ;;  %v3262_v44 = vadd.f32 %v8076_v56, %v10788_v29  ;;  %3862 = vrot.lane.b32.xlu0 %v3347_v59, %s9332_s19  ;;  %v10889_v33 = vld [vmem:[%s12346_s2 + $0xb8] sm:$0xff]  }
 0x3d2   : > { %v3327_v43 = vadd.f32 %v10735_v51, %v3262_v44  ;;  %v8077_v45 = vpop.f32.mrb[68].mxu1  ;;  %v3342_v17 = vmax.f32 %v3324_v24, 0.0  ;;  %v10852_v51 = vld [vmem:[%s12346_s2 + $0xe8] sm:$0xff]   ;;  %v10897_v44 = vld [vmem:[%s12346_s2 + $0x100] sm:$0xff]  }
 0x3d3   : > { %v8078_v23 = vpop.f32.mrb[69].mxu1  ;;  %8189 = vmatprep.subr.bf16.mxu0 %v10852_v51 }
 0x3d4   : > { %v3343_v52 = vmax.f32 %v3327_v43, 0.0  ;;  %v8079_v47 = vadd.f32 %v8078_v23, %v8077_v45  ;;  %v8080_v12 = vpop.f32.mrb[70].mxu1  ;;  %8190 = vmatpush3.bf16.msra.mxu0 %v10860_v4 }
 0x3d5   : > { %v8081_v15 = vpop.f32.mrb[71].mxu1  ;;  %8191 = vmatprep.subr.bf16.mxu0 %v10868_v27 }
 0x3d6   : > { %v3348_v32 = vpack.c.bf16 %v3343_v52, %v3342_v17  ;;  %v3267_v60 = vadd.f32 %v8079_v47, %v10788_v29  ;;  %v8082_v22 = vadd.f32 %v8081_v15, %v8080_v12  ;;  %v10910_v12 = vld [vmem:[%s12346_s2 + $0x108] sm:$0xff]  }
 0x3d8   : > { %v3332_v37 = vadd.f32 %v10729_v46, %v3267_v60  ;;  %v3270_v7 = vadd.f32 %v8082_v22, %v10788_v29  ;;  %3864 = vrot.lane.b32.xlu0 %v3348_v32, %s9332_s19  ;;  %v10876_v46 = vld [vmem:[%s12346_s2 + $0xb0] sm:$0xff]   ;;  %v10920_v22 = vld [vmem:[%s12346_s2 + $0xc8] sm:$0xff]  }
 0x3d9   : > { %8192 = vmatpush3.bf16.msra.mxu0 %v10876_v46 }
 0x3da   : > { %v3335_v42 = vadd.f32 %v10733_v50, %v3270_v7  ;;  %v8107_v55 = vpop.f32.mrb[72].mxu1  ;;  %v3344_v11 = vmax.f32 %v3332_v37, 0.0  ;;  %8193 = vmatprep.subr.bf16.mxu0 %v10881_v40 }
 0x3db   : > { %v8108_v62 = vpop.f32.mrb[73].mxu1 }
 0x3dc   : > { %v3345_v39 = vmax.f32 %v3335_v42, 0.0  ;;  %v8109_v38 = vadd.f32 %v8108_v62, %v8107_v55  ;;  %v8110_v30 = vpop.f32.mrb[74].mxu1  ;;  %v10929_v42 = vld [vmem:[%s12346_s2 + $0x110] sm:$0xff]  }
 0x3dd   : > { %v8111_v28 = vpop.f32.mrb[75].mxu1  ;;  %8194 = vmatpush3.bf16.msra.mxu0 %v10889_v33 }
 0x3de   : > { %v3349_v50 = vpack.c.bf16 %v3345_v39, %v3344_v11  ;;  %v3417_v13 = vadd.f32 %v8109_v38, %v10788_v29  ;;  %v8112_v59 = vadd.f32 %v8111_v28, %v8110_v30  ;;  %8195 = vmatprep.subr.bf16.mxu0 %v10897_v44 }
 0x3e0   : > { %v3482_v56 = vadd.f32 %v10739_v63, %v3417_v13  ;;  %v3420_v24 = vadd.f32 %v8112_v59, %v10788_v29  ;;  %3866 = vrot.lane.b32.xlu0 %v3349_v50, %s9332_s19  ;;  %v10905_v63 = vld [vmem:[%s12346_s2 + $0xc0] sm:$0xff]   ;;  %v10942_v50 = vld [vmem:[%s12346_s2 + $0x118] sm:$0xff]  }
 0x3e1   : > { %8196 = vmatpush3.bf16.msra.mxu0 %v10905_v63 }
 0x3e2   : > { %v3485_v43 = vadd.f32 %v10743_v16, %v3420_v24  ;;  %v8113_v45 = vpop.f32.mrb[76].mxu1  ;;  %v3512_v23 = vmax.f32 %v3482_v56, 0.0  ;;  %8197 = vmatprep.subr.bf16.mxu0 %v10910_v12  ;;  %v10952_v24 = vld [vmem:[%s12346_s2 + $0xd8] sm:$0xff]  }
 0x3e3   : > { %v8114_v10 = vpop.f32.mrb[77].mxu1 }
 0x3e4   : > { %v3513_v17 = vmax.f32 %v3485_v43, 0.0  ;;  %v8115_v52 = vadd.f32 %v8114_v10, %v8113_v45  ;;  %v8116_v47 = vpop.f32.mrb[78].mxu1 }
 0x3e5   : > { %v8117_v15 = vpop.f32.mrb[79].mxu1  ;;  %8198 = vmatpush3.bf16.msra.mxu0 %v10920_v22 }
 0x3e6   : > { %v10913_v16 = vpack.c.bf16 %v3513_v17, %v3512_v23  ;;  %v3425_v32 = vadd.f32 %v8115_v52, %v10788_v29  ;;  %v8118_v60 = vadd.f32 %v8117_v15, %v8116_v47  ;;  %8199 = vmatprep.subr.bf16.mxu0 %v10929_v42 }
 0x3e8   : > { %v3490_v37 = vadd.f32 %v10737_v57, %v3425_v32  ;;  %v3428_v7 = vadd.f32 %v8118_v60, %v10788_v29  ;;  %8569 = vmatprep.mubr.msk.bf16.mxu1 %vm1283_vm9, %v10913_v16  ;;  %v10937_v57 = vld [vmem:[%s12346_s2 + $0xd0] sm:$0xff]  }
 0x3e9   : > { %8200 = vmatpush3.bf16.msra.mxu0 %v10937_v57 }
 0x3ea   : > { %v3493_v55 = vadd.f32 %v10741_v9, %v3428_v7  ;;  %v8119_v62 = vpop.f32.mrb[80].mxu1  ;;  %v3514_v39 = vmax.f32 %v3490_v37, 0.0  ;;  %8201 = vmatprep.subr.bf16.mxu0 %v10942_v50  ;;  %v3603_v7 = vadd.f32 %v10802_v54, %v10788_v29  ;;  %v3598_v54 = vadd.f32 %v10783_v18, %v10788_v29 }
 0x3eb   : > { %v8120_v11 = vpop.f32.mrb[81].mxu1  ;;  %v3619_v18 = vadd.f32 %v10823_v21, %v10788_v29  ;;  %v3614_v21 = vadd.f32 %v10815_v31, %v10788_v29 }
 0x3ec   : > { %v3515_v38 = vmax.f32 %v3493_v55, 0.0  ;;  %v8121_v30 = vadd.f32 %v8120_v11, %v8119_v62  ;;  %v8122_v28 = vpop.f32.mrb[82].mxu1  ;;  %v3595_v62 = vadd.f32 %v10781_v20, %v10788_v29  ;;  %v3606_v11 = vadd.f32 %v10804_v35, %v10788_v29 }
 0x3ed   : > { %v8123_v13 = vpop.f32.mrb[83].mxu1  ;;  %8202 = vmatpush3.bf16.msra.mxu0 %v10952_v24 }
 0x3ee   : > { %v10945_v9 = vpack.c.bf16 %v3515_v38, %v3514_v39  ;;  %v3433_v59 = vadd.f32 %v8121_v30, %v10788_v29  ;;  %v8124_v56 = vadd.f32 %v8123_v13, %v8122_v28  ;;  %8577 = vmatprep.subr.bf16.mxu0 %v10748_v2 }
 0x3f0   : > { %v3498_v43 = vadd.f32 %v10768_v6, %v3433_v59  ;;  %v3436_v45 = vadd.f32 %v8124_v56, %v10788_v29  ;;  %8570 = vmatmul.mubr.msk.bf16.vlgmr.msra.gmra.mrb[96].mxu1 %vm1283_vm9, %v10945_v9 }
 0x3f1   : > { %8236 = vmatpush3.bf16.msra.mxu1 %v10847_v1 }
 0x3f2   : > { %v3501_v10 = vadd.f32 %v10777_v5, %v3436_v45  ;;  %v8125_v23 = vpop.f32.mrb[84].mxu1  ;;  %8237 = vmatprep.subr.bf16.mxu1 %v10852_v51  ;;  %v3516_v52 = vmax.f32 %v3498_v43, 0.0 }
 0x3f3   : > { %v8126_v17 = vpop.f32.mrb[85].mxu1 }
 0x3f4   : > { %v3517_v47 = vmax.f32 %v3501_v10, 0.0  ;;  %v8127_v6 = vadd.f32 %v8126_v17, %v8125_v23  ;;  %v8128_v15 = vpop.f32.mrb[86].mxu1  ;;  %v3611_v10 = vadd.f32 %v10813_v3, %v10788_v29 }
 0x3f5   : > { %v8129_v32 = vpop.f32.mrb[87].mxu1  ;;  %8238 = vmatpush3.bf16.msra.mxu1 %v10860_v4 }
 0x3f6   : > { %v10964_v60 = vpack.c.bf16 %v3517_v47, %v3516_v52  ;;  %v3441_v1 = vadd.f32 %v8127_v6, %v10788_v29  ;;  %v8130_v37 = vadd.f32 %v8129_v32, %v8128_v15  ;;  %8239 = vmatprep.subr.bf16.mxu1 %v10868_v27  ;;  %v3622_v52 = vadd.f32 %v10825_v53, %v10788_v29 }
 0x3f8   : > { %v3506_v5 = vadd.f32 %v10765_v58, %v3441_v1  ;;  %v3444_v51 = vadd.f32 %v8130_v37, %v10788_v29  ;;  %8573 = vmatprep.mubr.msk.bf16.mxu1 %vm1283_vm9, %v10964_v60 }
 0x3f9   : > { %8240 = vmatpush3.bf16.msra.mxu1 %v10876_v46 }
 0x3fa   : > { %v3509_v4 = vadd.f32 %v10775_v48, %v3444_v51  ;;  %v8555_v55 = vpop.f32.mrb[88].mxu1  ;;  %8241 = vmatprep.subr.bf16.mxu1 %v10881_v40  ;;  %v3518_v39 = vmax.f32 %v3506_v5, 0.0 }
 0x3fb   : > { %v3668_v27 = vadd.f32 %v8555_v55, %v3603_v7  ;;  %v3659_v58 = vpop.f32.mrb[89].mxu1 }
 0x3fc   : > { %v3519_v38 = vmax.f32 %v3509_v4, 0.0  ;;  %v3660_v30 = vadd.f32 %v3659_v58, %v3595_v62  ;;  %v8556_v28 = vpop.f32.mrb[90].mxu1 }
 0x3fd   : > { %v3671_v46 = vadd.f32 %v8556_v28, %v3606_v11  ;;  %v3662_v48 = vpop.f32.mrb[91].mxu1  ;;  %8242 = vmatpush3.bf16.msra.mxu1 %v10889_v33  ;;  %v3692_v40 = vmax.f32 %v3668_v27, 0.0 }
 0x3fe   : > { %v10984_v13 = vpack.c.bf16 %v3519_v38, %v3518_v39  ;;  %v3663_v20 = vadd.f32 %v3662_v48, %v3598_v54  ;;  %8243 = vmatprep.subr.bf16.mxu1 %v10897_v44  ;;  %v3690_v56 = vmax.f32 %v3660_v30, 0.0 }
 0x3ff   : > { %v3693_v59 = vmax.f32 %v3671_v46, 0.0 }
 0x400   : > { %v3691_v35 = vmax.f32 %v3663_v20, 0.0  ;;  %8574 = vmatmul.mubr.msk.bf16.gmra.mrb[100].mxu1 %vm1283_vm9, %v10984_v13 }
 0x401   : > { %v3699_v43 = vpack.c.bf16 %v3693_v59, %v3692_v40  ;;  %8244 = vmatpush3.bf16.msra.mxu1 %v10905_v63  ;;  %v3745_v40 = vshrl.u32 %v10913_v16, 16 }
 0x402   : > { %v3698_v45 = vpack.c.bf16 %v3691_v35, %v3690_v56  ;;  %v8559_v33 = vpop.f32.mrb[92].mxu1  ;;  %8245 = vmatprep.subr.bf16.mxu1 %v10910_v12 }
 0x403   : > { %v3786_v44 = vshrl.u32 %v3699_v43, 16  ;;  %v3684_v23 = vadd.f32 %v8559_v33, %v3619_v18  ;;  %v3675_v17 = vpop.f32.mrb[93].mxu1  ;;  %v3789_v32 = vshll.u32 %v3699_v43, 16  ;;  %v3747_v56 = vrot.slane %v3745_v40, 7  ;;  %v8790_v40 = vld [vmem:[%s12346_s2 + $0x1c8] sm:$0xff]  }
 0x404   : > { %v3779_v47 = vshrl.u32 %v3698_v45, 16  ;;  %v3676_v6 = vadd.f32 %v3675_v17, %v3611_v10  ;;  %v8560_v15 = vpop.f32.mrb[94].mxu1  ;;  %4174 = vrot.lane.b32.xlu0 %v3698_v45, %s9332_s19  ;;  %v3782_v5 = vshll.u32 %v3698_v45, 16  ;;  %v3748_v45 = vshll.u32 %v10913_v16, 16 }
 0x405   : > { %v3788_v63 = vrot.slane %v3786_v44, 7  ;;  %v3687_v1 = vadd.f32 %v8560_v15, %v3622_v52  ;;  %v3678_v3 = vpop.f32.mrb[95].mxu1  ;;  %8246 = vmatpush3.bf16.msra.mxu1 %v10920_v22  ;;  %v3696_v53 = vmax.f32 %v3684_v23, 0.0  ;;  %v3752_v33 = vshrl.u32 %v10945_v9, 16 }
 0x406   : > { %v3679_v12 = vadd.f32 %v3678_v3, %v3614_v21  ;;  %v3781_v37 = vrot.slane %v3779_v47, 7  ;;  %8247 = vmatprep.subr.bf16.mxu1 %v10929_v42  ;;  %v3694_v4 = vmax.f32 %v3676_v6, 0.0  ;;  %v3755_v47 = vshll.u32 %v10945_v9, 16 }
 0x407   : > { %v3697_v51 = vmax.f32 %v3687_v1, 0.0  ;;  %v3791_v7 = vor.u32 %v3789_v32, %v3788_v63  ;;  %v3754_v23 = vrot.slane %v3752_v33, 7  ;;  %v3761_v15 = vshrl.u32 %v10964_v60, 16  ;;  %v8797_v33 = vld [vmem:[%s12346_s2 + $0x190] sm:$0xff]  }
 0x408   : > { %v3695_v55 = vmax.f32 %v3679_v12, 0.0  ;;  %v3784_v62 = vor.u32 %v3782_v5, %v3781_v37  ;;  %v3764_v3 = vshll.u32 %v10964_v60, 16  ;;  %v3815_v5 = vshll.u32 %v10797_v61, 16 }
 0x409   : > { %v3701_v27 = vpack.c.bf16 %v3697_v51, %v3696_v53  ;;  %v3792_v29 = vsel %vm1020_vm0, %v3781_v37, %v3791_v7  ;;  %8248 = vmatpush3.bf16.msra.mxu1 %v10937_v57  ;;  %v3757_v6 = vor.u32 %v3755_v47, %v3754_v23  ;;  %v3763_v32 = vrot.slane %v3761_v15, 7  ;;  %v8800_v23 = vld [vmem:[%s12346_s2 + $0x158] sm:$0xff]   ;;  %v8803_v47 = vld [vmem:[%s12346_s2 + $0x1a8] sm:$0xff]  }
 0x40a   : > { %v3700_v31 = vpack.c.bf16 %v3695_v55, %v3694_v4  ;;  %v3810_v22 = vsel %vm9717_vm2, 0, %v3784_v62  ;;  %8249 = vmatprep.subr.bf16.mxu1 %v10942_v50  ;;  %v3817_v55 = vrot.slane %v3815_v5, 1 }
 0x40b   : > { %v3802_v58 = vshrl.u32 %v3701_v27, 16  ;;  %3848 = vrot.lane.b32.xlu1 %v3810_v22, %s9332_s19  ;;  %v3805_v39 = vshll.u32 %v3701_v27, 16  ;;  %v3758_v63 = vsel %vm1020_vm0, %v3747_v56, %v3757_v6  ;;  %v3766_v37 = vor.u32 %v3764_v3, %v3763_v32 }
 0x40c   : > { %v3795_v42 = vshrl.u32 %v3700_v31, 16  ;;  %4178 = vrot.lane.b32.xlu0 %v3700_v31, %s9332_s19  ;;  %v3798_v30 = vshll.u32 %v3700_v31, 16  ;;  %v3813_v31 = vshrl.u32 %v10797_v61, 16 }
 0x40d   : > { %v3804_v11 = vrot.slane %v3802_v58, 7  ;;  %8250 = vmatpush3.bf16.msra.mxu1 %v10952_v24 }
 0x40e   : > { %v3797_v38 = vrot.slane %v3795_v42, 7 }
 0x40f   : > { %3850 = vrot.lane.b32.xlu1 %v3792_v29, %s9332_s19  ;;  %v3807_v57 = vor.u32 %v3805_v39, %v3804_v11  ;;  %v3820_v29 = vshll.u32 %v10794_v26, 16 }
 0x410   : > { %v3800_v28 = vor.u32 %v3798_v30, %v3797_v38  ;;  %v3824_v30 = vshrl.u32 %v10794_v26, 16 }
 0x411   : > { %v3808_v54 = vsel %vm1020_vm0, %v3797_v38, %v3807_v57  ;;  %v3822_v11 = vrot.slane %v3820_v29, 1 }
 0x412   : > { %v3811_v50 = vsel %vm9717_vm2, 0, %v3800_v28  ;;  %v3840_v28 = vshrl.u32 %v10806_v36, 16 }
 0x413   : > { %3852 = vrot.lane.b32.xlu1 %v3811_v50, %s9332_s19 }
 0x417   : > { %3854 = vrot.lane.b32.xlu1 %v3808_v54, %s9332_s19 }
 0x41b   : > { %4176 = vrot.lane.b32.xlu1 %v3699_v43, %s9332_s19  ;;  %v3750_v43 = vor.u32 %v3748_v45, %v3747_v56  ;;  %v8792_v56 = vld [vmem:[%s12346_s2 + $0x1d8] sm:$0xff]   ;;  %v8795_v45 = vld [vmem:[%s12346_s2 + $0x188] sm:$0xff]  }
 0x41d   : > { %v3776_v10 = vsel %vm9717_vm2, 0, %v3750_v43  ;;  %v8796_v43 = vld [vmem:[%s12346_s2 + $0x148] sm:$0xff]  }
 0x41f   : > { %4180 = vrot.lane.b32.xlu1 %v3701_v27, %s9332_s19  ;;  %v3771_v27 = vshll.u32 %v10984_v13, 16 }
 0x43a   : > { %v3861_v24 = vpop.permute.xlu0 %3860 }
 0x43b   : > { %v3885_v46 = vsel %vm1283_vm9, %v10797_v61, %v3861_v24 }
 0x43c   : > { %4060 = vmatprep.mubr.bf16.mxu0 %v3885_v46 }
 0x442   : > { %v3863_v48 = vpop.permute.xlu0 %3862 }
 0x443   : > { %v3888_v52 = vsel %vm1283_vm9, %v10794_v26, %v3863_v48  ;;  %v3842_v26 = vor.u32 %v3840_v28, %v10817_v8  ;;  %v8789_v8 = vld [vmem:[%s12346_s2 + $0x1c0] sm:$0xff]  }
 0x445   : > { %v3845_v54 = vsel %vm9768_vm5, %v3842_v26, 0 }
 0x44a   : > { %v3865_v20 = vpop.permute.xlu0 %3864 }
 0x452   : > { %v3867_v59 = vpop.permute.xlu0 %3866 }
 0x453   : > { %v3894_v62 = vsel %vm1283_vm9, %v10806_v36, %v3867_v59  ;;  %v8791_v59 = vld [vmem:[%s12346_s2 + $0x1d0] sm:$0xff]  }
 0x476   : > { %v4175_v35 = vpop.permute.xlu0 %4174 }
 0x477   : > { %v4183_v18 = vsel %vm1283_vm9, %v10913_v16, %v4175_v35  ;;  %v8793_v35 = vld [vmem:[%s12346_s2 + $0x180] sm:$0xff]  }
 0x478   : > { %4238 = vmatprep.mubr.bf16.mxu1 %v4183_v18  ;;  %v8794_v18 = vld [vmem:[%s12346_s2 + $0x140] sm:$0xff]   ;;  %8283 = vmatprep.subr.bf16.mxu1 %v8793_v35 }
 0x479   : > { %4239 = vmatmul.mubr.bf16.vlgmr.msra.gmra.mrb[104].mxu1 %v3885_v46 }
 0x47a   : > { %8284 = vmatpush3.bf16.msra.mxu1 %v8794_v18 }
 0x47b   : > { %8285 = vmatprep.subr.bf16.mxu1 %v8795_v45 }
 0x47d   : > { %v3849_v44 = vpop.permute.xlu1 %3848 }
 0x47e   : > { %v3870_v17 = vsel %vm1283_vm9, %v3776_v10, %v3849_v44  ;;  %v4179_v53 = vpop.permute.xlu0 %4178  ;;  %8286 = vmatpush3.bf16.msra.mxu1 %v8796_v43  ;;  %v8798_v10 = vld [vmem:[%s12346_s2 + $0x150] sm:$0xff]   ;;  %v8799_v44 = vld [vmem:[%s12346_s2 + $0x198] sm:$0xff]  }
 0x47f   : > { %4061 = vmatmul.mubr.bf16.vlgmr.msra.gmra.mrb[64].mxu0 %v3870_v17  ;;  %8287 = vmatprep.subr.bf16.mxu1 %v8797_v33  ;;  %v8801_v17 = vld [vmem:[%s12346_s2 + $0x1a0] sm:$0xff]  }
 0x480   : > { %4068 = vmatprep.mubr.bf16.mxu0 %v3888_v52  ;;  %8578 = vmatpush3.bf16.msra.mxu0 %v10748_v2  ;;  %v3891_v2 = vsel %vm1283_vm9, %v10808_v41, %v3865_v20  ;;  %v3777_v41 = vsel %vm9717_vm2, 0, %v3766_v37 }
 0x481   : > { %v3851_v16 = vpop.permute.xlu1 %3850  ;;  %8579 = vmatprep.subr.bf16.mxu0 %v10755_v34 }
 0x482   : > { %v3874_v1 = vsel %vm1283_vm9, %v3758_v63, %v3851_v16  ;;  %8288 = vmatpush3.bf16.msra.mxu1 %v8798_v10  ;;  %v8804_v16 = vld [vmem:[%s12346_s2 + $0x168] sm:$0xff]  }
 0x483   : > { %8289 = vmatprep.subr.bf16.mxu1 %v8799_v44 }
 0x484   : > { %8580 = vmatpush3.bf16.msra.mxu0 %v10755_v34  ;;  %v3768_v34 = vshrl.u32 %v10984_v13, 16 }
 0x485   : > { %v3853_v21 = vpop.permute.xlu1 %3852  ;;  %8581 = vmatprep.subr.bf16.mxu0 %v10762_v19 }
 0x486   : > { %v3770_v7 = vrot.slane %v3768_v34, 7  ;;  %v3878_v4 = vsel %vm1283_vm9, %v3777_v41, %v3853_v21  ;;  %8290 = vmatpush3.bf16.msra.mxu1 %v8800_v23  ;;  %v11142_v34 = vld [vmem:[%s12347_s3 + $0x2] ss:$0 sm:$0xff] }
 0x487   : > { %4069 = vmatmul.mubr.bf16.gmra.mrb[68].mxu0 %v3874_v1  ;;  %8291 = vmatprep.subr.bf16.mxu1 %v8801_v17 }
 0x488   : > { %4076 = vmatprep.mubr.bf16.mxu0 %v3891_v2  ;;  %8582 = vmatpush3.bf16.msra.mxu0 %v10762_v19  ;;  %v3773_v22 = vor.u32 %v3771_v27, %v3770_v7 }
 0x489   : > { %v3855_v12 = vpop.permute.xlu1 %3854  ;;  %8583 = vmatprep.subr.bf16.mxu0 %v10773_v25 }
 0x48a   : > { %v3774_v42 = vsel %vm1020_vm0, %v3763_v32, %v3773_v22 }
 0x48b   : > { %v3882_v39 = vsel %vm1283_vm9, %v3774_v42, %v3855_v12 }
 0x48c   : > { %8584 = vmatpush3.bf16.msra.mxu0 %v10773_v25  ;;  %v4189_v25 = vsel %vm1283_vm9, %v10964_v60, %v4179_v53  ;;  %v3826_v60 = vor.u32 %v3824_v30, %v3822_v11 }
 0x48d   : > { %v4177_v51 = vpop.permute.xlu1 %4176  ;;  %8593 = vmatprep.subr.bf16.mxu0 %v8789_v8 }
 0x48e   : > { %v4186_v19 = vsel %vm1283_vm9, %v10945_v9, %v4177_v51  ;;  %v3818_v9 = vor.u32 %v3817_v55, %v3813_v31  ;;  %v3844_v57 = vsel %vm9768_vm5, %v3826_v60, 0 }
 0x48f   : > { %4077 = vmatmul.mubr.bf16.gmra.mrb[72].mxu0 %v3878_v4  ;;  %4246 = vmatprep.mubr.bf16.mxu1 %v4186_v19 }
 0x490   : > { %4084 = vmatprep.mubr.bf16.mxu0 %v3894_v62  ;;  %4247 = vmatmul.mubr.bf16.gmra.mrb[108].mxu1 %v3888_v52  ;;  %v3823_v38 = vsel %vm1131_vm3, %v3818_v9, %v3822_v11  ;;  %v8802_v52 = vld [vmem:[%s12346_s2 + $0x160] sm:$0xff]  }
 0x491   : > { %4254 = vmatprep.mubr.bf16.mxu1 %v4189_v25  ;;  %v4181_v58 = vpop.permute.xlu1 %4180  ;;  %8292 = vmatpush3.bf16.msra.mxu1 %v8802_v52 }
 0x492   : > { %v4192_v61 = vsel %vm1283_vm9, %v10984_v13, %v4181_v58  ;;  %8293 = vmatprep.subr.bf16.mxu1 %v8803_v47 }
 0x495   : > { %8294 = vmatpush3.bf16.msra.mxu1 %v8804_v16 }
 0x497   : > { %4085 = vmatmul.mubr.bf16.gmra.mrb[76].mxu0 %v3882_v39 }
 0x498   : > { %4255 = vmatmul.mubr.bf16.gmra.mrb[112].mxu1 %v3891_v2  ;;  %8585 = vmatprep.mubr.msk.bf16.mxu0 %vm1283_vm9, %v3823_v38 }
 0x499   : > { %4262 = vmatprep.mubr.bf16.mxu1 %v4192_v61 }
 0x49f   : > { %8586 = vmatmul.mubr.msk.bf16.vlgmr.msra.gmra.mrb[80].mxu0 %vm1283_vm9, %v3844_v57 }
 0x4a0   : > { %4263 = vmatmul.mubr.bf16.gmra.mrb[116].mxu1 %v3894_v62  ;;  %8589 = vmatprep.mubr.msk.bf16.mxu0 %vm1283_vm9, %v10821_v0 }
 0x4a1   : > { %8594 = vmatpush3.bf16.msra.mxu0 %v8789_v8 }
 0x4a2   : > { %8595 = vmatprep.subr.bf16.mxu0 %v8790_v40 }
 0x4a5   : > { %8596 = vmatpush3.bf16.msra.mxu0 %v8790_v40 }
 0x4a6   : > { %8597 = vmatprep.subr.bf16.mxu0 %v8791_v59 }
 0x4a7   : > { %8590 = vmatmul.mubr.msk.bf16.gmra.mrb[84].mxu0 %vm1283_vm9, %v3845_v54 }
 0x4a9   : > { %8598 = vmatpush3.bf16.msra.mxu0 %v8791_v59 }
 0x4aa   : > { %8599 = vmatprep.subr.bf16.mxu0 %v8792_v56 }
 0x4ad   : > { %8600 = vmatpush3.bf16.msra.mxu0 %v8792_v56 }
 0x4c3   : > { %v11075_v13 = vpop.f32.mrb[96].mxu1 }
 0x4c4   : > { %v4127_v50 = vpop.f32.mrb[97].mxu1 }
 0x4c5   : > { %v11077_v24 = vpop.f32.mrb[98].mxu1 }
 0x4c6   : > { %v4130_v46 = vpop.f32.mrb[99].mxu1 }
 0x4d3   : > { %v11079_v48 = vpop.f32.mrb[100].mxu1 }
 0x4d4   : > { %v11081_v20 = vpop.f32.mrb[101].mxu1 }
 0x4d5   : > { %v11083_v0 = vpop.f32.mrb[102].mxu1 }
 0x4d6   : > { %v11085_v36 = vpop.f32.mrb[103].mxu1 }
 0x54c   : > { %v8251_v6 = vpop.f32.mrb[104].mxu1 }
 0x54d   : > { %v8252_v15 = vpop.f32.mrb[105].mxu1 }
 0x54e   : > { %v11135_v21 = vadd.f32 %v8252_v15, %v8251_v6  ;;  %v8254_v63 = vpop.f32.mrb[106].mxu1 }
 0x54f   : > { %v8255_v32 = vpop.f32.mrb[107].mxu1 }
 0x550   : > { %v11137_v1 = vadd.f32 %v8255_v32, %v8254_v63 }
 0x552   : > { %v8203_v2 = vpop.f32.mrb[64].mxu0 }
 0x553   : > { %v8204_v3 = vpop.f32.mrb[65].mxu0 }
 0x554   : > { %v8205_v12 = vadd.f32 %v8204_v3, %v8203_v2  ;;  %v8206_v37 = vpop.f32.mrb[66].mxu0 }
 0x555   : > { %v8207_v5 = vpop.f32.mrb[67].mxu0 }
 0x556   : > { %v4063_v53 = vadd.f32 %v8205_v12, %v11142_v34  ;;  %v8208_v51 = vadd.f32 %v8207_v5, %v8206_v37 }
 0x558   : > { %v4128_v41 = vadd.f32 %v4127_v50, %v4063_v53  ;;  %v4066_v7 = vadd.f32 %v8208_v51, %v11142_v34 }
 0x55a   : > { %v4131_v4 = vadd.f32 %v4130_v46, %v4066_v7  ;;  %v8209_v19 = vpop.f32.mrb[68].mxu0  ;;  %v4158_v62 = vmax.f32 %v4128_v41, 0.0 }
 0x55b   : > { %v8210_v55 = vpop.f32.mrb[69].mxu0 }
 0x55c   : > { %v4159_v27 = vmax.f32 %v4131_v4, 0.0  ;;  %v8211_v25 = vadd.f32 %v8210_v55, %v8209_v19  ;;  %v8212_v29 = vpop.f32.mrb[70].mxu0 }
 0x55d   : > { %v8213_v31 = vpop.f32.mrb[71].mxu0 }
 0x55e   : > { %v11146_v22 = vpack.c.bf16 %v4159_v27, %v4158_v62  ;;  %v4071_v9 = vadd.f32 %v8211_v25, %v11142_v34  ;;  %v8214_v58 = vadd.f32 %v8213_v31, %v8212_v29  ;;  %v8805_v25 = vld [vmem:[%s12346_s2 + $0x1b0] sm:$0xff]  }
 0x55f   : > { %v8806_v29 = vld [vmem:[%s12346_s2 + $0x170] sm:$0xff]   ;;  %8295 = vmatprep.subr.bf16.mxu1 %v8805_v25 }
 0x560   : > { %v4136_v42 = vadd.f32 %v11075_v13, %v4071_v9  ;;  %v4074_v11 = vadd.f32 %v8214_v58, %v11142_v34  ;;  %v4391_v39 = vshrl.u32 %v11146_v22, 16  ;;  %v4394_v38 = vshll.u32 %v11146_v22, 16  ;;  %8296 = vmatpush3.bf16.msra.mxu1 %v8806_v29 }
 0x562   : > { %v4139_v30 = vadd.f32 %v11077_v24, %v4074_v11  ;;  %v8215_v61 = vpop.f32.mrb[72].mxu0  ;;  %v4393_v60 = vrot.slane %v4391_v39, 7  ;;  %v4160_v26 = vmax.f32 %v4136_v42, 0.0  ;;  %v4458_v43 = vrot.slane %v4394_v38, 1 }
 0x563   : > { %v8216_v57 = vpop.f32.mrb[73].mxu0  ;;  %v8257_v28 = vpop.f32.mrb[108].mxu1 }
 0x564   : > { %v4161_v54 = vmax.f32 %v4139_v30, 0.0  ;;  %v8217_v50 = vadd.f32 %v8216_v57, %v8215_v61  ;;  %v8218_v46 = vpop.f32.mrb[74].mxu0  ;;  %v8258_v8 = vpop.f32.mrb[109].mxu1  ;;  %v11154_v40 = vor.u32 %v4394_v38, %v4393_v60  ;;  %v4459_v16 = vor.u32 %v4458_v43, %v4391_v39 }
 0x565   : > { %v8259_v13 = vadd.f32 %v8258_v8, %v8257_v28  ;;  %v8219_v59 = vpop.f32.mrb[75].mxu0  ;;  %v8260_v56 = vpop.f32.mrb[110].mxu1  ;;  %v4241_v57 = vadd.f32 %v11135_v21, %v11142_v34 }
 0x566   : > { %v11156_v35 = vpack.c.bf16 %v4161_v54, %v4160_v26  ;;  %v4079_v18 = vadd.f32 %v8217_v50, %v11142_v34  ;;  %v8220_v45 = vadd.f32 %v8219_v59, %v8218_v46  ;;  %v8261_v24 = vpop.f32.mrb[111].mxu1 }
 0x567   : > { %v8262_v33 = vadd.f32 %v8261_v24, %v8260_v56  ;;  %v4249_v39 = vadd.f32 %v8259_v13, %v11142_v34 }
 0x568   : > { %v4398_v10 = vshrl.u32 %v11156_v35, 16  ;;  %v4144_v44 = vadd.f32 %v11081_v20, %v4079_v18  ;;  %v4082_v23 = vadd.f32 %v8220_v45, %v11142_v34  ;;  %v4401_v17 = vshll.u32 %v11156_v35, 16 }
 0x569   : > { %v4252_v46 = vadd.f32 %v8262_v33, %v11142_v34 }
 0x56a   : > { %v4147_v52 = vadd.f32 %v11085_v36, %v4082_v23  ;;  %v8221_v47 = vpop.f32.mrb[76].mxu0  ;;  %v4460_v6 = vrot.slane %v4401_v17, 1  ;;  %v4400_v15 = vrot.slane %v4398_v10, 7  ;;  %v4162_v63 = vmax.f32 %v4144_v44, 0.0 }
 0x56b   : > { %v8222_v32 = vpop.f32.mrb[77].mxu0  ;;  %v8263_v2 = vpop.f32.mrb[112].mxu1 }
 0x56c   : > { %v4163_v3 = vmax.f32 %v4147_v52, 0.0  ;;  %v8223_v12 = vadd.f32 %v8222_v32, %v8221_v47  ;;  %v8224_v37 = vpop.f32.mrb[78].mxu0  ;;  %v8264_v5 = vpop.f32.mrb[113].mxu1  ;;  %v4461_v53 = vsel %vm1131_vm3, %v4459_v16, %v4460_v6  ;;  %v4462_v20 = vor.u32 %v4460_v6, %v4398_v10 }
 0x56d   : > { %v8265_v51 = vadd.f32 %v8264_v5, %v8263_v2  ;;  %v8225_v41 = vpop.f32.mrb[79].mxu0  ;;  %v8266_v7 = vpop.f32.mrb[114].mxu1  ;;  %8601 = vmatprep.mubr.msk.bf16.mxu0 %vm1283_vm9, %v4461_v53  ;;  %v4403_v36 = vor.u32 %v4401_v17, %v4400_v15 }
 0x56e   : > { %v11166_v4 = vpack.c.bf16 %v4163_v3, %v4162_v63  ;;  %v4087_v19 = vadd.f32 %v8223_v12, %v11142_v34  ;;  %v8226_v55 = vadd.f32 %v8225_v41, %v8224_v37  ;;  %v8267_v62 = vpop.f32.mrb[115].mxu1  ;;  %v4470_v27 = vsel %vm9768_vm5, %v4462_v20, 0 }
 0x56f   : > { %v8268_v31 = vadd.f32 %v8267_v62, %v8266_v7  ;;  %8602 = vmatmul.mubr.msk.bf16.vlgmr.msra.gmra.mrb[88].mxu0 %vm1283_vm9, %v4470_v27  ;;  %v11179_v9 = vsel %vm1020_vm0, %v4393_v60, %v4403_v36  ;;  %v8808_v60 = vld [vmem:[%s12346_s2 + $0x178] sm:$0xff]   ;;  %v4257_v3 = vadd.f32 %v8265_v51, %v11142_v34 }
 0x570   : > { %v4152_v58 = vadd.f32 %v11079_v48, %v4087_v19  ;;  %v4090_v42 = vadd.f32 %v8226_v55, %v11142_v34  ;;  %v4407_v11 = vshrl.u32 %v11166_v4, 16  ;;  %v4410_v38 = vshll.u32 %v11166_v4, 16  ;;  %v8807_v48 = vld [vmem:[%s12346_s2 + $0x1b8] sm:$0xff]  }
 0x571   : > { %8297 = vmatprep.subr.bf16.mxu1 %v8807_v48  ;;  %v4260_v5 = vadd.f32 %v8268_v31, %v11142_v34 }
 0x572   : > { %v4155_v30 = vadd.f32 %v11083_v0, %v4090_v42  ;;  %v8587_v61 = vpop.f32.mrb[80].mxu0  ;;  %v11195_v28 = vrot.slane %v4407_v11, 7  ;;  %v4244_v0 = vadd.f32 %v11137_v1, %v11142_v34  ;;  %v4164_v8 = vmax.f32 %v4152_v58, 0.0  ;;  %8298 = vmatpush3.bf16.msra.mxu1 %v8808_v60 }
 0x573   : > { %v4314_v26 = vadd.f32 %v8587_v61, %v4249_v39  ;;  %v8269_v54 = vpop.f32.mrb[116].mxu1  ;;  %v4305_v50 = vpop.f32.mrb[81].mxu0  ;;  %v4464_v17 = vrot.slane %v4410_v38, 1 }
 0x574   : > { %v4165_v21 = vmax.f32 %v4155_v30, 0.0  ;;  %v4306_v13 = vadd.f32 %v4305_v50, %v4241_v57  ;;  %v8270_v59 = vpop.f32.mrb[117].mxu1  ;;  %v8588_v56 = vpop.f32.mrb[82].mxu0  ;;  %v11201_v18 = vor.u32 %v4410_v38, %v11195_v28 }
 0x575   : > { %v8271_v45 = vadd.f32 %v8270_v59, %v8269_v54  ;;  %v4317_v24 = vadd.f32 %v8588_v56, %v4252_v46  ;;  %v8272_v43 = vpop.f32.mrb[118].mxu1  ;;  %v4308_v10 = vpop.f32.mrb[83].mxu0  ;;  %v4338_v1 = vmax.f32 %v4314_v26, 0.0  ;;  %v4465_v53 = vor.u32 %v4464_v17, %v4407_v11 }
 0x576   : > { %v11203_v44 = vpack.c.bf16 %v4165_v21, %v4164_v8  ;;  %v4309_v33 = vadd.f32 %v4308_v10, %v4244_v0  ;;  %v8273_v23 = vpop.f32.mrb[119].mxu1  ;;  %v4336_v16 = vmax.f32 %v4306_v13, 0.0 }
 0x577   : > { %v4339_v52 = vmax.f32 %v4317_v24, 0.0  ;;  %v8274_v47 = vadd.f32 %v8273_v23, %v8272_v43  ;;  %v4265_v2 = vadd.f32 %v8271_v45, %v11142_v34 }
 0x578   : > { %v4337_v6 = vmax.f32 %v4309_v33, 0.0  ;;  %v4417_v15 = vshll.u32 %v11203_v44, 16  ;;  %v4414_v63 = vshrl.u32 %v11203_v44, 16 }
 0x579   : > { %v4345_v32 = vpack.c.bf16 %v4339_v52, %v4338_v1  ;;  %v4268_v19 = vadd.f32 %v8274_v47, %v11142_v34  ;;  %v4422_v47 = vsel %vm9717_vm2, 0, %v11154_v40 }
 0x57a   : > { %v4344_v12 = vpack.c.bf16 %v4337_v6, %v4336_v16  ;;  %v8591_v37 = vpop.f32.mrb[84].mxu0  ;;  %v4466_v20 = vrot.slane %v4417_v15, 1  ;;  %v4416_v55 = vrot.slane %v4414_v63, 7 }
 0x57b   : > { %v4432_v41 = vshrl.u32 %v4345_v32, 16  ;;  %v4330_v7 = vadd.f32 %v8591_v37, %v4265_v2  ;;  %v4321_v36 = vpop.f32.mrb[85].mxu0  ;;  %v4435_v42 = vshll.u32 %v4345_v32, 16 }
 0x57c   : > { %v4425_v62 = vshrl.u32 %v4344_v12, 16  ;;  %v4322_v27 = vadd.f32 %v4321_v36, %v4257_v3  ;;  %v8592_v25 = vpop.f32.mrb[86].mxu0  ;;  %4486 = vrot.lane.b32.xlu0 %v4344_v12, %s9332_s19  ;;  %v4467_v29 = vsel %vm1131_vm3, %v4465_v53, %v4466_v20  ;;  %v4468_v51 = vor.u32 %v4466_v20, %v4414_v63 }
 0x57d   : > { %v4434_v58 = vrot.slane %v4432_v41, 7  ;;  %v4333_v39 = vadd.f32 %v8592_v25, %v4268_v19  ;;  %v4324_v31 = vpop.f32.mrb[87].mxu0  ;;  %8605 = vmatprep.mubr.msk.bf16.mxu0 %vm1283_vm9, %v4467_v29  ;;  %v4428_v30 = vshll.u32 %v4344_v12, 16  ;;  %v4342_v61 = vmax.f32 %v4330_v7, 0.0  ;;  %v8809_v19 = vld [vmem:[%s12348_s4 + $0x300] ss:$8 sps:$4 sm:$0xff]  }
 0x57e   : > { %v4325_v11 = vadd.f32 %v4324_v31, %v4260_v5  ;;  %v4471_v38 = vsel %vm9768_vm5, %v4468_v51, 0  ;;  %v4427_v34 = vrot.slane %v4425_v62, 7  ;;  %v4419_v60 = vor.u32 %v4417_v15, %v4416_v55  ;;  %v8811_v55 = vld [vmem:[%s12348_s4 + $0x304] ss:$8 sps:$4 sm:$0xff]   ;;  %v8812_v62 = vld [vmem:[%s12348_s4 + $0x310] ss:$8 sps:$4 sm:$0xff]  }
 0x57f   : > { %v4343_v57 = vmax.f32 %v4333_v39, 0.0  ;;  %8606 = vmatmul.mubr.msk.bf16.gmra.mrb[92].mxu0 %vm1283_vm9, %v4471_v38  ;;  %v4437_v48 = vor.u32 %v4435_v42, %v4434_v58  ;;  %v4340_v26 = vmax.f32 %v4322_v27, 0.0  ;;  %v4423_v12 = vsel %vm9717_vm2, 0, %v11201_v18  ;;  %6779 = vmatprep.subr.bf16.mxu0 %v8811_v55  ;;  %v8814_v27 = vld [vmem:[%s12348_s4 + $0x314] ss:$8 sps:$4 sm:$0xff]  }
 0x580   : > { %v4341_v54 = vmax.f32 %v4325_v11, 0.0  ;;  %4488 = vrot.lane.b32.xlu0 %v4345_v32, %s9332_s19  ;;  %v4430_v50 = vor.u32 %v4428_v30, %v4427_v34  ;;  %v4420_v14 = vsel %vm1020_vm0, %v11195_v28, %v4419_v60  ;;  %6780 = vmatpush1.bf16.msra.mxu0 %v8809_v19  ;;  %v8817_v25 = vld [vmem:[%s12348_s4 + $0x324] ss:$8 sps:$4 sm:$0xff]   ;;  %v8824_v29 = vld [vmem:[%s12348_s4] ss:$8 sps:$4 sm:$0xff]  }
 0x581   : > { %v4347_v46 = vpack.c.bf16 %v4343_v57, %v4342_v61  ;;  %v4438_v0 = vsel %vm1020_vm0, %v4427_v34, %v4437_v48  ;;  %6781 = vmatprep.subr.bf16.mxu0 %v8814_v27  ;;  %v8815_v51 = vld [vmem:[%s12348_s4 + $0x320] ss:$8 sps:$4 sm:$0xff]   ;;  %v8826_v58 = vld [vmem:[%s12348_s4 + $0x4] ss:$8 sps:$4 sm:$0xff]   ;;  %v8820_v42 = vld [vmem:[%s12348_s4 + $0x334] ss:$8 sps:$4 sm:$0xff]  }
 0x582   : > { %v4346_v8 = vpack.c.bf16 %v4341_v54, %v4340_v26  ;;  %v4456_v21 = vsel %vm9717_vm2, 0, %v4430_v50  ;;  %v8832_v39 = vld [vmem:[%s12348_s4 + $0x14] ss:$8 sps:$4 sm:$0xff]   ;;  %6656 = vmatprep.subr.bf16.mxu1 %v8826_v58  ;;  %v8830_v31 = vld [vmem:[%s12348_s4 + $0x10] ss:$8 sps:$4 sm:$0xff]  }
 0x583   : > { %v4448_v13 = vshrl.u32 %v4347_v46, 16  ;;  %4474 = vrot.lane.b32.xlu1 %v4456_v21, %s9332_s19  ;;  %v4451_v45 = vshll.u32 %v4347_v46, 16  ;;  %v8818_v11 = vld [vmem:[%s12348_s4 + $0x330] ss:$8 sps:$4 sm:$0xff]   ;;  %v8838_v38 = vld [vmem:[%s12348_s4 + $0x24] ss:$8 sps:$4 sm:$0xff]  }
 0x584   : > { %v4441_v59 = vshrl.u32 %v4346_v8, 16  ;;  %4490 = vrot.lane.b32.xlu0 %v4346_v8, %s9332_s19  ;;  %v4444_v43 = vshll.u32 %v4346_v8, 16  ;;  %6782 = vmatpush1.bf16.msra.mxu0 %v8812_v62  ;;  %v8823_v34 = vld [vmem:[%s12348_s4 + $0x344] ss:$8 sps:$4 sm:$0xff]   ;;  %v8836_v30 = vld [vmem:[%s12348_s4 + $0x20] ss:$8 sps:$4 sm:$0xff]  }
 0x585   : > { %v4450_v56 = vrot.slane %v4448_v13, 7  ;;  %6783 = vmatprep.subr.bf16.mxu0 %v8817_v25  ;;  %v8821_v61 = vld [vmem:[%s12348_s4 + $0x340] ss:$8 sps:$4 sm:$0xff]   ;;  %v8844_v57 = vld [vmem:[%s12348_s4 + $0x34] ss:$8 sps:$4 sm:$0xff]  }
 0x586   : > { %v4443_v24 = vrot.slane %v4441_v59, 7  ;;  %v8829_v48 = vld [vmem:[%s12348_s4 + $0x354] ss:$8 sps:$4 sm:$0xff]   ;;  %v8842_v60 = vld [vmem:[%s12348_s4 + $0x30] ss:$8 sps:$4 sm:$0xff]  }
 0x587   : > { %4476 = vrot.lane.b32.xlu1 %v4438_v0, %s9332_s19  ;;  %v4453_v10 = vor.u32 %v4451_v45, %v4450_v56  ;;  %v8827_v26 = vld [vmem:[%s12348_s4 + $0x350] ss:$8 sps:$4 sm:$0xff]   ;;  %v8850_v54 = vld [vmem:[%s12348_s4 + $0x44] ss:$8 sps:$4 sm:$0xff]   ;;  %v8833_v0 = vld [vmem:[%s12348_s4 + $0x360] ss:$8 sps:$4 sm:$0xff]  }
 0x588   : > { %4492 = vrot.lane.b32.xlu0 %v4347_v46, %s9332_s19  ;;  %v4446_v28 = vor.u32 %v4444_v43, %v4443_v24  ;;  %6784 = vmatpush1.bf16.msra.mxu0 %v8815_v51  ;;  %v8835_v50 = vld [vmem:[%s12348_s4 + $0x364] ss:$8 sps:$4 sm:$0xff]   ;;  %v8848_v46 = vld [vmem:[%s12348_s4 + $0x40] ss:$8 sps:$4 sm:$0xff]   ;;  %v8841_v8 = vld [vmem:[%s12348_s4 + $0x374] ss:$8 sps:$4 sm:$0xff]  }
 0x589   : > { %v4454_v33 = vsel %vm1020_vm0, %v4443_v24, %v4453_v10  ;;  %6785 = vmatprep.subr.bf16.mxu0 %v8820_v42  ;;  %v8854_v21 = vld [vmem:[%s12348_s4 + $0x50] ss:$8 sps:$4 sm:$0xff]   ;;  %v8862_v59 = vld [vmem:[%s12348_s4 + $0x64] ss:$8 sps:$4 sm:$0xff]   ;;  %v8860_v45 = vld [vmem:[%s12348_s4 + $0x60] ss:$8 sps:$4 sm:$0xff]  }
 0x58a   : > { %v4457_v23 = vsel %vm9717_vm2, 0, %v4446_v28  ;;  %v8839_v13 = vld [vmem:[%s12348_s4 + $0x370] ss:$8 sps:$4 sm:$0xff]   ;;  %v8847_v56 = vld [vmem:[%s12348_s4 + $0x384] ss:$8 sps:$4 sm:$0xff]  }
 0x58b   : > { %4478 = vrot.lane.b32.xlu1 %v4457_v23, %s9332_s19  ;;  %v8845_v24 = vld [vmem:[%s12348_s4 + $0x380] ss:$8 sps:$4 sm:$0xff]   ;;  %v8868_v43 = vld [vmem:[%s12348_s4 + $0x74] ss:$8 sps:$4 sm:$0xff]   ;;  %v8866_v28 = vld [vmem:[%s12348_s4 + $0x70] ss:$8 sps:$4 sm:$0xff]  }
 0x58c   : > { %6786 = vmatpush1.bf16.msra.mxu0 %v8818_v11  ;;  %v8853_v10 = vld [vmem:[%s12348_s4 + $0x394] ss:$8 sps:$4 sm:$0xff]   ;;  %v8874_v23 = vld [vmem:[%s12348_s4 + $0x84] ss:$8 sps:$4 sm:$0xff]   ;;  %v8869_v27 = vld [vmem:[%s12348_s4 + $0x3c0] ss:$8 sps:$4 sm:$0xff]  }
 0x58d   : > { %6787 = vmatprep.subr.bf16.mxu0 %v8823_v34  ;;  %v8877_v58 = vld [vmem:[%s12348_s4 + $0x3d4] ss:$8 sps:$4 sm:$0xff]   ;;  %v8875_v11 = vld [vmem:[%s12348_s4 + $0x3d0] ss:$8 sps:$4 sm:$0xff]  }
 0x58f   : > { %4480 = vrot.lane.b32.xlu1 %v4454_v33, %s9332_s19  ;;  %v8851_v33 = vld [vmem:[%s12348_s4 + $0x390] ss:$8 sps:$4 sm:$0xff]  }
 0x590   : > { %6788 = vmatpush1.bf16.msra.mxu0 %v8821_v61 }
 0x591   : > { %6789 = vmatprep.subr.bf16.mxu0 %v8829_v48 }
 0x594   : > { %6790 = vmatpush1.bf16.msra.mxu0 %v8827_v26 }
 0x595   : > { %6791 = vmatprep.subr.bf16.mxu0 %v8835_v50 }
 0x598   : > { %6792 = vmatpush1.bf16.msra.mxu0 %v8833_v0 }
 0x599   : > { %6793 = vmatprep.subr.bf16.mxu0 %v8841_v8 }
 0x59c   : > { %6794 = vmatpush1.bf16.msra.mxu0 %v8839_v13  ;;  %v8884_v13 = vld [vmem:[%s12348_s4 + $0xa0] ss:$8 sps:$4 sm:$0xff]  }
 0x59d   : > { %6795 = vmatprep.subr.bf16.mxu0 %v8847_v56  ;;  %v8887_v56 = vld [vmem:[%s12348_s4 + $0x3f0] ss:$8 sps:$4 sm:$0xff]  }
 0x5a0   : > { %6796 = vmatpush1.bf16.msra.mxu0 %v8845_v24 }
 0x5a1   : > { %6797 = vmatprep.subr.bf16.mxu0 %v8853_v10 }
 0x5a4   : > { %6798 = vmatpush1.bf16.msra.mxu0 %v8851_v33 }
 0x5ee   : > { %v4487_v17 = vpop.permute.xlu0 %4486 }
 0x5ef   : > { %v4511_v1 = vsel %vm1283_vm9, %v11146_v22, %v4487_v17  ;;  %v8859_v17 = vld [vmem:[%s12348_s4 + $0x3a4] ss:$8 sps:$4 sm:$0xff]  }
 0x5f0   : > { %4690 = vmatprep.mubr.bf16.mxu1 %v4511_v1  ;;  %6799 = vmatprep.subr.bf16.mxu0 %v8859_v17  ;;  %v8890_v17 = vld [vmem:[%s12348_s4 + $0xb0] ss:$8 sps:$4 sm:$0xff]  }
 0x5f2   : > { %v4489_v52 = vpop.permute.xlu0 %4488 }
 0x5f3   : > { %v4514_v15 = vsel %vm1283_vm9, %v11156_v35, %v4489_v52  ;;  %v11384_v52 = vld [vmem:[%s12347_s3 + $0x3] ss:$0 sm:$0xff] }
 0x5f5   : > { %v4475_v16 = vpop.permute.xlu1 %4474 }
 0x5f6   : > { %v4496_v6 = vsel %vm1283_vm9, %v4422_v47, %v4475_v16  ;;  %v4491_v32 = vpop.permute.xlu0 %4490  ;;  %v8872_v47 = vld [vmem:[%s12348_s4 + $0x80] ss:$8 sps:$4 sm:$0xff]  }
 0x5f7   : > { %4691 = vmatmul.mubr.bf16.vlgmr.msra.gmra.mrb[120].mxu1 %v4496_v6  ;;  %v4517_v22 = vsel %vm1283_vm9, %v11166_v4, %v4491_v32  ;;  %v8857_v6 = vld [vmem:[%s12348_s4 + $0x3a0] ss:$8 sps:$4 sm:$0xff]  }
 0x5f8   : > { %4698 = vmatprep.mubr.bf16.mxu1 %v4514_v15  ;;  %6657 = vmatpush1.bf16.msra.mxu1 %v8824_v29  ;;  %v8880_v15 = vld [vmem:[%s12348_s4 + $0x94] ss:$8 sps:$4 sm:$0xff]  }
 0x5f9   : > { %v4477_v63 = vpop.permute.xlu1 %4476  ;;  %6658 = vmatprep.subr.bf16.mxu1 %v8832_v39  ;;  %6800 = vmatpush1.bf16.msra.mxu0 %v8857_v6 }
 0x5fa   : > { %v4500_v2 = vsel %vm1283_vm9, %v11179_v9, %v4477_v63  ;;  %v4493_v40 = vpop.permute.xlu0 %4492 }
 0x5fb   : > { %v4520_v35 = vsel %vm1283_vm9, %v11203_v44, %v4493_v40 }
 0x5fc   : > { %6659 = vmatpush1.bf16.msra.mxu1 %v8830_v31 }
 0x5fd   : > { %v4479_v3 = vpop.permute.xlu1 %4478  ;;  %6660 = vmatprep.subr.bf16.mxu1 %v8838_v38 }
 0x5fe   : > { %v4504_v37 = vsel %vm1283_vm9, %v4423_v12, %v4479_v3  ;;  %v8878_v12 = vld [vmem:[%s12348_s4 + $0x90] ss:$8 sps:$4 sm:$0xff]  }
 0x5ff   : > { %4699 = vmatmul.mubr.bf16.gmra.mrb[124].mxu1 %v4500_v2  ;;  %v8865_v2 = vld [vmem:[%s12348_s4 + $0x3b4] ss:$8 sps:$4 sm:$0xff]  }
 0x600   : > { %4706 = vmatprep.mubr.bf16.mxu1 %v4517_v22  ;;  %6661 = vmatpush1.bf16.msra.mxu1 %v8836_v30  ;;  %v8883_v30 = vld [vmem:[%s12348_s4 + $0x3e4] ss:$8 sps:$4 sm:$0xff]  }
 0x601   : > { %v4481_v5 = vpop.permute.xlu1 %4480  ;;  %6662 = vmatprep.subr.bf16.mxu1 %v8844_v57  ;;  %6801 = vmatprep.subr.bf16.mxu0 %v8865_v2 }
 0x602   : > { %v4508_v9 = vsel %vm1283_vm9, %v4420_v14, %v4481_v5  ;;  %v8856_v14 = vld [vmem:[%s12348_s4 + $0x54] ss:$8 sps:$4 sm:$0xff]  }
 0x604   : > { %6663 = vmatpush1.bf16.msra.mxu1 %v8842_v60  ;;  %v8881_v60 = vld [vmem:[%s12348_s4 + $0x3e0] ss:$8 sps:$4 sm:$0xff]  }
 0x605   : > { %6664 = vmatprep.subr.bf16.mxu1 %v8850_v54 }
 0x607   : > { %4707 = vmatmul.mubr.bf16.gmra.mrb[128].mxu1 %v4504_v37  ;;  %v8863_v37 = vld [vmem:[%s12348_s4 + $0x3b0] ss:$8 sps:$4 sm:$0xff]  }
 0x608   : > { %4714 = vmatprep.mubr.bf16.mxu1 %v4520_v35  ;;  %6665 = vmatpush1.bf16.msra.mxu1 %v8848_v46 }
 0x609   : > { %6666 = vmatprep.subr.bf16.mxu1 %v8856_v14  ;;  %6802 = vmatpush1.bf16.msra.mxu0 %v8863_v37 }
 0x60c   : > { %6667 = vmatpush1.bf16.msra.mxu1 %v8854_v21 }
 0x60d   : > { %6668 = vmatprep.subr.bf16.mxu1 %v8862_v59  ;;  %v8886_v59 = vld [vmem:[%s12348_s4 + $0xa4] ss:$8 sps:$4 sm:$0xff]  }
 0x60f   : > { %4715 = vmatmul.mubr.bf16.gmra.mrb[132].mxu1 %v4508_v9  ;;  %v8871_v9 = vld [vmem:[%s12348_s4 + $0x3c4] ss:$8 sps:$4 sm:$0xff]  }
 0x610   : > { %6669 = vmatpush1.bf16.msra.mxu1 %v8860_v45  ;;  %6803 = vmatprep.subr.bf16.mxu0 %v8871_v9  ;;  %v8889_v45 = vld [vmem:[%s12348_s4 + $0x3f4] ss:$8 sps:$4 sm:$0xff]  }
 0x611   : > { %6670 = vmatprep.subr.bf16.mxu1 %v8868_v43  ;;  %6804 = vmatpush1.bf16.msra.mxu0 %v8869_v27  ;;  %v8910_v27 = vld [vmem:[%s12348_s4 + $0xe4] ss:$8 sps:$4 sm:$0xff]  }
 0x612   : > { %6805 = vmatprep.subr.bf16.mxu0 %v8877_v58  ;;  %v8914_v58 = vld [vmem:[%s12348_s4 + $0xf0] ss:$8 sps:$4 sm:$0xff]  }
 0x614   : > { %6671 = vmatpush1.bf16.msra.mxu1 %v8866_v28 }
 0x615   : > { %6672 = vmatprep.subr.bf16.mxu1 %v8874_v23  ;;  %6806 = vmatpush1.bf16.msra.mxu0 %v8875_v11 }
 0x616   : > { %6807 = vmatprep.subr.bf16.mxu0 %v8883_v30 }
 0x618   : > { %6673 = vmatpush1.bf16.msra.mxu1 %v8872_v47  ;;  %v8892_v47 = vld [vmem:[%s12348_s4 + $0xb4] ss:$8 sps:$4 sm:$0xff]  }
 0x619   : > { %6674 = vmatprep.subr.bf16.mxu1 %v8880_v15  ;;  %6808 = vmatpush1.bf16.msra.mxu0 %v8881_v60  ;;  %v8895_v15 = vld [vmem:[%s12348_s4 + $0x404] ss:$8 sps:$4 sm:$0xff]  }
 0x61a   : > { %6809 = vmatprep.subr.bf16.mxu0 %v8889_v45 }
 0x61c   : > { %6675 = vmatpush1.bf16.msra.mxu1 %v8878_v12 }
 0x61d   : > { %6676 = vmatprep.subr.bf16.mxu1 %v8886_v59  ;;  %6810 = vmatpush1.bf16.msra.mxu0 %v8887_v56 }
 0x61e   : > { %6820 = vmatprep.subr.bf16.mxu0 %v8895_v15 }
 0x620   : > { %6677 = vmatpush1.bf16.msra.mxu1 %v8884_v13 }
 0x621   : > { %6678 = vmatprep.subr.bf16.mxu1 %v8892_v47 }
 0x624   : > { %6679 = vmatpush1.bf16.msra.mxu1 %v8890_v17 }
 0x642   : > { %v11251_v53 = vpop.f32.mrb[88].mxu0 }
 0x643   : > { %v11253_v4 = vpop.f32.mrb[89].mxu0 }
 0x644   : > { %v11255_v20 = vpop.f32.mrb[90].mxu0 }
 0x645   : > { %v11257_v41 = vpop.f32.mrb[91].mxu0 }
 0x652   : > { %v11259_v18 = vpop.f32.mrb[92].mxu0 }
 0x653   : > { %v11261_v7 = vpop.f32.mrb[93].mxu0 }
 0x654   : > { %v11263_v36 = vpop.f32.mrb[94].mxu0 }
 0x655   : > { %v11265_v44 = vpop.f32.mrb[95].mxu0 }
 0x6ca   : > { %v8299_v1 = vpop.f32.mrb[120].mxu1 }
 0x6cb   : > { %v8300_v16 = vpop.f32.mrb[121].mxu1 }
 0x6cc   : > { %v8301_v63 = vadd.f32 %v8300_v16, %v8299_v1  ;;  %v8302_v32 = vpop.f32.mrb[122].mxu1 }
 0x6cd   : > { %v8303_v22 = vpop.f32.mrb[123].mxu1 }
 0x6ce   : > { %v4693_v3 = vadd.f32 %v8301_v63, %v11384_v52  ;;  %v8304_v40 = vadd.f32 %v8303_v22, %v8302_v32  ;;  %v8898_v22 = vld [vmem:[%s12348_s4 + $0xc4] ss:$8 sps:$4 sm:$0xff]  }
 0x6cf   : > { %6680 = vmatprep.subr.bf16.mxu1 %v8898_v22 }
 0x6d0   : > { %v4758_v35 = vadd.f32 %v11253_v4, %v4693_v3  ;;  %v4696_v5 = vadd.f32 %v8304_v40, %v11384_v52  ;;  %v8896_v3 = vld [vmem:[%s12348_s4 + $0xc0] ss:$8 sps:$4 sm:$0xff]  }
 0x6d1   : > { %6681 = vmatpush1.bf16.msra.mxu1 %v8896_v3  ;;  %v8901_v3 = vld [vmem:[%s12348_s4 + $0x414] ss:$8 sps:$4 sm:$0xff]  }
 0x6d2   : > { %v4761_v19 = vadd.f32 %v11257_v41, %v4696_v5  ;;  %v8305_v55 = vpop.f32.mrb[124].mxu1  ;;  %v4788_v25 = vmax.f32 %v4758_v35, 0.0  ;;  %v8904_v5 = vld [vmem:[%s12348_s4 + $0xd4] ss:$8 sps:$4 sm:$0xff]  }
 0x6d3   : > { %v8306_v62 = vpop.f32.mrb[125].mxu1  ;;  %6682 = vmatprep.subr.bf16.mxu1 %v8904_v5 }
 0x6d4   : > { %v4789_v29 = vmax.f32 %v4761_v19, 0.0  ;;  %v8307_v4 = vadd.f32 %v8306_v62, %v8305_v55  ;;  %v8308_v51 = vpop.f32.mrb[126].mxu1 }
 0x6d5   : > { %v8309_v42 = vpop.f32.mrb[127].mxu1 }
 0x6d6   : > { %v11417_v39 = vpack.c.bf16 %v4789_v29, %v4788_v25  ;;  %v4701_v41 = vadd.f32 %v8307_v4, %v11384_v52  ;;  %v8310_v31 = vadd.f32 %v8309_v42, %v8308_v51  ;;  %v8908_v25 = vld [vmem:[%s12348_s4 + $0xe0] ss:$8 sps:$4 sm:$0xff]   ;;  %v8916_v51 = vld [vmem:[%s12348_s4 + $0xf4] ss:$8 sps:$4 sm:$0xff]  }
 0x6d8   : > { %v4766_v38 = vadd.f32 %v11251_v53, %v4701_v41  ;;  %v4704_v34 = vadd.f32 %v8310_v31, %v11384_v52  ;;  %v8922_v41 = vld [vmem:[%s12348_s4 + $0x104] ss:$8 sps:$4 sm:$0xff]   ;;  %v4830_v17 = vrot.slane %v11417_v39, 7 }
 0x6da   : > { %v4769_v61 = vadd.f32 %v11255_v20, %v4704_v34  ;;  %v8311_v57 = vpop.f32.mrb[128].mxu1  ;;  %v4790_v26 = vmax.f32 %v4766_v38, 0.0 }
 0x6db   : > { %v8312_v48 = vpop.f32.mrb[129].mxu1 }
 0x6dc   : > { %v4791_v54 = vmax.f32 %v4769_v61, 0.0  ;;  %v8313_v50 = vadd.f32 %v8312_v48, %v8311_v57  ;;  %v8314_v53 = vpop.f32.mrb[130].mxu1 }
 0x6dd   : > { %v8315_v46 = vpop.f32.mrb[131].mxu1 }
 0x6de   : > { %v11432_v0 = vpack.c.bf16 %v4791_v54, %v4790_v26  ;;  %v4709_v14 = vadd.f32 %v8313_v50, %v11384_v52  ;;  %v8316_v8 = vadd.f32 %v8315_v46, %v8314_v53 }
 0x6e0   : > { %v4774_v20 = vadd.f32 %v11261_v7, %v4709_v14  ;;  %v4712_v21 = vadd.f32 %v8316_v8, %v11384_v52  ;;  %v4866_v4 = vshrl.u32 %v11432_v0, 16  ;;  %v4871_v5 = vrot.slane %v11432_v0, 1 }
 0x6e2   : > { %v4777_v7 = vadd.f32 %v11265_v44, %v4712_v21  ;;  %v8317_v24 = vpop.f32.mrb[132].mxu1  ;;  %v4792_v10 = vmax.f32 %v4774_v20, 0.0  ;;  %v4872_v42 = vrot.slane %v4866_v4, 1  ;;  %v4876_v30 = vrot.slane %v4866_v4, 2 }
 0x6e3   : > { %v8318_v43 = vpop.f32.mrb[133].mxu1  ;;  %v4880_v61 = vrot.slane %v4866_v4, 3  ;;  %v4884_v53 = vrot.slane %v4866_v4, 4  ;;  %v4888_v46 = vrot.slane %v4866_v4, 5  ;;  %v4892_v56 = vrot.slane %v4866_v4, 6 }
 0x6e4   : > { %v4793_v28 = vmax.f32 %v4777_v7, 0.0  ;;  %v8319_v33 = vadd.f32 %v8318_v43, %v8317_v24  ;;  %v8320_v23 = vpop.f32.mrb[134].mxu1  ;;  %v4896_v45 = vrot.slane %v4866_v4, 7 }
 0x6e5   : > { %v8321_v1 = vpop.f32.mrb[135].mxu1 }
 0x6e6   : > { %v11456_v44 = vpack.c.bf16 %v4793_v28, %v4792_v10  ;;  %v4717_v16 = vadd.f32 %v8319_v33, %v11384_v52  ;;  %v8322_v6 = vadd.f32 %v8321_v1, %v8320_v23  ;;  %v4826_v23 = vrot.slane %v11417_v39, 6 }
 0x6e8   : > { %v4782_v63 = vadd.f32 %v11259_v18, %v4717_v16  ;;  %v4720_v32 = vadd.f32 %v8322_v6, %v11384_v52  ;;  %v11465_v2 = vshrl.u32 %v11456_v44, 16  ;;  %v11477_v52 = vshrl.u32 %v11417_v39, 16 }
 0x6e9   : > { %v4956_v7 = vrot.slane %v11456_v44, 6  ;;  %v4960_v24 = vrot.slane %v11456_v44, 7 }
 0x6ea   : > { %v4785_v40 = vadd.f32 %v11263_v36, %v4720_v32  ;;  %v4961_v12 = vrot.slane %v11465_v2, 7  ;;  %v4957_v18 = vrot.slane %v11465_v2, 6  ;;  %v4794_v37 = vmax.f32 %v4782_v63, 0.0  ;;  %v8902_v36 = vld [vmem:[%s12348_s4 + $0xd0] ss:$8 sps:$4 sm:$0xff]  }
 0x6eb   : > { %v4831_v19 = vrot.slane %v11477_v52, 7  ;;  %v4827_v55 = vrot.slane %v11477_v52, 6  ;;  %6683 = vmatpush1.bf16.msra.mxu1 %v8902_v36  ;;  %v4937_v31 = vrot.slane %v11465_v2, 1  ;;  %v4807_v38 = vrot.slane %v11477_v52, 1  ;;  %v8893_v32 = vld [vmem:[%s12348_s4 + $0x400] ss:$8 sps:$4 sm:$0xff]  }
 0x6ec   : > { %v4795_v35 = vmax.f32 %v4785_v40, 0.0  ;;  %4962 = vrot.lane.b32.xlu0 %v4961_v12, %s9332_s19  ;;  %4958 = vrot.lane.b32.xlu1 %v4957_v18, %s9332_s19  ;;  %v4941_v57 = vrot.slane %v11465_v2, 2  ;;  %v4945_v48 = vrot.slane %v11465_v2, 3  ;;  %v4815_v26 = vrot.slane %v11477_v52, 3 }
 0x6ed   : > { %6684 = vmatprep.subr.bf16.mxu1 %v8910_v27  ;;  %v4811_v50 = vrot.slane %v11477_v52, 2  ;;  %v4949_v14 = vrot.slane %v11465_v2, 4  ;;  %v4953_v8 = vrot.slane %v11465_v2, 5  ;;  %v4823_v21 = vrot.slane %v11477_v52, 5  ;;  %v8905_v27 = vld [vmem:[%s12348_s4 + $0x420] ss:$8 sps:$4 sm:$0xff]  }
 0x6ee   : > { %v11487_v9 = vpack.c.bf16 %v4795_v35, %v4794_v37  ;;  %v4819_v59 = vrot.slane %v11477_v52, 4  ;;  %v8899_v37 = vld [vmem:[%s12348_s4 + $0x410] ss:$8 sps:$4 sm:$0xff]   ;;  %v8907_v35 = vld [vmem:[%s12348_s4 + $0x424] ss:$8 sps:$4 sm:$0xff]  }
 0x6ef   : > { %6685 = vmatpush1.bf16.msra.mxu1 %v8908_v25 }
 0x6f0   : > { %4832 = vrot.lane.b32.xlu0 %v4831_v19, %s9332_s19  ;;  %4828 = vrot.lane.b32.xlu1 %v4827_v55, %s9332_s19  ;;  %v4988_v62 = vshrl.u32 %v11487_v9, 16  ;;  %v4993_v40 = vrot.slane %v11487_v9, 1 }
 0x6f1   : > { %6686 = vmatprep.subr.bf16.mxu1 %v8916_v51 }
 0x6f2   : > { %v4994_v29 = vrot.slane %v4988_v62, 1  ;;  %v5002_v11 = vrot.slane %v4988_v62, 3  ;;  %v4998_v34 = vrot.slane %v4988_v62, 2  ;;  %v5010_v60 = vrot.slane %v4988_v62, 5 }
 0x6f3   : > { %6687 = vmatpush1.bf16.msra.mxu1 %v8914_v58  ;;  %v5006_v54 = vrot.slane %v4988_v62, 4  ;;  %v5018_v20 = vrot.slane %v4988_v62, 7  ;;  %v5014_v13 = vrot.slane %v4988_v62, 6 }
 0x6f4   : > { %4990 = vrot.lane.b32.xlu1 %v4988_v62, %s9332_s19  ;;  %4995 = vrot.lane.b32.xlu0 %v4994_v29, %s9332_s19  ;;  %v8913_v29 = vld [vmem:[%s12348_s4 + $0x434] ss:$8 sps:$4 sm:$0xff]  }
 0x6f5   : > { %6697 = vmatprep.subr.bf16.mxu1 %v8922_v41 }
 0x6f8   : > { %4868 = vrot.lane.b32.xlu1 %v4866_v4, %s9332_s19  ;;  %4873 = vrot.lane.b32.xlu0 %v4872_v42, %s9332_s19  ;;  %v4936_v4 = vrot.slane %v11456_v44, 1  ;;  %v8911_v42 = vld [vmem:[%s12348_s4 + $0x430] ss:$8 sps:$4 sm:$0xff]  }
 0x6fc   : > { %4933 = vrot.lane.b32.xlu1 %v11465_v2, %s9332_s19  ;;  %4938 = vrot.lane.b32.xlu0 %v4937_v31, %s9332_s19  ;;  %v8919_v31 = vld [vmem:[%s12348_s4 + $0x444] ss:$8 sps:$4 sm:$0xff]  }
 0x700   : > { %5003 = vrot.lane.b32.xlu1 %v5002_v11, %s9332_s19  ;;  %4808 = vrot.lane.b32.xlu0 %v4807_v38, %s9332_s19  ;;  %v4806_v11 = vrot.slane %v11417_v39, 1 }
 0x704   : > { %4999 = vrot.lane.b32.xlu1 %v4998_v34, %s9332_s19  ;;  %4803 = vrot.lane.b32.xlu0 %v11477_v52, %s9332_s19 }
 0x708   : > { %4877 = vrot.lane.b32.xlu1 %v4876_v30, %s9332_s19  ;;  %4881 = vrot.lane.b32.xlu0 %v4880_v61, %s9332_s19 }
 0x70c   : > { %4942 = vrot.lane.b32.xlu1 %v4941_v57, %s9332_s19  ;;  %4946 = vrot.lane.b32.xlu0 %v4945_v48, %s9332_s19  ;;  %v8917_v57 = vld [vmem:[%s12348_s4 + $0x440] ss:$8 sps:$4 sm:$0xff]  }
 0x710   : > { %5011 = vrot.lane.b32.xlu1 %v5010_v60, %s9332_s19  ;;  %4816 = vrot.lane.b32.xlu0 %v4815_v26, %s9332_s19  ;;  %v8925_v60 = vld [vmem:[%s12348_s4 + $0x454] ss:$8 sps:$4 sm:$0xff]  }
 0x714   : > { %5007 = vrot.lane.b32.xlu1 %v5006_v54, %s9332_s19  ;;  %4812 = vrot.lane.b32.xlu0 %v4811_v50, %s9332_s19  ;;  %v8920_v50 = vld [vmem:[%s12348_s4 + $0x100] ss:$8 sps:$4 sm:$0xff]  }
 0x718   : > { %4885 = vrot.lane.b32.xlu1 %v4884_v53, %s9332_s19  ;;  %4889 = vrot.lane.b32.xlu0 %v4888_v46, %s9332_s19  ;;  %v8923_v46 = vld [vmem:[%s12348_s4 + $0x450] ss:$8 sps:$4 sm:$0xff]  }
 0x71c   : > { %4950 = vrot.lane.b32.xlu1 %v4949_v14, %s9332_s19  ;;  %4954 = vrot.lane.b32.xlu0 %v4953_v8, %s9332_s19  ;;  %v8928_v14 = vld [vmem:[%s12348_s4 + $0x114] ss:$8 sps:$4 sm:$0xff]  }
 0x720   : > { %5019 = vrot.lane.b32.xlu1 %v5018_v20, %s9332_s19  ;;  %4824 = vrot.lane.b32.xlu0 %v4823_v21, %s9332_s19  ;;  %v8931_v20 = vld [vmem:[%s12348_s4 + $0x464] ss:$8 sps:$4 sm:$0xff]  }
 0x724   : > { %5015 = vrot.lane.b32.xlu1 %v5014_v13, %s9332_s19  ;;  %4820 = vrot.lane.b32.xlu0 %v4819_v59, %s9332_s19  ;;  %v8926_v13 = vld [vmem:[%s12348_s4 + $0x110] ss:$8 sps:$4 sm:$0xff]   ;;  %v8929_v59 = vld [vmem:[%s12348_s4 + $0x460] ss:$8 sps:$4 sm:$0xff]  }
 0x728   : > { %4893 = vrot.lane.b32.xlu1 %v4892_v56, %s9332_s19  ;;  %4897 = vrot.lane.b32.xlu0 %v4896_v45, %s9332_s19  ;;  %v8934_v56 = vld [vmem:[%s12348_s4 + $0x124] ss:$8 sps:$4 sm:$0xff]   ;;  %v8937_v45 = vld [vmem:[%s12348_s4 + $0x474] ss:$8 sps:$4 sm:$0xff]  }
 0x75e   : > { %v4959_v43 = vpop.permute.xlu1 %4958  ;;  %v4963_v10 = vpop.permute.xlu0 %4962 }
 0x75f   : > { %v4983_v28 = vsel %vm1283_vm9, %v4956_v7, %v4959_v43  ;;  %v4986_v33 = vsel %vm1283_vm9, %v4960_v24, %v4963_v10  ;;  %v4944_v7 = vrot.slane %v11456_v44, 3  ;;  %v8932_v43 = vld [vmem:[%s12348_s4 + $0x120] ss:$8 sps:$4 sm:$0xff]  }
 0x760   : > { %v5056_v1 = vshll.u32 %v4983_v28, 16  ;;  %v5058_v47 = vshll.u32 %v4986_v33, 16  ;;  %v8935_v28 = vld [vmem:[%s12348_s4 + $0x470] ss:$8 sps:$4 sm:$0xff]   ;;  %v8940_v33 = vld [vmem:[%s12348_s4 + $0x134] ss:$8 sps:$4 sm:$0xff]  }
 0x762   : > { %v4829_v16 = vpop.permute.xlu1 %4828  ;;  %v4833_v6 = vpop.permute.xlu0 %4832 }
 0x763   : > { %v4859_v15 = vsel %vm1283_vm9, %v4826_v23, %v4829_v16  ;;  %v4863_v63 = vsel %vm1283_vm9, %v4830_v17, %v4833_v6  ;;  %v8943_v23 = vld [vmem:[%s12348_s4 + $0x484] ss:$8 sps:$4 sm:$0xff]   ;;  %v4814_v17 = vrot.slane %v11417_v39, 3  ;;  %v8938_v16 = vld [vmem:[%s12348_s4 + $0x130] ss:$8 sps:$4 sm:$0xff]  }
 0x764   : > { %v5098_v2 = vsel %vm9717_vm2, %v4859_v15, %v5056_v1  ;;  %v5099_v22 = vsel %vm9717_vm2, %v4863_v63, %v5058_v47  ;;  %v8941_v15 = vld [vmem:[%s12348_s4 + $0x480] ss:$8 sps:$4 sm:$0xff]   ;;  %v8946_v63 = vld [vmem:[%s12348_s4 + $0x144] ss:$8 sps:$4 sm:$0xff]  }
 0x765   : > { %6811 = vmatprep.mubr.bf16.mxu0 %v5099_v22  ;;  %v8944_v22 = vld [vmem:[%s12348_s4 + $0x140] ss:$8 sps:$4 sm:$0xff]  }
 0x766   : > { %v11569_v12 = vpop.permute.xlu1 %4990  ;;  %6812 = vmatmul.mubr.bf16.vlgmr.msra.gmra.mrb[96].mxu0 %v5098_v2  ;;  %v4996_v18 = vpop.permute.xlu0 %4995  ;;  %v8949_v2 = vld [vmem:[%s12348_s4 + $0x494] ss:$8 sps:$4 sm:$0xff]  }
 0x767   : > { %6821 = vmatpush1.bf16.msra.mxu0 %v8893_v32  ;;  %v5025_v52 = vsel %vm1283_vm9, %v4993_v40, %v4996_v18  ;;  %v8952_v40 = vld [vmem:[%s12348_s4 + $0x154] ss:$8 sps:$4 sm:$0xff]   ;;  %v8955_v18 = vld [vmem:[%s12348_s4 + $0x4a4] ss:$8 sps:$4 sm:$0xff]  }
 0x768   : > { %6822 = vmatprep.subr.bf16.mxu0 %v8901_v3  ;;  %v5062_v36 = vshll.u32 %v5025_v52, 16  ;;  %v8947_v3 = vld [vmem:[%s12348_s4 + $0x490] ss:$8 sps:$4 sm:$0xff]  }
 0x769   : > { %v8950_v52 = vld [vmem:[%s12348_s4 + $0x150] ss:$8 sps:$4 sm:$0xff]  }
 0x76a   : > { %v11579_v19 = vpop.permute.xlu1 %4868  ;;  %v4874_v55 = vpop.permute.xlu0 %4873 }
 0x76b   : > { %6823 = vmatpush1.bf16.msra.mxu0 %v8899_v37  ;;  %v4904_v62 = vsel %vm1283_vm9, %v4871_v5, %v4874_v55  ;;  %v8953_v37 = vld [vmem:[%s12348_s4 + $0x4a0] ss:$8 sps:$4 sm:$0xff]   ;;  %v8961_v5 = vld [vmem:[%s12348_s4 + $0x4b4] ss:$8 sps:$4 sm:$0xff]   ;;  %v8959_v55 = vld [vmem:[%s12348_s4 + $0x4b0] ss:$8 sps:$4 sm:$0xff]  }
 0x76c   : > { %6824 = vmatprep.subr.bf16.mxu0 %v8907_v35  ;;  %v5101_v25 = vsel %vm9717_vm2, %v4904_v62, %v5062_v36  ;;  %v8958_v35 = vld [vmem:[%s12348_s4 + $0x164] ss:$8 sps:$4 sm:$0xff]   ;;  %v8956_v36 = vld [vmem:[%s12348_s4 + $0x160] ss:$8 sps:$4 sm:$0xff]   ;;  %v8964_v62 = vld [vmem:[%s12348_s4 + $0x174] ss:$8 sps:$4 sm:$0xff]  }
 0x76d   : > { %6852 = vmatprep.mubr.bf16.mxu0 %v5101_v25  ;;  %v8962_v25 = vld [vmem:[%s12348_s4 + $0x170] ss:$8 sps:$4 sm:$0xff]  }
 0x76e   : > { %v4939_v51 = vpop.permute.xlu0 %4938  ;;  %v4934_v41 = vpop.permute.xlu1 %4933 }
 0x76f   : > { %6825 = vmatpush1.bf16.msra.mxu0 %v8905_v27  ;;  %v4968_v58 = vsel %vm1283_vm9, %v4936_v4, %v4939_v51  ;;  %v4965_v30 = vsel %vm1283_vm9, %v11456_v44, %v4934_v41  ;;  %v8967_v27 = vld [vmem:[%s12348_s4 + $0x4c4] ss:$8 sps:$4 sm:$0xff]   ;;  %v8973_v51 = vld [vmem:[%s12348_s4 + $0x4d4] ss:$8 sps:$4 sm:$0xff]  }
 0x770   : > { %6826 = vmatprep.subr.bf16.mxu0 %v8913_v29  ;;  %v5046_v38 = vshll.u32 %v4968_v58, 16  ;;  %v5044_v26 = vshll.u32 %v4965_v30, 16  ;;  %v8965_v29 = vld [vmem:[%s12348_s4 + $0x4c0] ss:$8 sps:$4 sm:$0xff]   ;;  %v8970_v4 = vld [vmem:[%s12348_s4 + $0x184] ss:$8 sps:$4 sm:$0xff]  }
 0x771   : > { %v8968_v58 = vld [vmem:[%s12348_s4 + $0x180] ss:$8 sps:$4 sm:$0xff]   ;;  %v8976_v41 = vld [vmem:[%s12348_s4 + $0x194] ss:$8 sps:$4 sm:$0xff]  }
 0x772   : > { %v4809_v34 = vpop.permute.xlu0 %4808  ;;  %v8985_v30 = vld [vmem:[%s12348_s4 + $0x4f4] ss:$8 sps:$4 sm:$0xff]  }
 0x773   : > { %6827 = vmatpush1.bf16.msra.mxu0 %v8911_v42  ;;  %v4839_v61 = vsel %vm1283_vm9, %v4806_v11, %v4809_v34  ;;  %v8971_v42 = vld [vmem:[%s12348_s4 + $0x4d0] ss:$8 sps:$4 sm:$0xff]   ;;  %v8982_v34 = vld [vmem:[%s12348_s4 + $0x1a4] ss:$8 sps:$4 sm:$0xff]  }
 0x774   : > { %v5093_v48 = vsel %vm9717_vm2, %v4839_v61, %v5046_v38  ;;  %6828 = vmatprep.subr.bf16.mxu0 %v8919_v31  ;;  %v8979_v31 = vld [vmem:[%s12348_s4 + $0x4e4] ss:$8 sps:$4 sm:$0xff]   ;;  %v8974_v11 = vld [vmem:[%s12348_s4 + $0x190] ss:$8 sps:$4 sm:$0xff]   ;;  %v8977_v38 = vld [vmem:[%s12348_s4 + $0x4e0] ss:$8 sps:$4 sm:$0xff]   ;;  %v5004_v61 = vpop.permute.xlu1 %5003 }
 0x775   : > { %6688 = vmatprep.mubr.bf16.mxu1 %v5093_v48  ;;  %v5001_v48 = vrot.slane %v11487_v9, 3 }
 0x776   : > { %v4804_v54 = vpop.permute.xlu0 %4803 }
 0x777   : > { %6829 = vmatpush1.bf16.msra.mxu0 %v8917_v57  ;;  %v4835_v53 = vsel %vm1283_vm9, %v11417_v39, %v4804_v54  ;;  %v8980_v57 = vld [vmem:[%s12348_s4 + $0x1a0] ss:$8 sps:$4 sm:$0xff]   ;;  %v5022_v54 = vsel %vm1283_vm9, %v11487_v9, %v11569_v12 }
 0x778   : > { %v5092_v8 = vsel %vm9717_vm2, %v4835_v53, %v5044_v26  ;;  %6830 = vmatprep.subr.bf16.mxu0 %v8925_v60  ;;  %v8983_v60 = vld [vmem:[%s12348_s4 + $0x4f0] ss:$8 sps:$4 sm:$0xff]   ;;  %v8988_v26 = vld [vmem:[%s12348_s4 + $0x1b4] ss:$8 sps:$4 sm:$0xff]   ;;  %v5031_v53 = vsel %vm1283_vm9, %v5001_v48, %v5004_v61  ;;  %v5060_v12 = vshll.u32 %v5022_v54, 16 }
 0x779   : > { %6689 = vmatmul.mubr.bf16.vlgmr.msra.gmra.mrb[136].mxu1 %v5092_v8  ;;  %v4900_v8 = vsel %vm1283_vm9, %v11432_v0, %v11579_v19  ;;  %v8994_v19 = vld [vmem:[%s12348_s4 + $0x1c4] ss:$8 sps:$4 sm:$0xff]   ;;  %v9025_v61 = vld [vmem:[%s12348_s4 + $0x560] ss:$8 sps:$4 sm:$0xff]   ;;  %v9033_v48 = vld [vmem:[%s12348_s4 + $0x574] ss:$8 sps:$4 sm:$0xff]  }
 0x77a   : > { %6698 = vmatpush1.bf16.msra.mxu1 %v8920_v50  ;;  %v11626_v21 = vpop.permute.xlu0 %4881  ;;  %v8991_v50 = vld [vmem:[%s12348_s4 + $0x504] ss:$8 sps:$4 sm:$0xff]   ;;  %v9036_v54 = vld [vmem:[%s12348_s4 + $0x234] ss:$8 sps:$4 sm:$0xff]  }
 0x77b   : > { %6831 = vmatpush1.bf16.msra.mxu0 %v8923_v46  ;;  %6699 = vmatprep.subr.bf16.mxu1 %v8928_v14  ;;  %v4879_v46 = vrot.slane %v11432_v0, 3 }
 0x77c   : > { %6832 = vmatprep.subr.bf16.mxu0 %v8931_v20  ;;  %v8986_v20 = vld [vmem:[%s12348_s4 + $0x1b0] ss:$8 sps:$4 sm:$0xff]  }
 0x77e   : > { %6700 = vmatpush1.bf16.msra.mxu1 %v8926_v13  ;;  %v4947_v24 = vpop.permute.xlu0 %4946  ;;  %v4912_v13 = vsel %vm1283_vm9, %v4879_v46, %v11626_v21  ;;  %v5100_v21 = vsel %vm9717_vm2, %v4900_v8, %v5060_v12  ;;  %v9037_v46 = vld [vmem:[%s12348_s4 + $0x580] ss:$8 sps:$4 sm:$0xff]   ;;  %v9045_v8 = vld [vmem:[%s12348_s4 + $0x594] ss:$8 sps:$4 sm:$0xff]   ;;  %v9043_v12 = vld [vmem:[%s12348_s4 + $0x590] ss:$8 sps:$4 sm:$0xff]  }
 0x77f   : > { %6833 = vmatpush1.bf16.msra.mxu0 %v8929_v59  ;;  %v4974_v10 = vsel %vm1283_vm9, %v4944_v7, %v4947_v24  ;;  %6701 = vmatprep.subr.bf16.mxu1 %v8934_v56  ;;  %v8989_v59 = vld [vmem:[%s12348_s4 + $0x500] ss:$8 sps:$4 sm:$0xff]   ;;  %v5066_v56 = vshll.u32 %v5031_v53, 16  ;;  %v8997_v7 = vld [vmem:[%s12348_s4 + $0x514] ss:$8 sps:$4 sm:$0xff]  }
 0x780   : > { %6834 = vmatprep.subr.bf16.mxu0 %v8937_v45  ;;  %v5050_v1 = vshll.u32 %v4974_v10, 16  ;;  %v11771_v45 = vpop.permute.xlu1 %4999  ;;  %v9034_v53 = vld [vmem:[%s12348_s4 + $0x230] ss:$8 sps:$4 sm:$0xff]  }
 0x781   : > { %v5103_v24 = vsel %vm9717_vm2, %v4912_v13, %v5066_v56  ;;  %v9048_v13 = vld [vmem:[%s12348_s4 + $0x254] ss:$8 sps:$4 sm:$0xff]   ;;  %v9046_v56 = vld [vmem:[%s12348_s4 + $0x250] ss:$8 sps:$4 sm:$0xff]  }
 0x782   : > { %6702 = vmatpush1.bf16.msra.mxu1 %v8932_v43  ;;  %v4817_v47 = vpop.permute.xlu0 %4816  ;;  %v8992_v43 = vld [vmem:[%s12348_s4 + $0x1c0] ss:$8 sps:$4 sm:$0xff]  }
 0x783   : > { %6835 = vmatpush1.bf16.msra.mxu0 %v8935_v28  ;;  %v4847_v6 = vsel %vm1283_vm9, %v4814_v17, %v4817_v47  ;;  %6703 = vmatprep.subr.bf16.mxu1 %v8940_v33  ;;  %v8995_v28 = vld [vmem:[%s12348_s4 + $0x510] ss:$8 sps:$4 sm:$0xff]   ;;  %v9000_v33 = vld [vmem:[%s12348_s4 + $0x1d4] ss:$8 sps:$4 sm:$0xff]   ;;  %v9001_v47 = vld [vmem:[%s12348_s4 + $0x520] ss:$8 sps:$4 sm:$0xff]  }
 0x784   : > { %v5095_v32 = vsel %vm9717_vm2, %v4847_v6, %v5050_v1  ;;  %6836 = vmatprep.subr.bf16.mxu0 %v8943_v23  ;;  %v9003_v23 = vld [vmem:[%s12348_s4 + $0x524] ss:$8 sps:$4 sm:$0xff]   ;;  %v11797_v17 = vpop.permute.xlu1 %4877  ;;  %v8998_v1 = vld [vmem:[%s12348_s4 + $0x1d0] ss:$8 sps:$4 sm:$0xff]   ;;  %v9009_v6 = vld [vmem:[%s12348_s4 + $0x534] ss:$8 sps:$4 sm:$0xff]  }
 0x785   : > { %6729 = vmatprep.mubr.bf16.mxu1 %v5095_v32  ;;  %v9007_v32 = vld [vmem:[%s12348_s4 + $0x530] ss:$8 sps:$4 sm:$0xff]  }
 0x786   : > { %6704 = vmatpush1.bf16.msra.mxu1 %v8938_v16  ;;  %v4813_v14 = vpop.permute.xlu0 %4812  ;;  %v9006_v16 = vld [vmem:[%s12348_s4 + $0x1e4] ss:$8 sps:$4 sm:$0xff]  }
 0x787   : > { %6837 = vmatpush1.bf16.msra.mxu0 %v8941_v15  ;;  %6705 = vmatprep.subr.bf16.mxu1 %v8946_v63  ;;  %v9004_v63 = vld [vmem:[%s12348_s4 + $0x1e0] ss:$8 sps:$4 sm:$0xff]  }
 0x788   : > { %6838 = vmatprep.subr.bf16.mxu0 %v8949_v2  ;;  %v9012_v2 = vld [vmem:[%s12348_s4 + $0x1f4] ss:$8 sps:$4 sm:$0xff]  }
 0x78a   : > { %6706 = vmatpush1.bf16.msra.mxu1 %v8944_v22  ;;  %v11786_v10 = vpop.permute.xlu0 %4889  ;;  %v4943_v22 = vpop.permute.xlu1 %4942 }
 0x78b   : > { %6839 = vmatpush1.bf16.msra.mxu0 %v8947_v3  ;;  %6707 = vmatprep.subr.bf16.mxu1 %v8952_v40  ;;  %v9015_v3 = vld [vmem:[%s12348_s4 + $0x544] ss:$8 sps:$4 sm:$0xff]   ;;  %v4940_v40 = vrot.slane %v11456_v44, 2 }
 0x78c   : > { %6840 = vmatprep.subr.bf16.mxu0 %v8955_v18  ;;  %v4952_v18 = vrot.slane %v11456_v44, 5 }
 0x78e   : > { %6708 = vmatpush1.bf16.msra.mxu1 %v8950_v52  ;;  %v4955_v15 = vpop.permute.xlu0 %4954  ;;  %v9010_v52 = vld [vmem:[%s12348_s4 + $0x1f0] ss:$8 sps:$4 sm:$0xff]  }
 0x78f   : > { %6841 = vmatpush1.bf16.msra.mxu0 %v8953_v37  ;;  %6709 = vmatprep.subr.bf16.mxu1 %v8958_v35  ;;  %v4971_v37 = vsel %vm1283_vm9, %v4940_v40, %v4943_v22  ;;  %v4810_v35 = vrot.slane %v11417_v39, 2  ;;  %v9073_v22 = vld [vmem:[%s12348_s4 + $0x5e0] ss:$8 sps:$4 sm:$0xff]   ;;  %v9081_v40 = vld [vmem:[%s12348_s4 + $0x5f4] ss:$8 sps:$4 sm:$0xff]  }
 0x790   : > { %6842 = vmatprep.subr.bf16.mxu0 %v8961_v5 }
 0x792   : > { %6710 = vmatpush1.bf16.msra.mxu1 %v8956_v36  ;;  %v4825_v5 = vpop.permute.xlu0 %4824  ;;  %v9013_v36 = vld [vmem:[%s12348_s4 + $0x540] ss:$8 sps:$4 sm:$0xff]  }
 0x793   : > { %6843 = vmatpush1.bf16.msra.mxu0 %v8959_v55  ;;  %6711 = vmatprep.subr.bf16.mxu1 %v8964_v62  ;;  %v9018_v55 = vld [vmem:[%s12348_s4 + $0x204] ss:$8 sps:$4 sm:$0xff]   ;;  %v4980_v62 = vsel %vm1283_vm9, %v4952_v18, %v4955_v15  ;;  %v9067_v15 = vld [vmem:[%s12348_s4 + $0x5d0] ss:$8 sps:$4 sm:$0xff]   ;;  %v4997_v18 = vrot.slane %v11487_v9, 2 }
 0x794   : > { %6844 = vmatprep.subr.bf16.mxu0 %v8967_v27  ;;  %v4822_v27 = vrot.slane %v11417_v39, 5 }
 0x796   : > { %6712 = vmatpush1.bf16.msra.mxu1 %v8962_v25  ;;  %v9021_v25 = vld [vmem:[%s12348_s4 + $0x554] ss:$8 sps:$4 sm:$0xff]  }
 0x797   : > { %6845 = vmatpush1.bf16.msra.mxu0 %v8965_v29  ;;  %6713 = vmatprep.subr.bf16.mxu1 %v8970_v4  ;;  %v4843_v29 = vsel %vm1283_vm9, %v4810_v35, %v4813_v14  ;;  %v5048_v4 = vshll.u32 %v4971_v37, 16  ;;  %v9042_v14 = vld [vmem:[%s12348_s4 + $0x244] ss:$8 sps:$4 sm:$0xff]   ;;  %v9076_v37 = vld [vmem:[%s12348_s4 + $0x2a0] ss:$8 sps:$4 sm:$0xff]   ;;  %v5009_v35 = vrot.slane %v11487_v9, 5 }
 0x798   : > { %6846 = vmatprep.subr.bf16.mxu0 %v8973_v51  ;;  %v4855_v51 = vsel %vm1283_vm9, %v4822_v27, %v4825_v5  ;;  %v9079_v5 = vld [vmem:[%s12348_s4 + $0x5f0] ss:$8 sps:$4 sm:$0xff]   ;;  %v9087_v27 = vld [vmem:[%s12348_s4 + $0x604] ss:$8 sps:$4 sm:$0xff]  }
 0x79a   : > { %6714 = vmatpush1.bf16.msra.mxu1 %v8968_v58  ;;  %v9016_v58 = vld [vmem:[%s12348_s4 + $0x200] ss:$8 sps:$4 sm:$0xff]  }
 0x79b   : > { %6847 = vmatpush1.bf16.msra.mxu0 %v8971_v42  ;;  %6715 = vmatprep.subr.bf16.mxu1 %v8976_v41  ;;  %v5054_v42 = vshll.u32 %v4980_v62, 16  ;;  %v9019_v41 = vld [vmem:[%s12348_s4 + $0x550] ss:$8 sps:$4 sm:$0xff]   ;;  %v4875_v62 = vrot.slane %v11432_v0, 2 }
 0x79c   : > { %6848 = vmatprep.subr.bf16.mxu0 %v8979_v31  ;;  %v9024_v31 = vld [vmem:[%s12348_s4 + $0x214] ss:$8 sps:$4 sm:$0xff]  }
 0x79e   : > { %6716 = vmatpush1.bf16.msra.mxu1 %v8974_v11  ;;  %v5094_v11 = vsel %vm9717_vm2, %v4843_v29, %v5048_v4  ;;  %v4887_v29 = vrot.slane %v11432_v0, 5  ;;  %v4908_v4 = vsel %vm1283_vm9, %v4875_v62, %v11797_v17  ;;  %v9090_v17 = vld [vmem:[%s12348_s4 + $0x2c4] ss:$8 sps:$4 sm:$0xff]   ;;  %v5017_v62 = vrot.slane %v11487_v9, 7 }
 0x79f   : > { %6849 = vmatpush1.bf16.msra.mxu0 %v8977_v38  ;;  %6717 = vmatprep.subr.bf16.mxu1 %v8982_v34  ;;  %v9027_v38 = vld [vmem:[%s12348_s4 + $0x564] ss:$8 sps:$4 sm:$0xff]   ;;  %v5097_v34 = vsel %vm9717_vm2, %v4855_v51, %v5054_v42  ;;  %v9082_v51 = vld [vmem:[%s12348_s4 + $0x2b0] ss:$8 sps:$4 sm:$0xff]   ;;  %v9085_v42 = vld [vmem:[%s12348_s4 + $0x600] ss:$8 sps:$4 sm:$0xff]  }
 0x7a0   : > { %6850 = vmatprep.subr.bf16.mxu0 %v8985_v30  ;;  %v9022_v30 = vld [vmem:[%s12348_s4 + $0x210] ss:$8 sps:$4 sm:$0xff]  }
 0x7a2   : > { %6718 = vmatpush1.bf16.msra.mxu1 %v8980_v57  ;;  %v9030_v57 = vld [vmem:[%s12348_s4 + $0x224] ss:$8 sps:$4 sm:$0xff]  }
 0x7a3   : > { %6851 = vmatpush1.bf16.msra.mxu0 %v8983_v60  ;;  %6719 = vmatprep.subr.bf16.mxu1 %v8988_v26  ;;  %v9028_v60 = vld [vmem:[%s12348_s4 + $0x220] ss:$8 sps:$4 sm:$0xff]   ;;  %v9031_v26 = vld [vmem:[%s12348_s4 + $0x570] ss:$8 sps:$4 sm:$0xff]  }
 0x7a4   : > { %6861 = vmatprep.subr.bf16.mxu0 %v8991_v50  ;;  %v9039_v50 = vld [vmem:[%s12348_s4 + $0x584] ss:$8 sps:$4 sm:$0xff]  }
 0x7a6   : > { %6720 = vmatpush1.bf16.msra.mxu1 %v8986_v20  ;;  %6853 = vmatmul.mubr.bf16.vlgmr.msra.gmra.mrb[96].mxu0 %v5100_v21  ;;  %v9040_v20 = vld [vmem:[%s12348_s4 + $0x240] ss:$8 sps:$4 sm:$0xff]   ;;  %v9057_v21 = vld [vmem:[%s12348_s4 + $0x5b4] ss:$8 sps:$4 sm:$0xff]  }
 0x7a7   : > { %6862 = vmatpush1.bf16.msra.mxu0 %v8989_v59  ;;  %6893 = vmatprep.mubr.bf16.mxu0 %v5103_v24  ;;  %v9051_v59 = vld [vmem:[%s12348_s4 + $0x5a4] ss:$8 sps:$4 sm:$0xff]   ;;  %v9052_v24 = vld [vmem:[%s12348_s4 + $0x260] ss:$8 sps:$4 sm:$0xff]  }
 0x7a8   : > { %6721 = vmatprep.subr.bf16.mxu1 %v8994_v19  ;;  %6863 = vmatprep.subr.bf16.mxu0 %v8997_v7  ;;  %v9049_v19 = vld [vmem:[%s12348_s4 + $0x5a0] ss:$8 sps:$4 sm:$0xff]   ;;  %v9054_v7 = vld [vmem:[%s12348_s4 + $0x264] ss:$8 sps:$4 sm:$0xff]  }
 0x7aa   : > { %6722 = vmatpush1.bf16.msra.mxu1 %v8992_v43  ;;  %v9055_v43 = vld [vmem:[%s12348_s4 + $0x5b0] ss:$8 sps:$4 sm:$0xff]  }
 0x7ab   : > { %6864 = vmatpush1.bf16.msra.mxu0 %v8995_v28  ;;  %6723 = vmatprep.subr.bf16.mxu1 %v9000_v33  ;;  %v9060_v28 = vld [vmem:[%s12348_s4 + $0x274] ss:$8 sps:$4 sm:$0xff]   ;;  %v9063_v33 = vld [vmem:[%s12348_s4 + $0x5c4] ss:$8 sps:$4 sm:$0xff]  }
 0x7ac   : > { %6865 = vmatprep.subr.bf16.mxu0 %v9003_v23  ;;  %v9058_v23 = vld [vmem:[%s12348_s4 + $0x270] ss:$8 sps:$4 sm:$0xff]  }
 0x7ae   : > { %6724 = vmatpush1.bf16.msra.mxu1 %v8998_v1  ;;  %v9061_v1 = vld [vmem:[%s12348_s4 + $0x5c0] ss:$8 sps:$4 sm:$0xff]  }
 0x7af   : > { %6866 = vmatpush1.bf16.msra.mxu0 %v9001_v47  ;;  %6725 = vmatprep.subr.bf16.mxu1 %v9006_v16  ;;  %v9066_v47 = vld [vmem:[%s12348_s4 + $0x284] ss:$8 sps:$4 sm:$0xff]   ;;  %v9069_v16 = vld [vmem:[%s12348_s4 + $0x5d4] ss:$8 sps:$4 sm:$0xff]  }
 0x7b0   : > { %6867 = vmatprep.subr.bf16.mxu0 %v9009_v6  ;;  %v9064_v6 = vld [vmem:[%s12348_s4 + $0x280] ss:$8 sps:$4 sm:$0xff]  }
 0x7b2   : > { %6726 = vmatpush1.bf16.msra.mxu1 %v9004_v63  ;;  %v9072_v63 = vld [vmem:[%s12348_s4 + $0x294] ss:$8 sps:$4 sm:$0xff]  }
 0x7b3   : > { %6868 = vmatpush1.bf16.msra.mxu0 %v9007_v32  ;;  %6727 = vmatprep.subr.bf16.mxu1 %v9012_v2  ;;  %v9075_v32 = vld [vmem:[%s12348_s4 + $0x5e4] ss:$8 sps:$4 sm:$0xff]   ;;  %v9070_v2 = vld [vmem:[%s12348_s4 + $0x290] ss:$8 sps:$4 sm:$0xff]  }
 0x7b4   : > { %6869 = vmatprep.subr.bf16.mxu0 %v9015_v3  ;;  %v9078_v3 = vld [vmem:[%s12348_s4 + $0x2a4] ss:$8 sps:$4 sm:$0xff]  }
 0x7b6   : > { %6728 = vmatpush1.bf16.msra.mxu1 %v9010_v52  ;;  %v5012_v52 = vpop.permute.xlu1 %5011 }
 0x7b7   : > { %6870 = vmatpush1.bf16.msra.mxu0 %v9013_v36  ;;  %6738 = vmatprep.subr.bf16.mxu1 %v9018_v55  ;;  %v9084_v36 = vld [vmem:[%s12348_s4 + $0x2b4] ss:$8 sps:$4 sm:$0xff]   ;;  %v5028_v55 = vsel %vm1283_vm9, %v4997_v18, %v11771_v45 }
 0x7b8   : > { %6871 = vmatprep.subr.bf16.mxu0 %v9021_v25  ;;  %v5037_v25 = vsel %vm1283_vm9, %v5009_v35, %v5012_v52  ;;  %v5064_v45 = vshll.u32 %v5028_v55, 16  ;;  %v9138_v18 = vld [vmem:[%s12348_s4 + $0x6d4] ss:$8 sps:$4 sm:$0xff]   ;;  %v9136_v52 = vld [vmem:[%s12348_s4 + $0x6d0] ss:$8 sps:$4 sm:$0xff]  }
 0x7b9   : > { %6730 = vmatmul.mubr.bf16.vlgmr.msra.gmra.mrb[136].mxu1 %v5094_v11  ;;  %v9093_v11 = vld [vmem:[%s12348_s4 + $0x614] ss:$8 sps:$4 sm:$0xff]   ;;  %v9139_v35 = vld [vmem:[%s12348_s4 + $0x6e0] ss:$8 sps:$4 sm:$0xff]  }
 0x7ba   : > { %6739 = vmatpush1.bf16.msra.mxu1 %v9016_v58  ;;  %6770 = vmatprep.mubr.bf16.mxu1 %v5097_v34  ;;  %v4920_v58 = vsel %vm1283_vm9, %v4887_v29, %v11786_v10  ;;  %v5102_v10 = vsel %vm9717_vm2, %v4908_v4, %v5064_v45  ;;  %v9088_v34 = vld [vmem:[%s12348_s4 + $0x2c0] ss:$8 sps:$4 sm:$0xff]   ;;  %v4883_v29 = vrot.slane %v11432_v0, 4 }
 0x7bb   : > { %6872 = vmatpush1.bf16.msra.mxu0 %v9019_v41  ;;  %6740 = vmatprep.subr.bf16.mxu1 %v9024_v31  ;;  %v5070_v41 = vshll.u32 %v5037_v25, 16  ;;  %v11996_v31 = vpop.permute.xlu1 %5007 }
 0x7bc   : > { %6873 = vmatprep.subr.bf16.mxu0 %v9027_v38 }
 0x7bd   : > { %v5105_v38 = vsel %vm9717_vm2, %v4920_v58, %v5070_v41  ;;  %v4895_v58 = vrot.slane %v11432_v0, 7 }
 0x7be   : > { %6741 = vmatpush1.bf16.msra.mxu1 %v9022_v30  ;;  %v9091_v30 = vld [vmem:[%s12348_s4 + $0x610] ss:$8 sps:$4 sm:$0xff]  }
 0x7bf   : > { %6874 = vmatpush1.bf16.msra.mxu0 %v9025_v61  ;;  %6742 = vmatprep.subr.bf16.mxu1 %v9030_v57  ;;  %v9096_v61 = vld [vmem:[%s12348_s4 + $0x2d4] ss:$8 sps:$4 sm:$0xff]   ;;  %v9099_v57 = vld [vmem:[%s12348_s4 + $0x624] ss:$8 sps:$4 sm:$0xff]  }
 0x7c0   : > { %6875 = vmatprep.subr.bf16.mxu0 %v9033_v48  ;;  %v12020_v48 = vpop.permute.xlu1 %4885 }
 0x7c2   : > { %6743 = vmatpush1.bf16.msra.mxu1 %v9028_v60  ;;  %v9094_v60 = vld [vmem:[%s12348_s4 + $0x2d0] ss:$8 sps:$4 sm:$0xff]  }
 0x7c3   : > { %6876 = vmatpush1.bf16.msra.mxu0 %v9031_v26  ;;  %6744 = vmatprep.subr.bf16.mxu1 %v9036_v54  ;;  %v9097_v26 = vld [vmem:[%s12348_s4 + $0x620] ss:$8 sps:$4 sm:$0xff]   ;;  %v9102_v54 = vld [vmem:[%s12348_s4 + $0x2e4] ss:$8 sps:$4 sm:$0xff]  }
 0x7c4   : > { %6877 = vmatprep.subr.bf16.mxu0 %v9039_v50  ;;  %v9105_v50 = vld [vmem:[%s12348_s4 + $0x634] ss:$8 sps:$4 sm:$0xff]  }
 0x7c6   : > { %6745 = vmatpush1.bf16.msra.mxu1 %v9034_v53  ;;  %v9100_v53 = vld [vmem:[%s12348_s4 + $0x2e0] ss:$8 sps:$4 sm:$0xff]  }
 0x7c7   : > { %6878 = vmatpush1.bf16.msra.mxu0 %v9037_v46  ;;  %6746 = vmatprep.subr.bf16.mxu1 %v9042_v14  ;;  %v9103_v46 = vld [vmem:[%s12348_s4 + $0x630] ss:$8 sps:$4 sm:$0xff]   ;;  %v9108_v14 = vld [vmem:[%s12348_s4 + $0x2f4] ss:$8 sps:$4 sm:$0xff]  }
 0x7c8   : > { %6879 = vmatprep.subr.bf16.mxu0 %v9045_v8  ;;  %v4951_v8 = vpop.permute.xlu1 %4950 }
 0x7ca   : > { %6747 = vmatpush1.bf16.msra.mxu1 %v9040_v20  ;;  %v9111_v20 = vld [vmem:[%s12348_s4 + $0x644] ss:$8 sps:$4 sm:$0xff]  }
 0x7cb   : > { %6880 = vmatpush1.bf16.msra.mxu0 %v9043_v12  ;;  %6748 = vmatprep.subr.bf16.mxu1 %v9048_v13  ;;  %v4948_v12 = vrot.slane %v11456_v44, 4  ;;  %v4821_v13 = vpop.permute.xlu0 %4820  ;;  %v9114_v44 = vld [vmem:[%s12348_s4 + $0x654] ss:$8 sps:$4 sm:$0xff]  }
 0x7cc   : > { %6881 = vmatprep.subr.bf16.mxu0 %v9051_v59  ;;  %v9106_v59 = vld [vmem:[%s12348_s4 + $0x2f0] ss:$8 sps:$4 sm:$0xff]   ;;  %v5020_v55 = vpop.permute.xlu1 %5019 }
 0x7cd   : > { %v5043_v45 = vsel %vm1283_vm9, %v5017_v62, %v5020_v55  ;;  %v9204_v62 = vld [vmem:[%s12350_s6 + $0x28] sm:$0xff]  }
 0x7ce   : > { %6749 = vmatpush1.bf16.msra.mxu1 %v9046_v56  ;;  %v4977_v56 = vsel %vm1283_vm9, %v4948_v12, %v4951_v8  ;;  %v9168_v8 = vld [vmem:[%s12348_s4 + $0x774] ss:$8 sps:$4 sm:$0xff]   ;;  %v9171_v12 = vld [vmem:[%s12348_s4 + $0x784] ss:$8 sps:$4 sm:$0xff]  }
 0x7cf   : > { %6882 = vmatpush1.bf16.msra.mxu0 %v9049_v19  ;;  %6750 = vmatprep.subr.bf16.mxu1 %v9054_v7  ;;  %v4818_v19 = vrot.slane %v11417_v39, 4  ;;  %v9109_v7 = vld [vmem:[%s12348_s4 + $0x640] ss:$8 sps:$4 sm:$0xff]   ;;  %v9112_v39 = vld [vmem:[%s12348_s4 + $0x650] ss:$8 sps:$4 sm:$0xff]   ;;  %v4898_v4 = vpop.permute.xlu0 %4897 }
 0x7d0   : > { %6883 = vmatprep.subr.bf16.mxu0 %v9057_v21 }
 0x7d1   : > { %v4851_v21 = vsel %vm1283_vm9, %v4818_v19, %v4821_v13  ;;  %v9169_v13 = vld [vmem:[%s12348_s4 + $0x780] ss:$8 sps:$4 sm:$0xff]   ;;  %v9177_v19 = vld [vmem:[%s12348_s4 + $0x7a4] ss:$8 sps:$4 sm:$0xff]  }
 0x7d2   : > { %6751 = vmatpush1.bf16.msra.mxu1 %v9052_v24  ;;  %v5052_v24 = vshll.u32 %v4977_v56, 16  ;;  %v9172_v56 = vld [vmem:[%s12348_s4 + $0x790] ss:$8 sps:$4 sm:$0xff]  }
 0x7d3   : > { %6884 = vmatpush1.bf16.msra.mxu0 %v9055_v43  ;;  %6752 = vmatprep.subr.bf16.mxu1 %v9060_v28  ;;  %v9117_v28 = vld [vmem:[%s12348_s4 + $0x664] ss:$8 sps:$4 sm:$0xff]  }
 0x7d4   : > { %6885 = vmatprep.subr.bf16.mxu0 %v9063_v33  ;;  %v5096_v43 = vsel %vm9717_vm2, %v4851_v21, %v5052_v24  ;;  %v9115_v33 = vld [vmem:[%s12348_s4 + $0x660] ss:$8 sps:$4 sm:$0xff]   ;;  %v9178_v21 = vld [vmem:[%s12348_s4 + $0x7b0] ss:$8 sps:$4 sm:$0xff]  }
 0x7d5   : > { %v9193_v24 = vld [vmem:[%s12350_s6 + $0x40] sm:$0xff]  }
 0x7d6   : > { %6753 = vmatpush1.bf16.msra.mxu1 %v9058_v23  ;;  %v9120_v23 = vld [vmem:[%s12348_s4 + $0x674] ss:$8 sps:$4 sm:$0xff]  }
 0x7d7   : > { %6886 = vmatpush1.bf16.msra.mxu0 %v9061_v1  ;;  %6754 = vmatprep.subr.bf16.mxu1 %v9066_v47  ;;  %v9118_v1 = vld [vmem:[%s12348_s4 + $0x670] ss:$8 sps:$4 sm:$0xff]   ;;  %v9123_v47 = vld [vmem:[%s12348_s4 + $0x684] ss:$8 sps:$4 sm:$0xff]  }
 0x7d8   : > { %6887 = vmatprep.subr.bf16.mxu0 %v9069_v16  ;;  %v9121_v16 = vld [vmem:[%s12348_s4 + $0x680] ss:$8 sps:$4 sm:$0xff]  }
 0x7da   : > { %6755 = vmatpush1.bf16.msra.mxu1 %v9064_v6  ;;  %v9126_v6 = vld [vmem:[%s12348_s4 + $0x694] ss:$8 sps:$4 sm:$0xff]  }
 0x7db   : > { %6888 = vmatpush1.bf16.msra.mxu0 %v9067_v15  ;;  %6756 = vmatprep.subr.bf16.mxu1 %v9072_v63  ;;  %v9124_v15 = vld [vmem:[%s12348_s4 + $0x690] ss:$8 sps:$4 sm:$0xff]   ;;  %v9129_v63 = vld [vmem:[%s12348_s4 + $0x6a4] ss:$8 sps:$4 sm:$0xff]  }
 0x7dc   : > { %6889 = vmatprep.subr.bf16.mxu0 %v9075_v32  ;;  %v9127_v32 = vld [vmem:[%s12348_s4 + $0x6a0] ss:$8 sps:$4 sm:$0xff]  }
 0x7de   : > { %6757 = vmatpush1.bf16.msra.mxu1 %v9070_v2  ;;  %v9132_v2 = vld [vmem:[%s12348_s4 + $0x6b4] ss:$8 sps:$4 sm:$0xff]  }
 0x7df   : > { %6890 = vmatpush1.bf16.msra.mxu0 %v9073_v22  ;;  %6758 = vmatprep.subr.bf16.mxu1 %v9078_v3  ;;  %v9130_v22 = vld [vmem:[%s12348_s4 + $0x6b0] ss:$8 sps:$4 sm:$0xff]   ;;  %v9135_v3 = vld [vmem:[%s12348_s4 + $0x6c4] ss:$8 sps:$4 sm:$0xff]  }
 0x7e0   : > { %6891 = vmatprep.subr.bf16.mxu0 %v9081_v40  ;;  %v9133_v40 = vld [vmem:[%s12348_s4 + $0x6c0] ss:$8 sps:$4 sm:$0xff]  }
 0x7e2   : > { %6759 = vmatpush1.bf16.msra.mxu1 %v9076_v37  ;;  %v9141_v37 = vld [vmem:[%s12348_s4 + $0x6e4] ss:$8 sps:$4 sm:$0xff]  }
 0x7e3   : > { %6892 = vmatpush1.bf16.msra.mxu0 %v9079_v5  ;;  %6760 = vmatprep.subr.bf16.mxu1 %v9084_v36  ;;  %v9144_v5 = vld [vmem:[%s12348_s4 + $0x6f4] ss:$8 sps:$4 sm:$0xff]   ;;  %v5005_v36 = vrot.slane %v11487_v9, 4 }
 0x7e4   : > { %6902 = vmatprep.subr.bf16.mxu0 %v9087_v27  ;;  %v9142_v27 = vld [vmem:[%s12348_s4 + $0x6f0] ss:$8 sps:$4 sm:$0xff]  }
 0x7e5   : > { %v5034_v25 = vsel %vm1283_vm9, %v5005_v36, %v11996_v31  ;;  %v9145_v31 = vld [vmem:[%s12348_s4 + $0x700] ss:$8 sps:$4 sm:$0xff]  }
 0x7e6   : > { %6761 = vmatpush1.bf16.msra.mxu1 %v9082_v51  ;;  %6894 = vmatmul.mubr.bf16.vlgmr.msra.gmra.mrb[96].mxu0 %v5102_v10  ;;  %v9147_v51 = vld [vmem:[%s12348_s4 + $0x704] ss:$8 sps:$4 sm:$0xff]   ;;  %v5068_v41 = vshll.u32 %v5034_v25, 16  ;;  %v9150_v10 = vld [vmem:[%s12348_s4 + $0x714] ss:$8 sps:$4 sm:$0xff]  }
 0x7e7   : > { %6903 = vmatpush1.bf16.msra.mxu0 %v9085_v42  ;;  %6934 = vmatprep.mubr.bf16.mxu0 %v5105_v38  ;;  %v4916_v42 = vsel %vm1283_vm9, %v4883_v29, %v12020_v48  ;;  %v9156_v48 = vld [vmem:[%s12348_s4 + $0x734] ss:$8 sps:$4 sm:$0xff]  }
 0x7e8   : > { %6762 = vmatprep.subr.bf16.mxu1 %v9090_v17  ;;  %6904 = vmatprep.subr.bf16.mxu0 %v9093_v11  ;;  %v4928_v17 = vsel %vm1283_vm9, %v4895_v58, %v4898_v4  ;;  %v5074_v11 = vshll.u32 %v5043_v45, 16  ;;  %v5104_v38 = vsel %vm9717_vm2, %v4916_v42, %v5068_v41  ;;  %v9206_v29 = vld [vmem:[%s12350_s6 + $0x30] sm:$0xff]   ;;  %v9207_v4 = vld [vmem:[%s12350_s6 + $0x78] sm:$0xff]   ;;  %v5366_v41 = vlaneseq }
 0x7ea   : > { %6763 = vmatpush1.bf16.msra.mxu1 %v9088_v34  ;;  %v5107_v34 = vsel %vm9717_vm2, %v4928_v17, %v5074_v11  ;;  %v5367_v17 = vshrl.u32 %v5366_v41, 7  ;;  %v5364_v11 = vld [vmem:[%s12349_s5] sm:$0x3] }
 0x7eb   : > { %6905 = vmatpush1.bf16.msra.mxu0 %v9091_v30  ;;  %6764 = vmatprep.subr.bf16.mxu1 %v9096_v61  ;;  %v9148_v30 = vld [vmem:[%s12348_s4 + $0x710] ss:$8 sps:$4 sm:$0xff]   ;;  %v9153_v61 = vld [vmem:[%s12348_s4 + $0x724] ss:$8 sps:$4 sm:$0xff]  }
 0x7ec   : > { %6906 = vmatprep.subr.bf16.mxu0 %v9099_v57  ;;  %v9151_v57 = vld [vmem:[%s12348_s4 + $0x720] ss:$8 sps:$4 sm:$0xff]  }
 0x7ee   : > { %6765 = vmatpush1.bf16.msra.mxu1 %v9094_v60  ;;  %v9154_v60 = vld [vmem:[%s12348_s4 + $0x730] ss:$8 sps:$4 sm:$0xff]  }
 0x7ef   : > { %6907 = vmatpush1.bf16.msra.mxu0 %v9097_v26  ;;  %6766 = vmatprep.subr.bf16.mxu1 %v9102_v54  ;;  %v9159_v26 = vld [vmem:[%s12348_s4 + $0x744] ss:$8 sps:$4 sm:$0xff]   ;;  %v9157_v54 = vld [vmem:[%s12348_s4 + $0x740] ss:$8 sps:$4 sm:$0xff]  }
 0x7f0   : > { %6908 = vmatprep.subr.bf16.mxu0 %v9105_v50  ;;  %v9162_v50 = vld [vmem:[%s12348_s4 + $0x754] ss:$8 sps:$4 sm:$0xff]  }
 0x7f2   : > { %6767 = vmatpush1.bf16.msra.mxu1 %v9100_v53  ;;  %v9160_v53 = vld [vmem:[%s12348_s4 + $0x750] ss:$8 sps:$4 sm:$0xff]  }
 0x7f3   : > { %6909 = vmatpush1.bf16.msra.mxu0 %v9103_v46  ;;  %6768 = vmatprep.subr.bf16.mxu1 %v9108_v14  ;;  %v9165_v46 = vld [vmem:[%s12348_s4 + $0x764] ss:$8 sps:$4 sm:$0xff]   ;;  %v9163_v14 = vld [vmem:[%s12348_s4 + $0x760] ss:$8 sps:$4 sm:$0xff]  }
 0x7f4   : > { %6910 = vmatprep.subr.bf16.mxu0 %v9111_v20  ;;  %v9166_v20 = vld [vmem:[%s12348_s4 + $0x770] ss:$8 sps:$4 sm:$0xff]  }
 0x7f6   : > { %6769 = vmatpush1.bf16.msra.mxu1 %v9106_v59  ;;  %v9174_v59 = vld [vmem:[%s12348_s4 + $0x794] ss:$8 sps:$4 sm:$0xff]  }
 0x7f7   : > { %6911 = vmatpush1.bf16.msra.mxu0 %v9109_v7  ;;  %v9175_v7 = vld [vmem:[%s12348_s4 + $0x7a0] ss:$8 sps:$4 sm:$0xff]   ;;  %8331 = vmatprep.subr.bf16.mxu1 %v9193_v24 }
 0x7f8   : > { %6912 = vmatprep.subr.bf16.mxu0 %v9114_v44  ;;  %v9180_v44 = vld [vmem:[%s12348_s4 + $0x7b4] ss:$8 sps:$4 sm:$0xff]  }
 0x7f9   : > { %6771 = vmatmul.mubr.bf16.vlgmr.msra.gmra.mrb[136].mxu1 %v5096_v43  ;;  %v9195_v43 = vld [vmem:[%s12350_s6 + $0x48] sm:$0xff]  }
 0x7fb   : > { %6913 = vmatpush1.bf16.msra.mxu0 %v9112_v39  ;;  %v9194_v39 = vld [vmem:[%s12350_s6] sm:$0xff]  }
 0x7fc   : > { %6914 = vmatprep.subr.bf16.mxu0 %v9117_v28  ;;  %v9183_v28 = vld [vmem:[%s12348_s4 + $0x7c4] ss:$8 sps:$4 sm:$0xff]   ;;  %8332 = vmatpush3.bf16.msra.mxu1 %v9194_v39 }
 0x7fd   : > { %8333 = vmatprep.subr.bf16.mxu1 %v9195_v43 }
 0x7ff   : > { %6915 = vmatpush1.bf16.msra.mxu0 %v9115_v33  ;;  %v9196_v33 = vld [vmem:[%s12350_s6 + $0x8] sm:$0xff]  }
 0x800   : > { %6916 = vmatprep.subr.bf16.mxu0 %v9120_v23  ;;  %v9181_v23 = vld [vmem:[%s12348_s4 + $0x7c0] ss:$8 sps:$4 sm:$0xff]   ;;  %8334 = vmatpush3.bf16.msra.mxu1 %v9196_v33 }
 0x803   : > { %6917 = vmatpush1.bf16.msra.mxu0 %v9118_v1  ;;  %v9197_v1 = vld [vmem:[%s12350_s6 + $0x50] sm:$0xff]  }
 0x804   : > { %6918 = vmatprep.subr.bf16.mxu0 %v9123_v47  ;;  %v9186_v47 = vld [vmem:[%s12348_s4 + $0x7d4] ss:$8 sps:$4 sm:$0xff]   ;;  %8335 = vmatprep.subr.bf16.mxu1 %v9197_v1 }
 0x807   : > { %6919 = vmatpush1.bf16.msra.mxu0 %v9121_v16  ;;  %v9198_v16 = vld [vmem:[%s12350_s6 + $0x10] sm:$0xff]  }
 0x808   : > { %6920 = vmatprep.subr.bf16.mxu0 %v9126_v6  ;;  %v9184_v6 = vld [vmem:[%s12348_s4 + $0x7d0] ss:$8 sps:$4 sm:$0xff]   ;;  %8336 = vmatpush3.bf16.msra.mxu1 %v9198_v16 }
 0x80b   : > { %6921 = vmatpush1.bf16.msra.mxu0 %v9124_v15  ;;  %v9199_v15 = vld [vmem:[%s12350_s6 + $0x58] sm:$0xff]  }
 0x80c   : > { %6922 = vmatprep.subr.bf16.mxu0 %v9129_v63  ;;  %v9189_v63 = vld [vmem:[%s12348_s4 + $0x7e4] ss:$8 sps:$4 sm:$0xff]   ;;  %8337 = vmatprep.subr.bf16.mxu1 %v9199_v15 }
 0x80f   : > { %6923 = vmatpush1.bf16.msra.mxu0 %v9127_v32  ;;  %v5016_v32 = vpop.permute.xlu1 %5015 }
 0x810   : > { %6924 = vmatprep.subr.bf16.mxu0 %v9132_v2  ;;  %v9200_v2 = vld [vmem:[%s12350_s6 + $0x18] sm:$0xff]  }
 0x811   : > { %8338 = vmatpush3.bf16.msra.mxu1 %v9200_v2 }
 0x813   : > { %6925 = vmatpush1.bf16.msra.mxu0 %v9130_v22  ;;  %v9187_v22 = vld [vmem:[%s12348_s4 + $0x7e0] ss:$8 sps:$4 sm:$0xff]  }
 0x814   : > { %6926 = vmatprep.subr.bf16.mxu0 %v9135_v3  ;;  %v9201_v3 = vld [vmem:[%s12350_s6 + $0x60] sm:$0xff]  }
 0x815   : > { %8339 = vmatprep.subr.bf16.mxu1 %v9201_v3 }
 0x817   : > { %6927 = vmatpush1.bf16.msra.mxu0 %v9133_v40  ;;  %v9192_v40 = vld [vmem:[%s12348_s4 + $0x7f4] ss:$8 sps:$4 sm:$0xff]  }
 0x818   : > { %6928 = vmatprep.subr.bf16.mxu0 %v9138_v18  ;;  %v5013_v18 = vrot.slane %v11487_v9, 6  ;;  %v4891_v9 = vrot.slane %v11432_v0, 6  ;;  %v9205_v0 = vld [vmem:[%s12350_s6 + $0x70] sm:$0xff]  }
 0x81a   : > { %v5040_v36 = vsel %vm1283_vm9, %v5013_v18, %v5016_v32 }
 0x81b   : > { %6929 = vmatpush1.bf16.msra.mxu0 %v9136_v52  ;;  %v9202_v52 = vld [vmem:[%s12350_s6 + $0x20] sm:$0xff]  }
 0x81c   : > { %6930 = vmatprep.subr.bf16.mxu0 %v9141_v37  ;;  %v4894_v37 = vpop.permute.xlu1 %4893  ;;  %8340 = vmatpush3.bf16.msra.mxu1 %v9202_v52 }
 0x81d   : > { %v4924_v55 = vsel %vm1283_vm9, %v4891_v9, %v4894_v37 }
 0x81f   : > { %6931 = vmatpush1.bf16.msra.mxu0 %v9139_v35  ;;  %v9190_v35 = vld [vmem:[%s12348_s4 + $0x7f0] ss:$8 sps:$4 sm:$0xff]  }
 0x820   : > { %6932 = vmatprep.subr.bf16.mxu0 %v9144_v5  ;;  %v9203_v5 = vld [vmem:[%s12350_s6 + $0x68] sm:$0xff]  }
 0x821   : > { %8341 = vmatprep.subr.bf16.mxu1 %v9203_v5 }
 0x822   : > { %8342 = vmatpush3.bf16.msra.mxu1 %v9204_v62 }
 0x823   : > { %6933 = vmatpush1.bf16.msra.mxu0 %v9142_v27  ;;  %v5072_v27 = vshll.u32 %v5040_v36, 16  ;;  %8343 = vmatprep.subr.bf16.mxu1 %v9205_v0 }
 0x824   : > { %6943 = vmatprep.subr.bf16.mxu0 %v9147_v51 }
 0x825   : > { %v5106_v25 = vsel %vm9717_vm2, %v4924_v55, %v5072_v27 }
 0x826   : > { %6935 = vmatmul.mubr.bf16.vlgmr.msra.gmra.mrb[96].mxu0 %v5104_v38  ;;  %8344 = vmatpush3.bf16.msra.mxu1 %v9206_v29 }
 0x827   : > { %6944 = vmatpush1.bf16.msra.mxu0 %v9145_v31  ;;  %6975 = vmatprep.mubr.bf16.mxu0 %v5107_v34  ;;  %v5368_v31 = vsub.s32 0, %v5367_v17 }
 0x828   : > { %6945 = vmatprep.subr.bf16.mxu0 %v9150_v10  ;;  %8345 = vmatprep.subr.bf16.mxu1 %v9207_v4  ;;  %v5372_v10 = vsub.s32 1, %v5367_v17 }
 0x829   : > { %v5369_v38 = vrot.slane %v5364_v11, %v5368_v31 }
 0x82a   : > { %8346 = vmatpush3.bf16.msra.mxu1 %v9208_v49  ;;  %v5373_v34 = vrot.slane %v5364_v11, %v5372_v10 }
 0x82b   : > { %6946 = vmatpush1.bf16.msra.mxu0 %v9148_v30 }
 0x82c   : > { %6947 = vmatprep.subr.bf16.mxu0 %v9153_v61 }
 0x82f   : > { %6948 = vmatpush1.bf16.msra.mxu0 %v9151_v57 }
 0x830   : > { %6949 = vmatprep.subr.bf16.mxu0 %v9156_v48 }
 0x833   : > { %6950 = vmatpush1.bf16.msra.mxu0 %v9154_v60 }
 0x834   : > { %6951 = vmatprep.subr.bf16.mxu0 %v9159_v26 }
 0x837   : > { %6952 = vmatpush1.bf16.msra.mxu0 %v9157_v54 }
 0x838   : > { %6953 = vmatprep.subr.bf16.mxu0 %v9162_v50 }
 0x83b   : > { %6954 = vmatpush1.bf16.msra.mxu0 %v9160_v53 }
 0x83c   : > { %6955 = vmatprep.subr.bf16.mxu0 %v9165_v46 }
 0x83f   : > { %6956 = vmatpush1.bf16.msra.mxu0 %v9163_v14 }
 0x840   : > { %6957 = vmatprep.subr.bf16.mxu0 %v9168_v8 }
 0x843   : > { %6958 = vmatpush1.bf16.msra.mxu0 %v9166_v20 }
 0x844   : > { %6959 = vmatprep.subr.bf16.mxu0 %v9171_v12  ;;  %v7901_v12 = vld [vmem:[%s12351_s7] ss:$0 sm:$0xff] }
 0x847   : > { %6960 = vmatpush1.bf16.msra.mxu0 %v9169_v13 }
 0x848   : > { %6961 = vmatprep.subr.bf16.mxu0 %v9174_v59 }
 0x84b   : > { %6962 = vmatpush1.bf16.msra.mxu0 %v9172_v56 }
 0x84c   : > { %6963 = vmatprep.subr.bf16.mxu0 %v9177_v19 }
 0x84f   : > { %6964 = vmatpush1.bf16.msra.mxu0 %v9175_v7 }
 0x850   : > { %6965 = vmatprep.subr.bf16.mxu0 %v9180_v44 }
 0x853   : > { %6966 = vmatpush1.bf16.msra.mxu0 %v9178_v21 }
 0x854   : > { %6967 = vmatprep.subr.bf16.mxu0 %v9183_v28 }
 0x857   : > { %6968 = vmatpush1.bf16.msra.mxu0 %v9181_v23 }
 0x858   : > { %6969 = vmatprep.subr.bf16.mxu0 %v9186_v47 }
 0x85b   : > { %6970 = vmatpush1.bf16.msra.mxu0 %v9184_v6 }
 0x85c   : > { %6971 = vmatprep.subr.bf16.mxu0 %v9189_v63 }
 0x85f   : > { %6972 = vmatpush1.bf16.msra.mxu0 %v9187_v22 }
 0x860   : > { %6973 = vmatprep.subr.bf16.mxu0 %v9192_v40 }
 0x863   : > { %6974 = vmatpush1.bf16.msra.mxu0 %v9190_v35 }
 0x866   : > { %6976 = vmatmul.mubr.bf16.vlgmr.msra.gmra.mrb[96].mxu0 %v5106_v25 }
 0x8cc   : > { %v6772_v51 = vpop.f32.mrb[136].mxu1 }
 0x8cd   : > { %v6774_v45 = vpop.f32.mrb[137].mxu1  ;;  %v8609_v30 = vadd.f32 %v6772_v51, %v5369_v38 }
 0x8ce   : > { %v6776_v58 = vpop.f32.mrb[138].mxu1  ;;  %v8611_v61 = vadd.f32 %v6774_v45, %v5373_v34 }
 0x8cf   : > { %v6777_v42 = vpop.f32.mrb[139].mxu1 }
 0x939   : > { %v6977_v57 = vpop.f32.mrb[96].mxu0 }
 0x93a   : > { %v8610_v48 = vadd.f32 %v8609_v30, %v6977_v57  ;;  %v6979_v60 = vpop.f32.mrb[97].mxu0 }
 0x93b   : > { %v8612_v26 = vadd.f32 %v8611_v61, %v6979_v60  ;;  %v6981_v54 = vpop.f32.mrb[98].mxu0 }
 0x93c   : > { %v6984_v50 = vmax.f32 %v8610_v48, 0.0  ;;  %v6982_v53 = vpop.f32.mrb[99].mxu0 }
 0x93d   : > { %v6985_v46 = vmax.f32 %v8612_v26, 0.0 }
 0x93e   : > { %v6986_v8 = vpack.c.bf16 %v6984_v50, %v6984_v50 }
 0x93f   : > { %v6987_v14 = vpack.c.bf16 %v6985_v46, %v6985_v46 }
 0x941   : > { %7155 = vmatprep.mubr.bf16.mxu1 %v6987_v14 }
 0x942   : > { %7156 = vmatmul.mubr.bf16.vlgmr.msra.gmra.mrb[140].mxu1 %v6986_v8 }
 0xa15   : > { %v8347_v20 = vpop.f32.mrb[140].mxu1 }
 0xa16   : > { %v8348_v13 = vpop.f32.mrb[141].mxu1 }
 0xa17   : > { %v8349_v59 = vadd.f32 %v8348_v13, %v8347_v20  ;;  %v8350_v56 = vpop.f32.mrb[142].mxu1 }
 0xa18   : > { %v8351_v19 = vpop.f32.mrb[143].mxu1 }
 0xa19   : > { %v7158_v7 = vadd.f32 %v8349_v59, %v7901_v12 }
 0xa1b   : > { %7163 = vst [vmem:[%s853_s20] sm:$0x3] %v7158_v7 }
 0xa1c   : > { %9278 = shalt.err (!%p9275_p5)
}
 0xa1d   : > { %s9279_s24 = scalar_lea.hbm %s12300_s23, 32  ;;  %s9283_s10 = scalar_lea.hbm %s12352_s8, 64 }
 0xa1e   : > { %p9280_p7 = scmp.ne.s32.totalorder %s12300_s23, %s9279_s24  ;;  %p9284_p12 = scmp.lt.u32.totalorder %s12300_s23, %s12352_s8 }
 0xa1f   : > { %p9285_p13 = scmp.lt.u32.totalorder %s9283_s10, %s9279_s24  ;;  %p9287_p1 = scmp.lt.u32.totalorder %s9279_s24, %s12300_s23 }
 0xa20   : > { %p9281_p10 = pnand %p9280_p7, %p9417_p6 }
 0xa21   : > { %p9286_p0 = por %p9285_p13, %p9284_p12 }
 0xa22   : > { %p9282_p11 = pneg %p9281_p10 }
 0xa23   : > { %p9288_p2 = por %p9287_p1, %p9286_p0 }
 0xa25   : > { %p9289_p3 = pnand %p9288_p2, %p9282_p11 }
 0xa27   : > { %9292 = shalt.err (!%p9289_p3)
}
 0xa28   : > { %8637 = dma.vmem_to_hbm [thread:$0]  (%p9417_p6), %s12302_s21, 32, %s12300_s23, %s7165_s12  }
 0xa29 PF: > { %s7190_s22 = sand.u32 1, %s9315_s27   ;;  %p8640_p4 = pnand %p7245_p9, %p9421_p8 }
 0xa2a   : > { %s7191_s13 = scalar_lea.sflag [#allocation4], %s7190_s22 }
 0xa2b   : > { %9310 = dma.done.wait (!%p8640_p4), %s7191_s13, 32  }
 0xa2c   : > { %9312 = vsyncadd (!%p8640_p4), %s7191_s13, 4294967264  ;;  %p18_p5 = scmp.ge.s32.totalorder %s9402_s11, 4   ;;  %s12362_s27 = smov %s9319_s28 }
 0xa2d   : > { %s12363_s28 = smov %s9323_s29  ;;  %s12364_s29 = smov %s9415_s14 }
 0xa2e   : > { %s12365_s30 = smov %s9402_s11  ;;  %20 = sbr.rel (!%p18_p5) target bundleno = 3 (0x3), region = 150 }
 0xa35   :  { %7196 = vsyncpa [#allocation4], 1 }
 0xa36   :  { %7198 = vsyncpa [#allocation4 + $0x1], 1 }

</bundles_post_ra>
